<compile_context>
chip_gen: v5e
topology: v5e:2x2
jax: 0.10.0
libtpu: 0.0.40
codegen_flags: <defaults>
</compile_context>

<pallas_src>
import math
import numpy as np
import jax
import jax.numpy as jnp
from jax import lax
from jax.experimental import pallas as pl
from jax.experimental.pallas import tpu as pltpu


# ---- "opt" params (stand-in for the original `params()` config) -------------
IMAGE_SIZE = 16          # opt.image_size
RADIUS = 0.3             # opt.radius (in NDC units)
POINTS_PER_PIXEL = 4     # opt.points_per_pixel
FOV_DEG = 60.0           # FoVPerspectiveCameras default fov
N_POINTS = 128           # must be <= 128 (point index packs into 7 low mantissa bits)
N_CHANNELS = 3
CPAD = 8                 # colors padded to 8 rows for a sublane-aligned MXU operand

H = W = IMAGE_SIZE
NPIX = H * W
LANES = 128              # pixels per in-kernel tile (lane dimension)
N_TILES = NPIX // LANES
INT32_MAX = np.int32(np.iinfo(np.int32).max)


# ----------------------------- Pallas kernel ---------------------------------
def _rasterize_composite_kernel(pix_ref, pts_ref, key_ref, col_ref, out_ref):
    """One batch element per grid step.

    pix_ref : VMEM (2, NPIX)            f32  -- row 0 = px, row 1 = py (NDC pixel centers)
    pts_ref : VMEM (1, N_POINTS, 2)     f32  -- [x_ndc, y_ndc] per point
    key_ref : VMEM (1, N_POINTS, 1)     i32  -- index-packed depth keys (INT32_MAX if z<=0)
    col_ref : VMEM (1, CPAD, N_POINTS)  f32  -- colors, padded to 8 rows, lane-dense
    out_ref : VMEM (1, N_CHANNELS, NPIX) f32 -- lane-dense composited image

    Points live on sublanes (128 rows), pixels on lanes (128 cols): every carried array
    is a stack of full (8,128) vregs; there is no serial per-point loop and no SMEM
    scalar traffic.
    """
    x = pts_ref[0, :, 0:1]                                # (N, 1)
    y = pts_ref[0, :, 1:2]                                # (N, 1)
    key_base = key_ref[0]                                 # (N, 1) int32
    colors_mat = col_ref[0]                               # (CPAD, N)

    r2 = jnp.float32(RADIUS * RADIUS)
    inv_r2 = jnp.float32(1.0 / (RADIUS * RADIUS))

    # Unrolled pixel-tile loop (tile axis folded out of the grid to cut per-step overhead).
    for t in range(N_TILES):
        lo = t * LANES
        px = pix_ref[0:1, lo:lo + LANES]                  # (1, LANES)
        py = pix_ref[1:2, lo:lo + LANES]

        # All-pairs (point, pixel) distance / weight / depth-key in one vectorized pass.
        dx = x - px                                       # (N, LANES)
        dy = y - py
        d2 = dx * dx + dy * dy
        hit = d2 < r2
        # Note: points behind the camera (z<=0) already have key_base == INT32_MAX, so
        # they can never win a selection round while a valid point remains, and the
        # kmin < INT32_MAX guard zeroes their weight otherwise -- no z mask needed here.
        w_all = jnp.where(hit, 1.0 - d2 * inv_r2, 0.0)    # compositing weights
        key = jnp.where(hit, key_base, INT32_MAX)         # int32 depth keys

        transmit = jnp.ones((1, LANES), jnp.float32)
        # Deferred color application: sel_acc[j, p] accumulates the composited weight of
        # point j at pixel p; colors applied once at the end with a single MXU matmul.
        sel_acc = jnp.zeros((N_POINTS, LANES), jnp.float32)

        # K nearest-in-depth points per pixel, front-to-back alpha compositing (unrolled).
        for _ in range(POINTS_PER_PIXEL):
            kmin = jnp.min(key, axis=0, keepdims=True)    # (1, LANES) i32
            mask = key == kmin                            # exactly one-hot among valid keys
            wk = jnp.sum(jnp.where(mask, w_all, 0.0), axis=0, keepdims=True)
            wk = jnp.where(kmin < INT32_MAX, wk, 0.0)     # no valid point left at this pixel
            contrib = wk * transmit
            sel_acc = sel_acc + jnp.where(mask, contrib, 0.0)
            transmit = transmit * (1.0 - wk)
            key = jnp.where(mask, INT32_MAX, key)         # knock out the winner

        # image_c[p] = sum_j sel_acc[j, p] * color_c[j]  -- one MXU pass, lane-dense store.
        img = jnp.dot(colors_mat, sel_acc, preferred_element_type=jnp.float32)  # (CPAD, LANES)
        out_ref[0, :, lo:lo + LANES] = img[0:N_CHANNELS, :]


def render_pallas(pix, pts_xy, keys, colors_t):
    """pix: (2, NPIX) f32; pts_xy: (B, N, 2) f32; keys: (B, N, 1) i32;
    colors_t: (B, CPAD, N) f32  ->  (B, N_CHANNELS, NPIX) f32."""
    B = pts_xy.shape[0]
    return pl.pallas_call(
        _rasterize_composite_kernel,
        out_shape=jax.ShapeDtypeStruct((B, N_CHANNELS, NPIX), jnp.float32),
        grid=(B,),
        in_specs=[
            pl.BlockSpec((2, NPIX), lambda b: (0, 0)),
            pl.BlockSpec((1, N_POINTS, 2), lambda b: (b, 0, 0)),
            pl.BlockSpec((1, N_POINTS, 1), lambda b: (b, 0, 0)),
            pl.BlockSpec((1, CPAD, N_POINTS), lambda b: (b, 0, 0)),
        ],
        out_specs=pl.BlockSpec((1, N_CHANNELS, NPIX), lambda b: (b, 0, 0)),
        compiler_params=pltpu.CompilerParams(
            dimension_semantics=("parallel",)),
    )(pix, pts_xy, keys, colors_t)


# ------------------------- camera / projection glue --------------------------
def _normalize(v):
    return v / jnp.linalg.norm(v, axis=-1, keepdims=True)


def look_at_view_transform(eye):
    """PyTorch3D look_at_view_transform(eye=eye, at=origin, up=+Y)."""
    at = jnp.zeros_like(eye)
    up = jnp.broadcast_to(jnp.array([0.0, 1.0, 0.0], jnp.float32), eye.shape)
    z_axis = _normalize(at - eye)
    x_axis = _normalize(jnp.cross(up, z_axis))
    y_axis = jnp.cross(z_axis, x_axis)
    R = jnp.stack([x_axis, y_axis, z_axis], axis=-1)   # columns are camera axes
    T = -jnp.einsum("bij,bi->bj", R, eye)              # T = -(R^T eye)
    return R, T


def project_to_ndc(points, R, T):
    """World -> view (row-vector convention) -> FoV perspective NDC."""
    pv = jnp.einsum("bni,bij->bnj", points, R) + T[:, None, :]
    s = 1.0 / math.tan(math.radians(FOV_DEG) / 2.0)
    z = pv[..., 2]
    x_ndc = s * pv[..., 0] / z
    y_ndc = s * pv[..., 1] / z
    return jnp.stack([x_ndc, y_ndc], axis=-1), z


def packed_depth_keys(z):
    """(B, N) view-space depths -> int32 keys that are order-preserving for z>0:
    bitcast(z) with the low 7 mantissa bits replaced by the point index (lowest-index
    tie-break for free; selection depth perturbed by <= 2^-17 relative, weights
    unchanged).  z<=0 maps to INT32_MAX (never selected)."""
    zi = lax.bitcast_convert_type(z.astype(jnp.float32), jnp.int32)
    idx = jnp.arange(N_POINTS, dtype=jnp.int32)
    packed = (zi & jnp.int32(-128)) | idx
    return jnp.where(z > 0.0, packed, INT32_MAX)


def _pixel_centers():
    """PyTorch3D NDC pixel centers (+X left, +Y up), row-major flat pixel order."""
    cols = np.arange(W, dtype=np.float64)
    rows = np.arange(H, dtype=np.float64)
    pxg = 1.0 - (2.0 * cols + 1.0) / W
    pyg = 1.0 - (2.0 * rows + 1.0) / H
    px = np.broadcast_to(pxg[None, :], (H, W)).reshape(-1)
    py = np.broadcast_to(pyg[:, None], (H, W)).reshape(-1)
    return jnp.asarray(np.stack([px, py], axis=0), jnp.float32)   # (2, NPIX)


# ------------------------------- Renderer ------------------------------------
class Renderer:
    """JAX/Pallas port of the PyTorch3D-based Renderer module."""

    def __init__(self, colors):
        self.image_size = IMAGE_SIZE
        self.radius = RADIUS
        self.points_per_pixel = POINTS_PER_PIXEL
        self.colors = colors                                   # (B, N, C) point features
        B = colors.shape[0]
        # Lane-dense (B, CPAD, N) colors for the MXU finalize (padded 3 -> 8 rows).
        ct = jnp.transpose(colors.astype(jnp.float32), (0, 2, 1))
        self._colors_t = jnp.zeros((B, CPAD, N_POINTS), jnp.float32).at[
            :, :N_CHANNELS, :].set(ct)
        self._pix = _pixel_centers()                            # (2, NPIX)

    def __call__(self, points, eye):
        B = points.shape[0]
        R, T = look_at_view_transform(eye)
        xy_ndc, z = project_to_ndc(points, R, T)                # (B, N, 2), (B, N)
        keys = packed_depth_keys(z)[..., None]                  # (B, N, 1) int32

        out = render_pallas(self._pix, xy_ndc, keys, self._colors_t)   # (B, C, NPIX)
        images = out.reshape(B, N_CHANNELS, H, W).transpose(0, 2, 3, 1)  # (B, H, W, C)
        return images


# ------------------------- pure-JAX reference check --------------------------
def reference_render(points, eye, colors):
    """Same rasterize+alpha-composite math in plain JAX.  Uses the same index-packed
    depth keys for ordering (ordering quantized by <= 2^-17 relative vs exact z;
    weights, coverage and compositing are exact)."""
    R, T = look_at_view_transform(eye)
    xy, z = project_to_ndc(points, R, T)
    keys = packed_depth_keys(z)                                 # (B, N) int32
    pix = _pixel_centers()
    px, py = pix[0], pix[1]                                     # (NPIX,)

    def per_batch(xy_b, key_b, col_b):
        d2 = (px[:, None] - xy_b[None, :, 0]) ** 2 + (py[:, None] - xy_b[None, :, 1]) ** 2
        inside = d2 < RADIUS ** 2
        kmask = jnp.where(inside, key_b[None, :], INT32_MAX)
        neg, idx = lax.top_k(-kmask, POINTS_PER_PIXEL)          # smallest keys, front-to-back
        kk = -neg
        dk = jnp.take_along_axis(d2, idx, axis=1)
        ck = col_b[idx]
        valid = kk < INT32_MAX
        w = jnp.where(valid, 1.0 - dk / (RADIUS ** 2), 0.0)
        trans = jnp.cumprod(1.0 - w, axis=1)
        trans = jnp.concatenate([jnp.ones((w.shape[0], 1)), trans[:, :-1]], axis=1)
        img = jnp.sum((w * trans)[..., None] * ck, axis=1)
        return img.reshape(H, W, N_CHANNELS)

    return jax.vmap(per_batch)(xy, keys, colors)


# ---------------------------------- main --------------------------------------
if __name__ == "__main__":
    key = jax.random.PRNGKey(0)
    kp, kc = jax.random.split(key, 2)
    B = 2
    points = jax.random.uniform(kp, (B, N_POINTS, 3), jnp.float32, -0.5, 0.5)
    colors = jax.random.uniform(kc, (B, N_POINTS, N_CHANNELS), jnp.float32)
    eye = jnp.array([[2.0, 1.0, 2.0], [-1.8, 1.2, 2.2]], jnp.float32)

    renderer = Renderer(colors)
    images = jax.block_until_ready(renderer(points, eye))

    ref = reference_render(points, eye, colors)
    err = float(jnp.max(jnp.abs(images - ref)))

    assert images.shape == (B, H, W, N_CHANNELS), images.shape
    assert np.isfinite(np.asarray(images)).all()
    assert err < 1e-3, f"max abs err vs JAX reference: {err}"
    print("KERNEL_OK")
</pallas_src>

<mosaic_0001>
module attributes {stable_mosaic.version = 11 : i64} {
  func.func @_rasterize_composite_kernel(%arg0: i32, %arg1: memref<2x256xf32, #tpu.memory_space<vmem>>, %arg2: memref<1x128x2xf32, #tpu.memory_space<vmem>>, %arg3: memref<1x128x1xi32, #tpu.memory_space<vmem>>, %arg4: memref<1x8x128xf32, #tpu.memory_space<vmem>>, %arg5: memref<1x3x256xf32, #tpu.memory_space<vmem>>) attributes {dimension_semantics = [#tpu.dimension_semantics<parallel>], iteration_bounds = array<i64: 2>, scalar_prefetch = 0 : i64, scratch_operands = 0 : i64, tpu.core_type = #tpu.core_type<tc>, window_params = [{pipeline_mode = #tpu.pipeline_mode<synchronous>, transform_indices = @transform_0, window_bounds = array<i64: 2, 256>}, {transform_indices = @transform_1, window_bounds = array<i64: 1, 128, 2>}, {transform_indices = @transform_2, window_bounds = array<i64: 1, 128, 1>}, {transform_indices = @transform_3, window_bounds = array<i64: 1, 8, 128>}, {transform_indices = @transform_4, window_bounds = array<i64: 1, 3, 256>}]} {
    %c0 = arith.constant 0 : index
    %c0_0 = arith.constant 0 : index
    %c0_1 = arith.constant 0 : index
    %0 = vector.load %arg2[%c0, %c0_0, %c0_1] : memref<1x128x2xf32, #tpu.memory_space<vmem>>, vector<1x128x1xf32>
    %1 = vector.shape_cast %0 : vector<1x128x1xf32> to vector<128x1xf32>
    %c0_2 = arith.constant 0 : index
    %c0_3 = arith.constant 0 : index
    %c1 = arith.constant 1 : index
    %2 = vector.load %arg2[%c0_2, %c0_3, %c1] : memref<1x128x2xf32, #tpu.memory_space<vmem>>, vector<1x128x1xf32>
    %3 = vector.shape_cast %2 : vector<1x128x1xf32> to vector<128x1xf32>
    %c0_4 = arith.constant 0 : index
    %c0_5 = arith.constant 0 : index
    %c0_6 = arith.constant 0 : index
    %4 = vector.load %arg3[%c0_4, %c0_5, %c0_6] : memref<1x128x1xi32, #tpu.memory_space<vmem>>, vector<1x128x1xi32>
    %5 = vector.shape_cast %4 : vector<1x128x1xi32> to vector<128x1xi32>
    %c0_7 = arith.constant 0 : index
    %c0_8 = arith.constant 0 : index
    %c0_9 = arith.constant 0 : index
    %6 = vector.load %arg4[%c0_7, %c0_8, %c0_9] : memref<1x8x128xf32, #tpu.memory_space<vmem>>, vector<1x8x128xf32>
    %7 = vector.shape_cast %6 : vector<1x8x128xf32> to vector<8x128xf32>
    %c0_10 = arith.constant 0 : index
    %c0_11 = arith.constant 0 : index
    %8 = vector.load %arg1[%c0_10, %c0_11] : memref<2x256xf32, #tpu.memory_space<vmem>>, vector<1x128xf32>
    %c1_12 = arith.constant 1 : index
    %c0_13 = arith.constant 0 : index
    %9 = vector.load %arg1[%c1_12, %c0_13] : memref<2x256xf32, #tpu.memory_space<vmem>>, vector<1x128xf32>
    %10 = vector.broadcast %1 : vector<128x1xf32> to vector<128x128xf32>
    %11 = vector.broadcast %8 : vector<1x128xf32> to vector<128x128xf32>
    %12 = arith.subf %10, %11 : vector<128x128xf32>
    %13 = vector.broadcast %3 : vector<128x1xf32> to vector<128x128xf32>
    %14 = vector.broadcast %9 : vector<1x128xf32> to vector<128x128xf32>
    %15 = arith.subf %13, %14 : vector<128x128xf32>
    %16 = arith.mulf %12, %12 : vector<128x128xf32>
    %17 = arith.mulf %15, %15 : vector<128x128xf32>
    %18 = arith.addf %16, %17 : vector<128x128xf32>
    %cst = arith.constant 9.000000e-02 : f32
    %19 = vector.broadcast %cst : f32 to vector<128x128xf32>
    %20 = arith.cmpf olt, %18, %19 : vector<128x128xf32>
    %cst_14 = arith.constant 11.1111107 : f32
    %21 = vector.broadcast %cst_14 : f32 to vector<128x128xf32>
    %22 = arith.mulf %18, %21 : vector<128x128xf32>
    %cst_15 = arith.constant 1.000000e+00 : f32
    %23 = vector.broadcast %cst_15 : f32 to vector<128x128xf32>
    %24 = arith.subf %23, %22 : vector<128x128xf32>
    %cst_16 = arith.constant 0.000000e+00 : f32
    %25 = vector.broadcast %cst_16 : f32 to vector<128x128xf32>
    %26 = arith.select %20, %24, %25 : vector<128x128xi1>, vector<128x128xf32>
    %c2147483647_i32 = arith.constant 2147483647 : i32
    %27 = vector.shape_cast %5 : vector<128x1xi32> to vector<128x1xi32>
    %28 = vector.broadcast %27 : vector<128x1xi32> to vector<128x128xi32>
    %29 = vector.broadcast %c2147483647_i32 : i32 to vector<128x128xi32>
    %30 = arith.select %20, %28, %29 : vector<128x128xi1>, vector<128x128xi32>
    %cst_17 = arith.constant 1.000000e+00 : f32
    %31 = vector.broadcast %cst_17 : f32 to vector<1x128xf32>
    %cst_18 = arith.constant 0.000000e+00 : f32
    %32 = vector.broadcast %cst_18 : f32 to vector<128x128xf32>
    %cst_19 = arith.constant dense<2147483647> : vector<128xi32>
    %33 = vector.multi_reduction <minsi>, %30, %cst_19 [0] : vector<128x128xi32> to vector<128xi32>
    %34 = vector.shape_cast %33 : vector<128xi32> to vector<1x128xi32>
    %35 = vector.broadcast %34 : vector<1x128xi32> to vector<128x128xi32>
    %36 = arith.cmpi eq, %30, %35 : vector<128x128xi32>
    %cst_20 = arith.constant 0.000000e+00 : f32
    %37 = vector.broadcast %cst_20 : f32 to vector<128x128xf32>
    %38 = arith.select %36, %26, %37 : vector<128x128xi1>, vector<128x128xf32>
    %cst_21 = arith.constant dense<0.000000e+00> : vector<128xf32>
    %39 = vector.multi_reduction <add>, %38, %cst_21 [0] : vector<128x128xf32> to vector<128xf32>
    %40 = vector.shape_cast %39 : vector<128xf32> to vector<1x128xf32>
    %c2147483647_i32_22 = arith.constant 2147483647 : i32
    %41 = vector.broadcast %c2147483647_i32_22 : i32 to vector<1x128xi32>
    %42 = arith.cmpi slt, %34, %41 : vector<1x128xi32>
    %cst_23 = arith.constant 0.000000e+00 : f32
    %43 = vector.broadcast %cst_23 : f32 to vector<1x128xf32>
    %44 = arith.select %42, %40, %43 : vector<1x128xi1>, vector<1x128xf32>
    %45 = arith.mulf %44, %31 : vector<1x128xf32>
    %cst_24 = arith.constant 0.000000e+00 : f32
    %46 = vector.shape_cast %45 : vector<1x128xf32> to vector<1x128xf32>
    %47 = vector.broadcast %46 : vector<1x128xf32> to vector<128x128xf32>
    %48 = vector.broadcast %cst_24 : f32 to vector<128x128xf32>
    %49 = arith.select %36, %47, %48 : vector<128x128xi1>, vector<128x128xf32>
    %50 = arith.addf %32, %49 : vector<128x128xf32>
    %cst_25 = arith.constant 1.000000e+00 : f32
    %51 = vector.broadcast %cst_25 : f32 to vector<1x128xf32>
    %52 = arith.subf %51, %44 : vector<1x128xf32>
    %53 = arith.mulf %31, %52 : vector<1x128xf32>
    %c2147483647_i32_26 = arith.constant 2147483647 : i32
    %54 = vector.broadcast %c2147483647_i32_26 : i32 to vector<128x128xi32>
    %55 = arith.select %36, %54, %30 : vector<128x128xi1>, vector<128x128xi32>
    %cst_27 = arith.constant dense<2147483647> : vector<128xi32>
    %56 = vector.multi_reduction <minsi>, %55, %cst_27 [0] : vector<128x128xi32> to vector<128xi32>
    %57 = vector.shape_cast %56 : vector<128xi32> to vector<1x128xi32>
    %58 = vector.broadcast %57 : vector<1x128xi32> to vector<128x128xi32>
    %59 = arith.cmpi eq, %55, %58 : vector<128x128xi32>
    %cst_28 = arith.constant 0.000000e+00 : f32
    %60 = vector.broadcast %cst_28 : f32 to vector<128x128xf32>
    %61 = arith.select %59, %26, %60 : vector<128x128xi1>, vector<128x128xf32>
    %cst_29 = arith.constant dense<0.000000e+00> : vector<128xf32>
    %62 = vector.multi_reduction <add>, %61, %cst_29 [0] : vector<128x128xf32> to vector<128xf32>
    %63 = vector.shape_cast %62 : vector<128xf32> to vector<1x128xf32>
    %c2147483647_i32_30 = arith.constant 2147483647 : i32
    %64 = vector.broadcast %c2147483647_i32_30 : i32 to vector<1x128xi32>
    %65 = arith.cmpi slt, %57, %64 : vector<1x128xi32>
    %cst_31 = arith.constant 0.000000e+00 : f32
    %66 = vector.broadcast %cst_31 : f32 to vector<1x128xf32>
    %67 = arith.select %65, %63, %66 : vector<1x128xi1>, vector<1x128xf32>
    %68 = arith.mulf %67, %53 : vector<1x128xf32>
    %cst_32 = arith.constant 0.000000e+00 : f32
    %69 = vector.shape_cast %68 : vector<1x128xf32> to vector<1x128xf32>
    %70 = vector.broadcast %69 : vector<1x128xf32> to vector<128x128xf32>
    %71 = vector.broadcast %cst_32 : f32 to vector<128x128xf32>
    %72 = arith.select %59, %70, %71 : vector<128x128xi1>, vector<128x128xf32>
    %73 = arith.addf %50, %72 : vector<128x128xf32>
    %cst_33 = arith.constant 1.000000e+00 : f32
    %74 = vector.broadcast %cst_33 : f32 to vector<1x128xf32>
    %75 = arith.subf %74, %67 : vector<1x128xf32>
    %76 = arith.mulf %53, %75 : vector<1x128xf32>
    %c2147483647_i32_34 = arith.constant 2147483647 : i32
    %77 = vector.broadcast %c2147483647_i32_34 : i32 to vector<128x128xi32>
    %78 = arith.select %59, %77, %55 : vector<128x128xi1>, vector<128x128xi32>
    %cst_35 = arith.constant dense<2147483647> : vector<128xi32>
    %79 = vector.multi_reduction <minsi>, %78, %cst_35 [0] : vector<128x128xi32> to vector<128xi32>
    %80 = vector.shape_cast %79 : vector<128xi32> to vector<1x128xi32>
    %81 = vector.broadcast %80 : vector<1x128xi32> to vector<128x128xi32>
    %82 = arith.cmpi eq, %78, %81 : vector<128x128xi32>
    %cst_36 = arith.constant 0.000000e+00 : f32
    %83 = vector.broadcast %cst_36 : f32 to vector<128x128xf32>
    %84 = arith.select %82, %26, %83 : vector<128x128xi1>, vector<128x128xf32>
    %cst_37 = arith.constant dense<0.000000e+00> : vector<128xf32>
    %85 = vector.multi_reduction <add>, %84, %cst_37 [0] : vector<128x128xf32> to vector<128xf32>
    %86 = vector.shape_cast %85 : vector<128xf32> to vector<1x128xf32>
    %c2147483647_i32_38 = arith.constant 2147483647 : i32
    %87 = vector.broadcast %c2147483647_i32_38 : i32 to vector<1x128xi32>
    %88 = arith.cmpi slt, %80, %87 : vector<1x128xi32>
    %cst_39 = arith.constant 0.000000e+00 : f32
    %89 = vector.broadcast %cst_39 : f32 to vector<1x128xf32>
    %90 = arith.select %88, %86, %89 : vector<1x128xi1>, vector<1x128xf32>
    %91 = arith.mulf %90, %76 : vector<1x128xf32>
    %cst_40 = arith.constant 0.000000e+00 : f32
    %92 = vector.shape_cast %91 : vector<1x128xf32> to vector<1x128xf32>
    %93 = vector.broadcast %92 : vector<1x128xf32> to vector<128x128xf32>
    %94 = vector.broadcast %cst_40 : f32 to vector<128x128xf32>
    %95 = arith.select %82, %93, %94 : vector<128x128xi1>, vector<128x128xf32>
    %96 = arith.addf %73, %95 : vector<128x128xf32>
    %cst_41 = arith.constant 1.000000e+00 : f32
    %97 = vector.broadcast %cst_41 : f32 to vector<1x128xf32>
    %98 = arith.subf %97, %90 : vector<1x128xf32>
    %99 = arith.mulf %76, %98 : vector<1x128xf32>
    %c2147483647_i32_42 = arith.constant 2147483647 : i32
    %100 = vector.broadcast %c2147483647_i32_42 : i32 to vector<128x128xi32>
    %101 = arith.select %82, %100, %78 : vector<128x128xi1>, vector<128x128xi32>
    %cst_43 = arith.constant dense<2147483647> : vector<128xi32>
    %102 = vector.multi_reduction <minsi>, %101, %cst_43 [0] : vector<128x128xi32> to vector<128xi32>
    %103 = vector.shape_cast %102 : vector<128xi32> to vector<1x128xi32>
    %104 = vector.broadcast %103 : vector<1x128xi32> to vector<128x128xi32>
    %105 = arith.cmpi eq, %101, %104 : vector<128x128xi32>
    %cst_44 = arith.constant 0.000000e+00 : f32
    %106 = vector.broadcast %cst_44 : f32 to vector<128x128xf32>
    %107 = arith.select %105, %26, %106 : vector<128x128xi1>, vector<128x128xf32>
    %cst_45 = arith.constant dense<0.000000e+00> : vector<128xf32>
    %108 = vector.multi_reduction <add>, %107, %cst_45 [0] : vector<128x128xf32> to vector<128xf32>
    %109 = vector.shape_cast %108 : vector<128xf32> to vector<1x128xf32>
    %c2147483647_i32_46 = arith.constant 2147483647 : i32
    %110 = vector.broadcast %c2147483647_i32_46 : i32 to vector<1x128xi32>
    %111 = arith.cmpi slt, %103, %110 : vector<1x128xi32>
    %cst_47 = arith.constant 0.000000e+00 : f32
    %112 = vector.broadcast %cst_47 : f32 to vector<1x128xf32>
    %113 = arith.select %111, %109, %112 : vector<1x128xi1>, vector<1x128xf32>
    %114 = arith.mulf %113, %99 : vector<1x128xf32>
    %cst_48 = arith.constant 0.000000e+00 : f32
    %115 = vector.shape_cast %114 : vector<1x128xf32> to vector<1x128xf32>
    %116 = vector.broadcast %115 : vector<1x128xf32> to vector<128x128xf32>
    %117 = vector.broadcast %cst_48 : f32 to vector<128x128xf32>
    %118 = arith.select %105, %116, %117 : vector<128x128xi1>, vector<128x128xf32>
    %119 = arith.addf %96, %118 : vector<128x128xf32>
    %cst_49 = arith.constant dense<0.000000e+00> : vector<8x128xf32>
    %120 = tpu.matmul %7, %119, %cst_49 {dimension_numbers = #tpu.dot_dimension_numbers<[1], [0], [0], [1], [0, 0, 1, 1], [], []>} : vector<8x128xf32>, vector<128x128xf32>, vector<8x128xf32> -> vector<8x128xf32>
    %121 = vector.extract_strided_slice %120 {offsets = [0, 0], sizes = [3, 128], strides = [1, 1]} : vector<8x128xf32> to vector<3x128xf32>
    %c0_50 = arith.constant 0 : index
    %c0_51 = arith.constant 0 : index
    %c0_52 = arith.constant 0 : index
    %122 = vector.load %arg5[%c0_50, %c0_51, %c0_52] : memref<1x3x256xf32, #tpu.memory_space<vmem>>, vector<1x3x128xf32>
    %123 = vector.shape_cast %122 : vector<1x3x128xf32> to vector<3x128xf32>
    %124 = vector.shape_cast %121 : vector<3x128xf32> to vector<1x3x128xf32>
    tpu.vector_store %arg5[%c0_50, %c0_51, %c0_52], %124 {strides = array<i32>} : memref<1x3x256xf32, #tpu.memory_space<vmem>>, vector<1x3x128xf32>,
    %c0_53 = arith.constant 0 : index
    %c128 = arith.constant 128 : index
    %125 = vector.load %arg1[%c0_53, %c128] : memref<2x256xf32, #tpu.memory_space<vmem>>, vector<1x128xf32>
    %c1_54 = arith.constant 1 : index
    %c128_55 = arith.constant 128 : index
    %126 = vector.load %arg1[%c1_54, %c128_55] : memref<2x256xf32, #tpu.memory_space<vmem>>, vector<1x128xf32>
    %127 = vector.broadcast %1 : vector<128x1xf32> to vector<128x128xf32>
    %128 = vector.broadcast %125 : vector<1x128xf32> to vector<128x128xf32>
    %129 = arith.subf %127, %128 : vector<128x128xf32>
    %130 = vector.broadcast %3 : vector<128x1xf32> to vector<128x128xf32>
    %131 = vector.broadcast %126 : vector<1x128xf32> to vector<128x128xf32>
    %132 = arith.subf %130, %131 : vector<128x128xf32>
    %133 = arith.mulf %129, %129 : vector<128x128xf32>
    %134 = arith.mulf %132, %132 : vector<128x128xf32>
    %135 = arith.addf %133, %134 : vector<128x128xf32>
    %cst_56 = arith.constant 9.000000e-02 : f32
    %136 = vector.broadcast %cst_56 : f32 to vector<128x128xf32>
    %137 = arith.cmpf olt, %135, %136 : vector<128x128xf32>
    %cst_57 = arith.constant 11.1111107 : f32
    %138 = vector.broadcast %cst_57 : f32 to vector<128x128xf32>
    %139 = arith.mulf %135, %138 : vector<128x128xf32>
    %cst_58 = arith.constant 1.000000e+00 : f32
    %140 = vector.broadcast %cst_58 : f32 to vector<128x128xf32>
    %141 = arith.subf %140, %139 : vector<128x128xf32>
    %cst_59 = arith.constant 0.000000e+00 : f32
    %142 = vector.broadcast %cst_59 : f32 to vector<128x128xf32>
    %143 = arith.select %137, %141, %142 : vector<128x128xi1>, vector<128x128xf32>
    %c2147483647_i32_60 = arith.constant 2147483647 : i32
    %144 = vector.shape_cast %5 : vector<128x1xi32> to vector<128x1xi32>
    %145 = vector.broadcast %144 : vector<128x1xi32> to vector<128x128xi32>
    %146 = vector.broadcast %c2147483647_i32_60 : i32 to vector<128x128xi32>
    %147 = arith.select %137, %145, %146 : vector<128x128xi1>, vector<128x128xi32>
    %cst_61 = arith.constant 1.000000e+00 : f32
    %148 = vector.broadcast %cst_61 : f32 to vector<1x128xf32>
    %cst_62 = arith.constant 0.000000e+00 : f32
    %149 = vector.broadcast %cst_62 : f32 to vector<128x128xf32>
    %cst_63 = arith.constant dense<2147483647> : vector<128xi32>
    %150 = vector.multi_reduction <minsi>, %147, %cst_63 [0] : vector<128x128xi32> to vector<128xi32>
    %151 = vector.shape_cast %150 : vector<128xi32> to vector<1x128xi32>
    %152 = vector.broadcast %151 : vector<1x128xi32> to vector<128x128xi32>
    %153 = arith.cmpi eq, %147, %152 : vector<128x128xi32>
    %cst_64 = arith.constant 0.000000e+00 : f32
    %154 = vector.broadcast %cst_64 : f32 to vector<128x128xf32>
    %155 = arith.select %153, %143, %154 : vector<128x128xi1>, vector<128x128xf32>
    %cst_65 = arith.constant dense<0.000000e+00> : vector<128xf32>
    %156 = vector.multi_reduction <add>, %155, %cst_65 [0] : vector<128x128xf32> to vector<128xf32>
    %157 = vector.shape_cast %156 : vector<128xf32> to vector<1x128xf32>
    %c2147483647_i32_66 = arith.constant 2147483647 : i32
    %158 = vector.broadcast %c2147483647_i32_66 : i32 to vector<1x128xi32>
    %159 = arith.cmpi slt, %151, %158 : vector<1x128xi32>
    %cst_67 = arith.constant 0.000000e+00 : f32
    %160 = vector.broadcast %cst_67 : f32 to vector<1x128xf32>
    %161 = arith.select %159, %157, %160 : vector<1x128xi1>, vector<1x128xf32>
    %162 = arith.mulf %161, %148 : vector<1x128xf32>
    %cst_68 = arith.constant 0.000000e+00 : f32
    %163 = vector.shape_cast %162 : vector<1x128xf32> to vector<1x128xf32>
    %164 = vector.broadcast %163 : vector<1x128xf32> to vector<128x128xf32>
    %165 = vector.broadcast %cst_68 : f32 to vector<128x128xf32>
    %166 = arith.select %153, %164, %165 : vector<128x128xi1>, vector<128x128xf32>
    %167 = arith.addf %149, %166 : vector<128x128xf32>
    %cst_69 = arith.constant 1.000000e+00 : f32
    %168 = vector.broadcast %cst_69 : f32 to vector<1x128xf32>
    %169 = arith.subf %168, %161 : vector<1x128xf32>
    %170 = arith.mulf %148, %169 : vector<1x128xf32>
    %c2147483647_i32_70 = arith.constant 2147483647 : i32
    %171 = vector.broadcast %c2147483647_i32_70 : i32 to vector<128x128xi32>
    %172 = arith.select %153, %171, %147 : vector<128x128xi1>, vector<128x128xi32>
    %cst_71 = arith.constant dense<2147483647> : vector<128xi32>
    %173 = vector.multi_reduction <minsi>, %172, %cst_71 [0] : vector<128x128xi32> to vector<128xi32>
    %174 = vector.shape_cast %173 : vector<128xi32> to vector<1x128xi32>
    %175 = vector.broadcast %174 : vector<1x128xi32> to vector<128x128xi32>
    %176 = arith.cmpi eq, %172, %175 : vector<128x128xi32>
    %cst_72 = arith.constant 0.000000e+00 : f32
    %177 = vector.broadcast %cst_72 : f32 to vector<128x128xf32>
    %178 = arith.select %176, %143, %177 : vector<128x128xi1>, vector<128x128xf32>
    %cst_73 = arith.constant dense<0.000000e+00> : vector<128xf32>
    %179 = vector.multi_reduction <add>, %178, %cst_73 [0] : vector<128x128xf32> to vector<128xf32>
    %180 = vector.shape_cast %179 : vector<128xf32> to vector<1x128xf32>
    %c2147483647_i32_74 = arith.constant 2147483647 : i32
    %181 = vector.broadcast %c2147483647_i32_74 : i32 to vector<1x128xi32>
    %182 = arith.cmpi slt, %174, %181 : vector<1x128xi32>
    %cst_75 = arith.constant 0.000000e+00 : f32
    %183 = vector.broadcast %cst_75 : f32 to vector<1x128xf32>
    %184 = arith.select %182, %180, %183 : vector<1x128xi1>, vector<1x128xf32>
    %185 = arith.mulf %184, %170 : vector<1x128xf32>
    %cst_76 = arith.constant 0.000000e+00 : f32
    %186 = vector.shape_cast %185 : vector<1x128xf32> to vector<1x128xf32>
    %187 = vector.broadcast %186 : vector<1x128xf32> to vector<128x128xf32>
    %188 = vector.broadcast %cst_76 : f32 to vector<128x128xf32>
    %189 = arith.select %176, %187, %188 : vector<128x128xi1>, vector<128x128xf32>
    %190 = arith.addf %167, %189 : vector<128x128xf32>
    %cst_77 = arith.constant 1.000000e+00 : f32
    %191 = vector.broadcast %cst_77 : f32 to vector<1x128xf32>
    %192 = arith.subf %191, %184 : vector<1x128xf32>
    %193 = arith.mulf %170, %192 : vector<1x128xf32>
    %c2147483647_i32_78 = arith.constant 2147483647 : i32
    %194 = vector.broadcast %c2147483647_i32_78 : i32 to vector<128x128xi32>
    %195 = arith.select %176, %194, %172 : vector<128x128xi1>, vector<128x128xi32>
    %cst_79 = arith.constant dense<2147483647> : vector<128xi32>
    %196 = vector.multi_reduction <minsi>, %195, %cst_79 [0] : vector<128x128xi32> to vector<128xi32>
    %197 = vector.shape_cast %196 : vector<128xi32> to vector<1x128xi32>
    %198 = vector.broadcast %197 : vector<1x128xi32> to vector<128x128xi32>
    %199 = arith.cmpi eq, %195, %198 : vector<128x128xi32>
    %cst_80 = arith.constant 0.000000e+00 : f32
    %200 = vector.broadcast %cst_80 : f32 to vector<128x128xf32>
    %201 = arith.select %199, %143, %200 : vector<128x128xi1>, vector<128x128xf32>
    %cst_81 = arith.constant dense<0.000000e+00> : vector<128xf32>
    %202 = vector.multi_reduction <add>, %201, %cst_81 [0] : vector<128x128xf32> to vector<128xf32>
    %203 = vector.shape_cast %202 : vector<128xf32> to vector<1x128xf32>
    %c2147483647_i32_82 = arith.constant 2147483647 : i32
    %204 = vector.broadcast %c2147483647_i32_82 : i32 to vector<1x128xi32>
    %205 = arith.cmpi slt, %197, %204 : vector<1x128xi32>
    %cst_83 = arith.constant 0.000000e+00 : f32
    %206 = vector.broadcast %cst_83 : f32 to vector<1x128xf32>
    %207 = arith.select %205, %203, %206 : vector<1x128xi1>, vector<1x128xf32>
    %208 = arith.mulf %207, %193 : vector<1x128xf32>
    %cst_84 = arith.constant 0.000000e+00 : f32
    %209 = vector.shape_cast %208 : vector<1x128xf32> to vector<1x128xf32>
    %210 = vector.broadcast %209 : vector<1x128xf32> to vector<128x128xf32>
    %211 = vector.broadcast %cst_84 : f32 to vector<128x128xf32>
    %212 = arith.select %199, %210, %211 : vector<128x128xi1>, vector<128x128xf32>
    %213 = arith.addf %190, %212 : vector<128x128xf32>
    %cst_85 = arith.constant 1.000000e+00 : f32
    %214 = vector.broadcast %cst_85 : f32 to vector<1x128xf32>
    %215 = arith.subf %214, %207 : vector<1x128xf32>
    %216 = arith.mulf %193, %215 : vector<1x128xf32>
    %c2147483647_i32_86 = arith.constant 2147483647 : i32
    %217 = vector.broadcast %c2147483647_i32_86 : i32 to vector<128x128xi32>
    %218 = arith.select %199, %217, %195 : vector<128x128xi1>, vector<128x128xi32>
    %cst_87 = arith.constant dense<2147483647> : vector<128xi32>
    %219 = vector.multi_reduction <minsi>, %218, %cst_87 [0] : vector<128x128xi32> to vector<128xi32>
    %220 = vector.shape_cast %219 : vector<128xi32> to vector<1x128xi32>
    %221 = vector.broadcast %220 : vector<1x128xi32> to vector<128x128xi32>
    %222 = arith.cmpi eq, %218, %221 : vector<128x128xi32>
    %cst_88 = arith.constant 0.000000e+00 : f32
    %223 = vector.broadcast %cst_88 : f32 to vector<128x128xf32>
    %224 = arith.select %222, %143, %223 : vector<128x128xi1>, vector<128x128xf32>
    %cst_89 = arith.constant dense<0.000000e+00> : vector<128xf32>
    %225 = vector.multi_reduction <add>, %224, %cst_89 [0] : vector<128x128xf32> to vector<128xf32>
    %226 = vector.shape_cast %225 : vector<128xf32> to vector<1x128xf32>
    %c2147483647_i32_90 = arith.constant 2147483647 : i32
    %227 = vector.broadcast %c2147483647_i32_90 : i32 to vector<1x128xi32>
    %228 = arith.cmpi slt, %220, %227 : vector<1x128xi32>
    %cst_91 = arith.constant 0.000000e+00 : f32
    %229 = vector.broadcast %cst_91 : f32 to vector<1x128xf32>
    %230 = arith.select %228, %226, %229 : vector<1x128xi1>, vector<1x128xf32>
    %231 = arith.mulf %230, %216 : vector<1x128xf32>
    %cst_92 = arith.constant 0.000000e+00 : f32
    %232 = vector.shape_cast %231 : vector<1x128xf32> to vector<1x128xf32>
    %233 = vector.broadcast %232 : vector<1x128xf32> to vector<128x128xf32>
    %234 = vector.broadcast %cst_92 : f32 to vector<128x128xf32>
    %235 = arith.select %222, %233, %234 : vector<128x128xi1>, vector<128x128xf32>
    %236 = arith.addf %213, %235 : vector<128x128xf32>
    %cst_93 = arith.constant dense<0.000000e+00> : vector<8x128xf32>
    %237 = tpu.matmul %7, %236, %cst_93 {dimension_numbers = #tpu.dot_dimension_numbers<[1], [0], [0], [1], [0, 0, 1, 1], [], []>} : vector<8x128xf32>, vector<128x128xf32>, vector<8x128xf32> -> vector<8x128xf32>
    %238 = vector.extract_strided_slice %237 {offsets = [0, 0], sizes = [3, 128], strides = [1, 1]} : vector<8x128xf32> to vector<3x128xf32>
    %c0_94 = arith.constant 0 : index
    %c0_95 = arith.constant 0 : index
    %c128_96 = arith.constant 128 : index
    %239 = vector.load %arg5[%c0_94, %c0_95, %c128_96] : memref<1x3x256xf32, #tpu.memory_space<vmem>>, vector<1x3x128xf32>
    %240 = vector.shape_cast %239 : vector<1x3x128xf32> to vector<3x128xf32>
    %241 = vector.shape_cast %238 : vector<3x128xf32> to vector<1x3x128xf32>
    tpu.vector_store %arg5[%c0_94, %c0_95, %c128_96], %241 {strides = array<i32>} : memref<1x3x256xf32, #tpu.memory_space<vmem>>, vector<1x3x128xf32>,
    return
  }
  func.func @transform_0(%arg0: i32) -> (i32, i32) {
    %c0_i32 = arith.constant 0 : i32
    %c0_i32_0 = arith.constant 0 : i32
    %c0_i32_1 = arith.constant 0 : i32
    return %c0_i32, %c0_i32_0 : i32, i32
  }
  func.func @transform_1(%arg0: i32) -> (i32, i32, i32) {
    %c0_i32 = arith.constant 0 : i32
    %c0_i32_0 = arith.constant 0 : i32
    %c0_i32_1 = arith.constant 0 : i32
    return %arg0, %c0_i32, %c0_i32_0 : i32, i32, i32
  }
  func.func @transform_2(%arg0: i32) -> (i32, i32, i32) {
    %c0_i32 = arith.constant 0 : i32
    %c0_i32_0 = arith.constant 0 : i32
    %c0_i32_1 = arith.constant 0 : i32
    return %arg0, %c0_i32, %c0_i32_0 : i32, i32, i32
  }
  func.func @transform_3(%arg0: i32) -> (i32, i32, i32) {
    %c0_i32 = arith.constant 0 : i32
    %c0_i32_0 = arith.constant 0 : i32
    %c0_i32_1 = arith.constant 0 : i32
    return %arg0, %c0_i32, %c0_i32_0 : i32, i32, i32
  }
  func.func @transform_4(%arg0: i32) -> (i32, i32, i32) {
    %c0_i32 = arith.constant 0 : i32
    %c0_i32_0 = arith.constant 0 : i32
    %c0_i32_1 = arith.constant 0 : i32
    return %arg0, %c0_i32, %c0_i32_0 : i32, i32, i32
  }
}

</mosaic_0001>

<bundles_post_ra>
// kernel: tpu_custom_call.1
= control target key start
LH: loop header
LB: loop body
LE: loop exit
PB: predicated region body
PF: predicated region fallthrough
CT: control target
= control target key end

     0   :  { %s2111_s15 = smov 0   ;;  %s5142_s0 = inlined_call_operand.vmem [shape: f32[2,256], index: 0, kind: input, shape index: {}]   ;;  %s5143_s1 = inlined_call_operand.vmem [shape: f32[2,128,2], index: 1, kind: input, shape index: {}]   ;;  %s5144_s2 = inlined_call_operand.vmem [shape: s32[2,128,1], index: 2, kind: input, shape index: {}]   ;;  %s5145_s3 = inlined_call_operand.vmem [shape: f32[2,8,128], index: 3, kind: input, shape index: {}]   ;;  %s5146_s4 = inlined_call_operand.vmem [shape: f32[2,3,256], index: 4, kind: output, shape index: {}]  }
   0x1 LB: > { %s2029_s16 = sadd.s32 4294967295, %s2082_s15   ;;  %p2033_p0 = scmp.ge.s32.totalorder %s2082_s15, 1  ;;  %s2082_s15 = sphi %s2111_s15, %s14_s15  }
   0x2   : > { %p181_p1 = scmp.lt.s32.totalorder %s2082_s15, 3 }
   0x4   : > { %p182_p2 = pnand %p2033_p0, %p181_p1 }
   0x6   : > { %185 = sbr.rel (%p182_p2) target bundleno = 719 (0x2cf), region = 36 }
   0xb   : > { %p216_p3 = scmp.lt.s32.totalorder %s2029_s16, 1  ;;  %v2084_v0 = vmov 1   ;;  %v2085_v1 = vmov 0   ;;  %v2185_v32 = vld [vmem:[%s5142_s0 + $0x1] ss:$0 sm:$0xff] }
   0xc   : > { %2059 = vset.pattern.permute.xlu0 %v2084_v0  ;;  %2057 = vset.pattern.permute.xlu2 %v2085_v1  ;;  %v2190_v33 = vld [vmem:[%s5142_s0 + $0x3] ss:$0 sm:$0xff]  ;;  %v2199_v38 = vld [vmem:[%s5142_s0] ss:$0 sm:$0xff]  ;;  %v2204_v39 = vld [vmem:[%s5142_s0 + $0x2] ss:$0 sm:$0xff] }
   0xd   : > { %2056 = vset.pattern.permute.xlu1 %v2085_v1  ;;  %s6001_s16 = smov (!%p216_p3, %s2029_s16), 1 }
   0xe   : > { %s2043_s17 = sshll.u32 %s6001_s16, 7  ;;  %s2038_s6 = sshll.u32 %s6001_s16, 3 }
   0xf   : > { %s2130_s20 = scalar_lea.vmem %s5143_s1, %s2043_s17  ;;  %s2157_s23 = scalar_lea.vmem %s5144_s2, %s2043_s17 }
  0x10   : > { %v239_v2 = vld [vmem:[%s2130_s20 + $0x20] sm:$0xff]  ;;  %v237_v3 = vld [vmem:[%s2130_s20 + $0x10] sm:$0xff]  ;;  %v236_v4 = vld [vmem:[%s2130_s20 + $0x8] sm:$0xff]  ;;  %s229_s9 = scalar_lea.vmem %s5145_s3, %s2038_s6  ;;  %s234_s12 = scalar_lea.vmem %s5146_s4, %s2038_s6 }
  0x11   : > { %292 = vperm.xlu2 %2057, %v239_v2   ;;  %282 = vperm.xlu1 %2056, %v237_v3   ;;  %v240_v5 = vld [vmem:[%s2130_s20 + $0x28] sm:$0xff]  ;;  %v238_v6 = vld [vmem:[%s2130_s20 + $0x18] sm:$0xff]  ;;  %v241_v7 = vld [vmem:[%s2130_s20 + $0x30] sm:$0xff] }
  0x12   : > { %372 = vperm.xlu0 %2059, %v236_v4   ;;  %v242_v8 = vld [vmem:[%s2130_s20 + $0x38] sm:$0xff]  ;;  %v245_v9 = vld [vmem:[%s2130_s20 + $0x50] sm:$0xff]  ;;  %v235_v10 = vld [vmem:[%s2130_s20] sm:$0xff] }
  0x13   : > { %v243_v11 = vld [vmem:[%s2130_s20 + $0x40] sm:$0xff]  ;;  %v244_v12 = vld [vmem:[%s2130_s20 + $0x48] sm:$0xff]  ;;  %v246_v13 = vld [vmem:[%s2130_s20 + $0x58] sm:$0xff] }
  0x14   : > { %v250_v14 = vld [vmem:[%s2130_s20 + $0x78] sm:$0xff]  ;;  %v251_v15 = vld [vmem:[%s2157_s23] sm:$0xff]  ;;  %v248_v18 = vld [vmem:[%s2130_s20 + $0x68] sm:$0xff] }
  0x15   : > { %v247_v16 = vld [vmem:[%s2130_s20 + $0x60] sm:$0xff]  ;;  %v254_v17 = vld [vmem:[%s2157_s23 + $0x18] sm:$0xff]  ;;  %v249_v19 = vld [vmem:[%s2130_s20 + $0x70] sm:$0xff] }
  0x16   : > { %v257_v20 = vld [vmem:[%s2157_s23 + $0x30] sm:$0xff]  ;;  %v260_v21 = vld [vmem:[%s2157_s23 + $0x48] sm:$0xff]  ;;  %v263_v23 = vld [vmem:[%s2157_s23 + $0x60] sm:$0xff] }
  0x17   : > { %v252_v25 = vld [vmem:[%s2157_s23 + $0x8] sm:$0xff]  ;;  %v253_v26 = vld [vmem:[%s2157_s23 + $0x10] sm:$0xff]  ;;  %v266_v27 = vld [vmem:[%s2157_s23 + $0x78] sm:$0xff] }
  0x18   : > { %v255_v29 = vld [vmem:[%s2157_s23 + $0x20] sm:$0xff]  ;;  %v256_v30 = vld [vmem:[%s2157_s23 + $0x28] sm:$0xff]  ;;  %v258_v35 = vld [vmem:[%s2157_s23 + $0x38] sm:$0xff] }
  0x19   : > { %297 = vperm.xlu2 %2057, %v240_v5   ;;  %287 = vperm.xlu1 %2056, %v238_v6   ;;  %v259_v37 = vld [vmem:[%s2157_s23 + $0x40] sm:$0xff]  ;;  %v261_v50 = vld [vmem:[%s2157_s23 + $0x50] sm:$0xff]  ;;  %v262_v52 = vld [vmem:[%s2157_s23 + $0x58] sm:$0xff] }
  0x1a   : > { %392 = vperm.xlu0 %2059, %v241_v7  }
  0x21   : > { %2058 = vset.pattern.permute.xlu2 %v2084_v0  ;;  %307 = vperm.xlu1 %2056, %v242_v8  }
  0x22   : > { %408 = vperm.xlu0 %2059, %v245_v9   ;;  %368 = vperm.xlu2 %2058, %v235_v10  }
  0x29   : > { %2060 = vset.pattern.permute.xlu1 %v2084_v0 }
  0x2a   : > { %2065 = vset.pattern.permute.xlu0 %v2085_v1  ;;  %376 = vperm.xlu1 %2060, %v237_v3  }
  0x2b   : > { %272 = vperm.xlu0 %2065, %v235_v10   ;;  %380 = vperm.xlu2 %2058, %v238_v6  }
  0x32   : > { %384 = vperm.xlu1 %2060, %v239_v2  }
  0x33   : > { %277 = vperm.xlu0 %2065, %v236_v4   ;;  %388 = vperm.xlu2 %2058, %v240_v5   ;;  %v264_v5 = vld [vmem:[%s2157_s23 + $0x68] sm:$0xff] }
  0x3a   : > { %396 = vperm.xlu1 %2060, %v242_v8  }
  0x3b   : > { %302 = vperm.xlu0 %2065, %v241_v7   ;;  %2061 = vset.pattern.permute.xlu2 %v2085_v1  ;;  %v265_v7 = vld [vmem:[%s2157_s23 + $0x70] sm:$0xff] }
  0x3c   : > { %312 = vperm.xlu2 %2061, %v243_v11  }
  0x42   : > { %2062 = vset.pattern.permute.xlu1 %v2085_v1 }
  0x43   : > { %317 = vperm.xlu0 %2065, %v244_v12   ;;  %322 = vperm.xlu1 %2062, %v245_v9  }
  0x44   : > { %327 = vperm.xlu2 %2061, %v246_v13  }
  0x4b   : > { %347 = vperm.xlu0 %2065, %v250_v14   ;;  %2063 = vset.pattern.permute.xlu1 %v2084_v0 }
  0x4c   : > { %2064 = vset.pattern.permute.xlu2 %v2084_v0  ;;  %400 = vperm.xlu1 %2063, %v243_v11  }
  0x4d   : > { %404 = vperm.xlu2 %2064, %v244_v12  }
  0x53   : > { %561 = vperm.xlu0 %2065, %v251_v15  }
  0x54   : > { %412 = vperm.xlu1 %2063, %v246_v13  }
  0x55   : > { %2066 = vset.pattern.permute.xlu2 %v2085_v1 }
  0x56   : > { %332 = vperm.xlu2 %2066, %v247_v16  }
  0x5b   : > { %570 = vperm.xlu0 %2065, %v254_v17  }
  0x5c   : > { %2067 = vset.pattern.permute.xlu1 %v2085_v1 }
  0x5d   : > { %337 = vperm.xlu1 %2067, %v248_v18  }
  0x5e   : > { %342 = vperm.xlu2 %2066, %v249_v19  }
  0x63   : > { %579 = vperm.xlu0 %2065, %v257_v20  }
  0x65   : > { %2068 = vset.pattern.permute.xlu1 %v2084_v0 }
  0x66   : > { %2069 = vset.pattern.permute.xlu2 %v2084_v0  ;;  %416 = vperm.xlu1 %2068, %v247_v16  }
  0x67   : > { %420 = vperm.xlu2 %2069, %v248_v18  }
  0x6b   : > { %588 = vperm.xlu0 %2065, %v260_v21   ;;  %v2170_v22 = vpop.permute.xlu2 %292 }
  0x6c   : > { %v355_v20 = vsub.f32 %v2170_v22, %v2199_v38  ;;  %v1212_v21 = vsub.f32 %v2170_v22, %v2204_v39 }
  0x6e   : > { %424 = vperm.xlu1 %2068, %v249_v19  }
  0x6f   : > { %428 = vperm.xlu2 %2069, %v250_v14  }
  0x73   : > { %597 = vperm.xlu0 %2065, %v263_v23   ;;  %v298_v24 = vpop.permute.xlu2 %297 }
  0x74   : > { %v356_v42 = vsub.f32 %v298_v24, %v2199_v38  ;;  %v1213_v43 = vsub.f32 %v298_v24, %v2204_v39 }
  0x76   : > { %2070 = vset.pattern.permute.xlu1 %v2085_v1  ;;  %v453_v57 = vmul.f32 %v356_v42, %v356_v42  ;;  %v1246_v58 = vmul.f32 %v1213_v43, %v1213_v43 }
  0x77   : > { %2071 = vset.pattern.permute.xlu2 %v2085_v1  ;;  %564 = vperm.xlu1 %2070, %v252_v25  }
  0x78   : > { %567 = vperm.xlu2 %2071, %v253_v26  }
  0x7b   : > { %606 = vperm.xlu0 %2065, %v266_v27  }
  0x7c   : > { %v2178_v28 = vpop.permute.xlu2 %368 }
  0x7d   : > { %v432_v16 = vsub.f32 %v2178_v28, %v2185_v32  ;;  %v1225_v17 = vsub.f32 %v2178_v28, %v2190_v33 }
  0x7f   : > { %573 = vperm.xlu1 %2070, %v255_v29  }
  0x80   : > { %576 = vperm.xlu2 %2071, %v256_v30  }
  0x83   : > { %v283_v31 = vpop.permute.xlu1 %282 }
  0x84   : > { %v2192_v34 = vpop.permute.xlu0 %372  ;;  %v353_v14 = vsub.f32 %v283_v31, %v2199_v38  ;;  %v1210_v15 = vsub.f32 %v283_v31, %v2204_v39 }
  0x85   : > { %v381_v36 = vpop.permute.xlu2 %380  ;;  %v433_v26 = vsub.f32 %v2192_v34, %v2185_v32  ;;  %v1226_v27 = vsub.f32 %v2192_v34, %v2190_v33  ;;  %v1245_v34 = vmul.f32 %v1212_v21, %v1212_v21 }
  0x86   : > { %v435_v40 = vsub.f32 %v381_v36, %v2185_v32  ;;  %v1228_v41 = vsub.f32 %v381_v36, %v2190_v33  ;;  %v450_v31 = vmul.f32 %v353_v14, %v353_v14 }
  0x87   : > { %582 = vperm.xlu1 %2070, %v258_v35   ;;  %v1243_v35 = vmul.f32 %v1210_v15, %v1210_v15 }
  0x88   : > { %585 = vperm.xlu2 %2071, %v259_v37   ;;  %v467_v45 = vmul.f32 %v435_v40, %v435_v40  ;;  %v1260_v46 = vmul.f32 %v1228_v41, %v1228_v41  ;;  %v464_v37 = vmul.f32 %v432_v16, %v432_v16  ;;  %v1257_v40 = vmul.f32 %v1225_v17, %v1225_v17 }
  0x8b   : > { %v288_v44 = vpop.permute.xlu1 %287 }
  0x8c   : > { %v354_v47 = vsub.f32 %v288_v44, %v2199_v38  ;;  %v1211_v48 = vsub.f32 %v288_v44, %v2204_v39  ;;  %v2212_v49 = vpop.permute.xlu0 %392 }
  0x8d   : > { %v389_v51 = vpop.permute.xlu2 %388 }
  0x8e   : > { %v451_v53 = vmul.f32 %v354_v47, %v354_v47  ;;  %v1244_v54 = vmul.f32 %v1211_v48, %v1211_v48  ;;  %v437_v55 = vsub.f32 %v389_v51, %v2185_v32  ;;  %v1230_v56 = vsub.f32 %v389_v51, %v2190_v33 }
  0x8f   : > { %591 = vperm.xlu1 %2070, %v261_v50   ;;  %v465_v48 = vmul.f32 %v433_v26, %v433_v26  ;;  %v1258_v50 = vmul.f32 %v1226_v27, %v1226_v27  ;;  %v438_v51 = vsub.f32 %v2212_v49, %v2185_v32 }
  0x90   : > { %v2218_v59 = vadd.f32 %v467_v45, %v451_v53  ;;  %v2220_v60 = vadd.f32 %v1260_v46, %v1244_v54  ;;  %v469_v61 = vmul.f32 %v437_v55, %v437_v55  ;;  %v1262_v62 = vmul.f32 %v1230_v56, %v1230_v56  ;;  %594 = vperm.xlu2 %2071, %v262_v52  }
  0x91   : > { %v452_v45 = vmul.f32 %v355_v20, %v355_v20  ;;  %v1231_v53 = vsub.f32 %v2212_v49, %v2190_v33  ;;  %v470_v26 = vmul.f32 %v438_v51, %v438_v51 }
  0x92   : > { %v2222_v63 = vadd.f32 %v469_v61, %v453_v57  ;;  %v2224_v0 = vadd.f32 %v1262_v62, %v1246_v58  ;;  %v515_v1 = vmul.f32 11.111111, %v2218_v59  ;;  %v1308_v3 = vmul.f32 11.111111, %v2220_v60 }
  0x93   : > { %v2227_v2 = vpop.permute.xlu1 %307  ;;  %vm499_vm0 = vcmp.lt.f32.partialorder %v2218_v59, 0.09  ;;  %vm1292_vm1 = vcmp.lt.f32.partialorder %v2220_v60, 0.09  ;;  %v1263_v27 = vmul.f32 %v1231_v53, %v1231_v53 }
  0x94   : > { %v2230_v4 = vpop.permute.xlu0 %408  ;;  %v531_v6 = vsub.f32 1.0, %v515_v1  ;;  %v1324_v8 = vsub.f32 1.0, %v1308_v3  ;;  %v1310_v12 = vmul.f32 11.111111, %v2224_v0  ;;  %vm1294_vm2 = vcmp.lt.f32.partialorder %v2224_v0, 0.09 }
  0x95   : > { %v358_v54 = vsub.f32 %v2227_v2, %v2199_v38 }
  0x96   : > { %v2235_v9 = vpop.permute.xlu2 %312  ;;  %v2239_v10 = vsel %vm499_vm0, %v531_v6, 0.0  ;;  %v2244_v11 = vsel %vm1292_vm1, %v1324_v8, 0.0  ;;  %v1326_v13 = vsub.f32 1.0, %v1310_v12 }
  0x97   : > { %5486 = vst [vmem:[#allocation2_spill] sm:$0xff] %v2239_v10  ;;  %600 = vperm.xlu1 %2070, %v264_v5  }
  0x98   : > { %603 = vperm.xlu2 %2071, %v265_v7   ;;  %5487 = vst [vmem:[#allocation3_spill] sm:$0xff] %v2244_v11  ;;  %v2256_v19 = vsel %vm1294_vm2, %v1326_v13, 0.0 }
  0x99   : > { %5488 = vst [vmem:[#allocation4_spill] sm:$0xff] %v2256_v19 }
  0x9c   : > { %v377_v18 = vpop.permute.xlu1 %376 }
  0x9d   : > { %v434_v23 = vsub.f32 %v377_v18, %v2185_v32  ;;  %v1227_v24 = vsub.f32 %v377_v18, %v2190_v33  ;;  %v273_v25 = vpop.permute.xlu0 %272 }
  0x9e   : > { %v351_v28 = vsub.f32 %v273_v25, %v2199_v38  ;;  %v1208_v29 = vsub.f32 %v273_v25, %v2204_v39  ;;  %v2270_v30 = vpop.permute.xlu2 %327 }
  0x9f   : > { %v466_v22 = vmul.f32 %v434_v23, %v434_v23  ;;  %v1259_v36 = vmul.f32 %v1227_v24, %v1227_v24  ;;  %v1215_v23 = vsub.f32 %v2227_v2, %v2204_v39 }
  0xa0   : > { %v448_v41 = vmul.f32 %v351_v28, %v351_v28  ;;  %v1241_v42 = vmul.f32 %v1208_v29, %v1208_v29  ;;  %v442_v28 = vsub.f32 %v2230_v4, %v2185_v32 }
  0xa1   : > { %v2272_v43 = vadd.f32 %v466_v22, %v450_v31  ;;  %v2274_v44 = vadd.f32 %v1259_v36, %v1243_v35  ;;  %v455_v31 = vmul.f32 %v358_v54, %v358_v54  ;;  %v1235_v35 = vsub.f32 %v2230_v4, %v2190_v33 }
  0xa2   : > { %v2276_v46 = vadd.f32 %v464_v37, %v448_v41  ;;  %v2278_v47 = vadd.f32 %v1257_v40, %v1241_v42 }
  0xa3   : > { %v514_v52 = vmul.f32 11.111111, %v2272_v43  ;;  %vm498_vm3 = vcmp.lt.f32.partialorder %v2272_v43, 0.09  ;;  %v1307_v6 = vmul.f32 11.111111, %v2274_v44 }
  0xa4   : > { %v385_v55 = vpop.permute.xlu1 %384  ;;  %v512_v56 = vmul.f32 11.111111, %v2276_v46  ;;  %v1305_v62 = vmul.f32 11.111111, %v2278_v47  ;;  %vm496_vm4 = vcmp.lt.f32.partialorder %v2276_v46, 0.09 }
  0xa5   : > { %v436_v57 = vsub.f32 %v385_v55, %v2185_v32  ;;  %v1229_v58 = vsub.f32 %v385_v55, %v2190_v33  ;;  %v278_v61 = vpop.permute.xlu0 %277  ;;  %v530_v1 = vsub.f32 1.0, %v514_v52  ;;  %vm1289_vm5 = vcmp.lt.f32.partialorder %v2278_v47, 0.09 }
  0xa6   : > { %v352_v3 = vsub.f32 %v278_v61, %v2199_v38  ;;  %v1209_v49 = vsub.f32 %v278_v61, %v2204_v39  ;;  %v528_v5 = vsub.f32 1.0, %v512_v56  ;;  %v1321_v13 = vsub.f32 1.0, %v1305_v62 }
  0xa7   : > { %v468_v7 = vmul.f32 %v436_v57, %v436_v57  ;;  %v1261_v8 = vmul.f32 %v1229_v58, %v1229_v58  ;;  %v405_v12 = vpop.permute.xlu2 %404  ;;  %v2297_v14 = vsel %vm498_vm3, %v530_v1, 0.0  ;;  %v1323_v29 = vsub.f32 1.0, %v1307_v6 }
  0xa8   : > { %5489 = vst [vmem:[#allocation5_spill] sm:$0xff] %v2297_v14  ;;  %v449_v15 = vmul.f32 %v352_v3, %v352_v3  ;;  %v1242_v16 = vmul.f32 %v1209_v49, %v1209_v49  ;;  %v2307_v20 = vsel %vm496_vm4, %v528_v5, 0.0  ;;  %v2311_v21 = vsel %vm1289_vm5, %v1321_v13, 0.0 }
  0xa9   : > { %v2301_v17 = vadd.f32 %v468_v7, %v452_v45  ;;  %v2303_v18 = vadd.f32 %v1261_v8, %v1245_v34  ;;  %5490 = vst [vmem:[#allocation6_spill] sm:$0xff] %v2307_v20  ;;  %vm1291_vm6 = vcmp.lt.f32.partialorder %v2274_v44, 0.09  ;;  %v1248_v45 = vmul.f32 %v1215_v23, %v1215_v23 }
  0xaa   : > { %5491 = vst [vmem:[#allocation7_spill] sm:$0xff] %v2311_v21  ;;  %v2315_v24 = vadd.f32 %v465_v48, %v449_v15  ;;  %v2317_v25 = vadd.f32 %v1258_v50, %v1242_v16  ;;  %v2329_v41 = vsel %vm1291_vm6, %v1323_v29, 0.0  ;;  %v441_v53 = vsub.f32 %v405_v12, %v2185_v32 }
  0xab   : > { %5492 = vst [vmem:[#allocation8_spill] sm:$0xff] %v2329_v41  ;;  %v1234_v58 = vsub.f32 %v405_v12, %v2190_v33  ;;  %v1309_v5 = vmul.f32 11.111111, %v2303_v18  ;;  %v474_v6 = vmul.f32 %v442_v28, %v442_v28  ;;  %v1267_v7 = vmul.f32 %v1235_v35, %v1235_v35 }
  0xac   : > { %v397_v22 = vpop.permute.xlu1 %396  ;;  %v513_v36 = vmul.f32 11.111111, %v2315_v24  ;;  %v1306_v42 = vmul.f32 11.111111, %v2317_v25  ;;  %vm5156_vm7 = vcmp.lt.f32.partialorder %v2315_v24, 0.09  ;;  %v473_v8 = vmul.f32 %v441_v53, %v441_v53 }
  0xad   : > { %v439_v2 = vsub.f32 %v397_v22, %v2185_v32  ;;  %v1232_v37 = vsub.f32 %v397_v22, %v2190_v33  ;;  %v303_v40 = vpop.permute.xlu0 %302  ;;  %vm1290_vm8 = vcmp.lt.f32.partialorder %v2317_v25, 0.09  ;;  %vm1293_vm9 = vcmp.lt.f32.partialorder %v2303_v18, 0.09 }
  0xae   : > { %v357_v34 = vsub.f32 %v303_v40, %v2199_v38  ;;  %v1214_v4 = vsub.f32 %v303_v40, %v2204_v39  ;;  %v529_v48 = vsub.f32 1.0, %v513_v36  ;;  %v1322_v52 = vsub.f32 1.0, %v1306_v42 }
  0xaf   : > { %v471_v50 = vmul.f32 %v439_v2, %v439_v2  ;;  %v1264_v51 = vmul.f32 %v1232_v37, %v1232_v37  ;;  %v1266_v13 = vmul.f32 %v1234_v58, %v1234_v58 }
  0xb0   : > { %v454_v54 = vmul.f32 %v357_v34, %v357_v34  ;;  %v1247_v55 = vmul.f32 %v1214_v4, %v1214_v4  ;;  %v2336_v56 = vpop.permute.xlu2 %332  ;;  %v2340_v57 = vsel %vm5156_vm7, %v529_v48, 0.0  ;;  %v2354_v49 = vsel %vm1290_vm8, %v1322_v52, 0.0 }
  0xb1   : > { %5493 = vst [vmem:[#allocation9_spill] sm:$0xff] %v2340_v57  ;;  %v2343_v61 = vadd.f32 %v471_v50, %v455_v31  ;;  %v2345_v62 = vadd.f32 %v1264_v51, %v1248_v45  ;;  %v359_v34 = vsub.f32 %v2235_v9, %v2199_v38 }
  0xb2   : > { %v2348_v1 = vadd.f32 %v470_v26, %v454_v54  ;;  %v2350_v3 = vadd.f32 %v1263_v27, %v1247_v55  ;;  %5494 = vst [vmem:[#allocation10_spill] sm:$0xff] %v2354_v49  ;;  %v1325_v26 = vsub.f32 1.0, %v1309_v5  ;;  %v1216_v55 = vsub.f32 %v2235_v9, %v2204_v39 }
  0xb3   : > { %v1312_v54 = vmul.f32 11.111111, %v2345_v62  ;;  %vm5157_vm12 = vcmp.lt.f32.partialorder %v2345_v62, 0.09 }
  0xb4   : > { %v518_v12 = vmul.f32 11.111111, %v2348_v1  ;;  %vm502_vm10 = vcmp.lt.f32.partialorder %v2348_v1, 0.09  ;;  %v1311_v23 = vmul.f32 11.111111, %v2350_v3 }
  0xb5   : > { %v318_v15 = vpop.permute.xlu0 %317  ;;  %v323_v16 = vpop.permute.xlu1 %322  ;;  %vm1295_vm11 = vcmp.lt.f32.partialorder %v2350_v3, 0.09  ;;  %v2368_v36 = vsel %vm1293_vm9, %v1325_v26, 0.0 }
  0xb6   : > { %v360_v27 = vsub.f32 %v318_v15, %v2199_v38  ;;  %v1217_v29 = vsub.f32 %v318_v15, %v2204_v39  ;;  %v361_v28 = vsub.f32 %v323_v16, %v2199_v38  ;;  %v1218_v31 = vsub.f32 %v323_v16, %v2204_v39  ;;  %5495 = vst [vmem:[#allocation11_spill] sm:$0xff] %v2368_v36 }
  0xb7   : > { %v534_v35 = vsub.f32 1.0, %v518_v12  ;;  %v1327_v22 = vsub.f32 1.0, %v1311_v23  ;;  %v1328_v12 = vsub.f32 1.0, %v1312_v54 }
  0xb8   : > { %v457_v2 = vmul.f32 %v360_v27, %v360_v27  ;;  %v1250_v37 = vmul.f32 %v1217_v29, %v1217_v29  ;;  %v458_v40 = vmul.f32 %v361_v28, %v361_v28  ;;  %v1251_v42 = vmul.f32 %v1218_v31, %v1218_v31  ;;  %v2370_v45 = vpop.permute.xlu2 %342 }
  0xb9   : > { %v2376_v4 = vsel %vm502_vm10, %v534_v35, 0.0  ;;  %v2380_v48 = vsel %vm1295_vm11, %v1327_v22, 0.0  ;;  %v2403_v26 = vsel %vm5157_vm12, %v1328_v12, 0.0  ;;  %v1249_v27 = vmul.f32 %v1216_v55, %v1216_v55 }
  0xba   : > { %5496 = vst [vmem:[#allocation12_spill] sm:$0xff] %v2376_v4  ;;  %v2382_v50 = vadd.f32 %v473_v8, %v457_v2  ;;  %v2384_v51 = vadd.f32 %v1266_v13, %v1250_v37  ;;  %v2386_v52 = vadd.f32 %v474_v6, %v458_v40  ;;  %v2388_v53 = vadd.f32 %v1267_v7, %v1251_v42 }
  0xbb   : > { %5497 = vst [vmem:[#allocation13_spill] sm:$0xff] %v2380_v48  ;;  %v456_v13 = vmul.f32 %v359_v34, %v359_v34  ;;  %v362_v29 = vsub.f32 %v2270_v30, %v2199_v38  ;;  %v1219_v40 = vsub.f32 %v2270_v30, %v2204_v39  ;;  %v365_v11 = vsub.f32 %v2370_v45, %v2199_v38 }
  0xbc   : > { %v521_v58 = vmul.f32 11.111111, %v2382_v50  ;;  %vm5147_vm13 = vcmp.lt.f32.partialorder %v2382_v50, 0.09  ;;  %v1314_v8 = vmul.f32 11.111111, %v2384_v51 }
  0xbd   : > { %v348_v5 = vpop.permute.xlu0 %347  ;;  %vm1298_vm14 = vcmp.lt.f32.partialorder %v2384_v51, 0.09  ;;  %v522_v7 = vmul.f32 11.111111, %v2386_v52  ;;  %5498 = vst [vmem:[#allocation14_spill] sm:$0xff] %v2403_v26 }
  0xbe   : > { %v401_v6 = vpop.permute.xlu1 %400  ;;  %v537_v15 = vsub.f32 1.0, %v521_v58  ;;  %v1330_v23 = vsub.f32 1.0, %v1314_v8  ;;  %vm5148_vm15 = vcmp.lt.f32.partialorder %v2386_v52, 0.09  ;;  %v1315_v34 = vmul.f32 11.111111, %v2388_v53 }
  0xbf   : > { %v440_v16 = vsub.f32 %v401_v6, %v2185_v32  ;;  %v1233_v9 = vsub.f32 %v401_v6, %v2190_v33  ;;  %v538_v31 = vsub.f32 1.0, %v522_v7  ;;  %v459_v8 = vmul.f32 %v362_v29, %v362_v29 }
  0xc0   : > { %v2409_v28 = vsel %vm5147_vm13, %v537_v15, 0.0  ;;  %v2413_v37 = vsel %vm1298_vm14, %v1330_v23, 0.0  ;;  %v1331_v58 = vsub.f32 1.0, %v1315_v34  ;;  %v1252_v15 = vmul.f32 %v1219_v40, %v1219_v40 }
  0xc1   : > { %5499 = vst [vmem:[#allocation15_spill] sm:$0xff] %v2409_v28  ;;  %v472_v35 = vmul.f32 %v440_v16, %v440_v16  ;;  %v1265_v22 = vmul.f32 %v1233_v9, %v1233_v9  ;;  %v421_v2 = vpop.permute.xlu2 %420  ;;  %v2420_v42 = vsel %vm5148_vm15, %v538_v31, 0.0  ;;  %vm5155_vm13 = vcmp.lt.f32.partialorder %v2388_v53, 0.09 }
  0xc2   : > { %5500 = vst [vmem:[#allocation16_spill] sm:$0xff] %v2413_v37  ;;  %v366_v29 = vsub.f32 %v348_v5, %v2199_v38  ;;  %v1223_v47 = vsub.f32 %v348_v5, %v2204_v39 }
  0xc3   : > { %v2423_v54 = vadd.f32 %v472_v35, %v456_v13  ;;  %v2425_v55 = vadd.f32 %v1265_v22, %v1249_v27  ;;  %v2441_v27 = vsel %vm5155_vm13, %v1331_v58, 0.0 }
  0xc4   : > { %5502 = vst [vmem:[#allocation18_spill] sm:$0xff] %v2441_v27  ;;  %v1256_v37 = vmul.f32 %v1223_v47, %v1223_v47 }
  0xc5   : > { %v2427_v12 = vpop.permute.xlu0 %561  ;;  %v520_v6 = vmul.f32 11.111111, %v2423_v54  ;;  %v1313_v16 = vmul.f32 11.111111, %v2425_v55  ;;  %vm1297_vm15 = vcmp.lt.f32.partialorder %v2425_v55, 0.09 }
  0xc6   : > { %v2433_v30 = vsel %vm1289_vm5, %v2427_v12, 2147483647  ;;  %v413_v7 = vpop.permute.xlu1 %412  ;;  %vm504_vm5 = vcmp.lt.f32.partialorder %v2423_v54, 0.09 }
  0xc7   : > { %5501 = vst [vmem:[#allocation17_spill] sm:$0xff] %v2433_v30  ;;  %v443_v13 = vsub.f32 %v413_v7, %v2185_v32  ;;  %v1236_v9 = vsub.f32 %v413_v7, %v2190_v33  ;;  %v536_v23 = vsub.f32 1.0, %v520_v6  ;;  %v1329_v31 = vsub.f32 1.0, %v1313_v16 }
  0xc9   : > { %v475_v35 = vmul.f32 %v443_v13, %v443_v13  ;;  %v1268_v22 = vmul.f32 %v1236_v9, %v1236_v9  ;;  %v429_v40 = vpop.permute.xlu2 %428  ;;  %v2448_v34 = vsel %vm504_vm5, %v536_v23, 0.0  ;;  %v2455_v7 = vsel %vm1297_vm15, %v1329_v31, 0.0 }
  0xca   : > { %5503 = vst [vmem:[#allocation19_spill] sm:$0xff] %v2448_v34  ;;  %v447_v6 = vsub.f32 %v429_v40, %v2185_v32  ;;  %v1240_v58 = vsub.f32 %v429_v40, %v2190_v33  ;;  %v463_v13 = vmul.f32 %v366_v29, %v366_v29  ;;  %v445_v9 = vsub.f32 %v421_v2, %v2185_v32 }
  0xcb   : > { %5504 = vst [vmem:[#allocation20_spill] sm:$0xff] %v2455_v7  ;;  %v2457_v5 = vadd.f32 %v475_v35, %v459_v8  ;;  %v2459_v16 = vadd.f32 %v1268_v22, %v1252_v15 }
  0xcc   : > { %v479_v27 = vmul.f32 %v447_v6, %v447_v6  ;;  %v1272_v23 = vmul.f32 %v1240_v58, %v1240_v58  ;;  %v477_v15 = vmul.f32 %v445_v9, %v445_v9  ;;  %v1238_v58 = vsub.f32 %v421_v2, %v2190_v33 }
  0xcd   : > { %v2462_v26 = vpop.permute.xlu0 %570  ;;  %v523_v48 = vmul.f32 11.111111, %v2457_v5  ;;  %v1316_v40 = vmul.f32 11.111111, %v2459_v16  ;;  %vm5158_vm13 = vcmp.lt.f32.partialorder %v2457_v5, 0.09 }
  0xce   : > { %v2466_v19 = vadd.f32 %v479_v27, %v463_v13  ;;  %v2468_v8 = vadd.f32 %v1272_v23, %v1256_v37  ;;  %vm1300_vm7 = vcmp.lt.f32.partialorder %v2459_v16, 0.09 }
  0xcf   : > { %v338_v31 = vpop.permute.xlu1 %337  ;;  %v539_v7 = vsub.f32 1.0, %v523_v48  ;;  %v1332_v35 = vsub.f32 1.0, %v1316_v40 }
  0xd0   : > { %v364_v29 = vsub.f32 %v338_v31, %v2199_v38  ;;  %v527_v22 = vmul.f32 11.111111, %v2466_v19  ;;  %v1320_v37 = vmul.f32 11.111111, %v2468_v8  ;;  %vm511_vm12 = vcmp.lt.f32.partialorder %v2466_v19, 0.09 }
  0xd1   : > { %v2474_v47 = vsel %vm5158_vm13, %v539_v7, 0.0  ;;  %v2480_v48 = vsel %vm1300_vm7, %v1332_v35, 0.0  ;;  %vm1304_vm13 = vcmp.lt.f32.partialorder %v2468_v8, 0.09  ;;  %v1221_v23 = vsub.f32 %v338_v31, %v2204_v39 }
  0xd2   : > { %v461_v27 = vmul.f32 %v364_v29, %v364_v29  ;;  %v568_v6 = vpop.permute.xlu2 %567  ;;  %5505 = vst [vmem:[#allocation21_spill] sm:$0xff] %v2480_v48  ;;  %v543_v13 = vsub.f32 1.0, %v527_v22  ;;  %v1336_v7 = vsub.f32 1.0, %v1320_v37  ;;  %v363_v22 = vsub.f32 %v2336_v56, %v2199_v38 }
  0xd3   : > { %v2491_v40 = vsel %vm498_vm3, %v568_v6, 2147483647  ;;  %v2495_v29 = vsel %vm1291_vm6, %v568_v6, 2147483647  ;;  %v1220_v31 = vsub.f32 %v2336_v56, %v2204_v39 }
  0xd4   : > { %v2486_v9 = vadd.f32 %v477_v15, %v461_v27  ;;  %5506 = vst [vmem:[#allocation22_spill] sm:$0xff] %v2491_v40  ;;  %v2499_v2 = vsel %vm511_vm12, %v543_v13, 0.0  ;;  %v2513_v44 = vsel %vm1304_vm13, %v1336_v7, 0.0  ;;  %v1270_v27 = vmul.f32 %v1238_v58, %v1238_v58 }
  0xd5   : > { %5507 = vst [vmem:[#allocation23_spill] sm:$0xff] %v2495_v29  ;;  %v580_v35 = vpop.permute.xlu0 %579  ;;  %v1254_v13 = vmul.f32 %v1221_v23, %v1221_v23 }
  0xd6   : > { %5508 = vst [vmem:[#allocation24_spill] sm:$0xff] %v2499_v2  ;;  %v2505_v15 = vsel %vm502_vm10, %v580_v35, 2147483647  ;;  %v2509_v43 = vsel %vm1295_vm11, %v580_v35, 2147483647  ;;  %v1253_v2 = vmul.f32 %v1220_v31, %v1220_v31 }
  0xd7   : > { %5509 = vst [vmem:[#allocation25_spill] sm:$0xff] %v2505_v15  ;;  %vm628_vm3 = vcmp.lt.s32.totalorder %v2491_v40, %v2505_v15  ;;  %vm1373_vm6 = vcmp.lt.s32.totalorder %v2495_v29, %v2509_v43  ;;  %v525_v1 = vmul.f32 11.111111, %v2486_v9  ;;  %vm5167_vm10 = vcmp.lt.f32.partialorder %v2486_v9, 0.09 }
  0xd8   : > { %5510 = vst [vmem:[#allocation26_spill] sm:$0xff] %v2509_v43  ;;  %v2524_v3 = vsel %vm628_vm3, %v2491_v40, %v2505_v15  ;;  %v2528_v6 = vsel %vm1373_vm6, %v2495_v29, %v2509_v43  ;;  %v417_v37 = vpop.permute.xlu1 %416  ;;  %v2543_v49 = vadd.f32 %v1270_v27, %v1254_v13 }
  0xd9   : > { %5511 = vst [vmem:[#allocation27_spill] sm:$0xff] %v2513_v44  ;;  %v444_v56 = vsub.f32 %v417_v37, %v2185_v32  ;;  %v1237_v7 = vsub.f32 %v417_v37, %v2190_v33  ;;  %v541_v35 = vsub.f32 1.0, %v525_v1  ;;  %v460_v44 = vmul.f32 %v363_v22, %v363_v22 }
  0xda   : > { %v1222_v22 = vsub.f32 %v2370_v45, %v2204_v39  ;;  %v2553_v27 = vpop.permute.xlu2 %576  ;;  %vm5166_vm6 = vcmp.lt.f32.partialorder %v2543_v49, 0.09 }
  0xdb   : > { %v476_v48 = vmul.f32 %v444_v56, %v444_v56  ;;  %v1269_v36 = vmul.f32 %v1237_v7, %v1237_v7  ;;  %v2535_v58 = vsel %vm5167_vm10, %v541_v35, 0.0  ;;  %v1318_v56 = vmul.f32 11.111111, %v2543_v49 }
  0xdc   : > { %v462_v7 = vmul.f32 %v365_v11, %v365_v11 }
  0xdd   : > { %v2539_v41 = vadd.f32 %v476_v48, %v460_v44  ;;  %v2541_v23 = vadd.f32 %v1269_v36, %v1253_v2  ;;  %v1255_v36 = vmul.f32 %v1222_v22, %v1222_v22  ;;  %v1334_v44 = vsub.f32 1.0, %v1318_v56 }
  0xdf   : > { %v524_v31 = vmul.f32 11.111111, %v2539_v41  ;;  %v1317_v37 = vmul.f32 11.111111, %v2541_v23  ;;  %vm5168_vm11 = vcmp.lt.f32.partialorder %v2539_v41, 0.09 }
  0xe0   : > { %v425_v1 = vpop.permute.xlu1 %424  ;;  %vm1301_vm3 = vcmp.lt.f32.partialorder %v2541_v23, 0.09 }
  0xe1   : > { %v446_v35 = vsub.f32 %v425_v1, %v2185_v32  ;;  %v1239_v38 = vsub.f32 %v425_v1, %v2190_v33  ;;  %v540_v48 = vsub.f32 1.0, %v524_v31  ;;  %v1333_v2 = vsub.f32 1.0, %v1317_v37  ;;  %v2573_v31 = vpop.permute.xlu0 %588 }
  0xe2   : > { %v2567_v33 = vsel %vm5166_vm6, %v1334_v44, 0.0  ;;  %v586_v44 = vpop.permute.xlu2 %585 }
  0xe3   : > { %v478_v39 = vmul.f32 %v446_v35, %v446_v35  ;;  %v1271_v45 = vmul.f32 %v1239_v38, %v1239_v38  ;;  %v2559_v11 = vsel %vm5168_vm11, %v540_v48, 0.0  ;;  %v2563_v32 = vsel %vm1301_vm3, %v1333_v2, 0.0  ;;  %5513 = vst [vmem:[#allocation29_spill] sm:$0xff] %v2567_v33 }
  0xe4   : > { %5512 = vst [vmem:[#allocation28_spill] sm:$0xff] %v2563_v32  ;;  %v2580_v38 = vsel %vm1294_vm2, %v2553_v27, 2147483647  ;;  %v2632_v46 = vsel %vm1297_vm15, %v586_v44, 2147483647 }
  0xe5   : > { %v2569_v13 = vadd.f32 %v478_v39, %v462_v7  ;;  %v2571_v22 = vadd.f32 %v1271_v45, %v1255_v36  ;;  %5514 = vst [vmem:[#allocation30_spill] sm:$0xff] %v2580_v38  ;;  %v2593_v36 = vsel %vm1298_vm14, %v2573_v31, 2147483647  ;;  %v2612_v45 = vsel %vm496_vm4, %v2427_v12, 2147483647 }
  0xe6   : > { %5516 = vst [vmem:[#allocation32_spill] sm:$0xff] %v2593_v36  ;;  %vm503_vm15 = vcmp.lt.f32.partialorder %v2343_v61, 0.09 }
  0xe7   : > { %v526_v1 = vmul.f32 11.111111, %v2569_v13  ;;  %v1319_v37 = vmul.f32 11.111111, %v2571_v22  ;;  %vm510_vm10 = vcmp.lt.f32.partialorder %v2569_v13, 0.09 }
  0xe8   : > { %vm1303_vm11 = vcmp.lt.f32.partialorder %v2571_v22, 0.09  ;;  %5519 = vst [vmem:[#allocation35_spill] sm:$0xff] %v2612_v45 }
  0xe9   : > { %v565_v56 = vpop.permute.xlu1 %564  ;;  %v542_v35 = vsub.f32 1.0, %v526_v1  ;;  %v1335_v7 = vsub.f32 1.0, %v1319_v37  ;;  %v2606_v39 = vpop.permute.xlu0 %597  ;;  %5523 = vst [vmem:[#allocation39_spill] sm:$0xff] %v2632_v46 }
  0xea   : > { %v2584_v48 = vsel %vm1290_vm8, %v565_v56, 2147483647  ;;  %vm500_vm8 = vcmp.lt.f32.partialorder %v2301_v17, 0.09 }
  0xeb   : > { %5515 = vst [vmem:[#allocation31_spill] sm:$0xff] %v2584_v48  ;;  %vm1371_vm6 = vcmp.lt.s32.totalorder %v2584_v48, %v2580_v38  ;;  %v2599_v25 = vsel %vm510_vm10, %v542_v35, 0.0  ;;  %v2603_v2 = vsel %vm1303_vm11, %v1335_v7, 0.0  ;;  %v2628_v35 = vsel %vm504_vm5, %v586_v44, 2147483647 }
  0xec   : > { %v1372_v0 = vsel %vm1371_vm6, %v2584_v48, %v2580_v38  ;;  %5517 = vst [vmem:[#allocation33_spill] sm:$0xff] %v2599_v25  ;;  %v2650_v44 = vsel %vm499_vm0, %v2462_v26, 2147483647  ;;  %vm5527_vm5 = vcmp.lt.f32.partialorder %v2345_v62, 0.09 }
  0xed   : > { %5518 = vst [vmem:[#allocation34_spill] sm:$0xff] %v2603_v2  ;;  %vm1379_vm2 = vcmp.lt.s32.totalorder %v1372_v0, %v2593_v36 }
  0xee   : > { %5522 = vst [vmem:[#allocation38_spill] sm:$0xff] %v2628_v35  ;;  %v2645_v55 = vsel %vm1379_vm2, %v1372_v0, %v2593_v36 }
  0xef   : > { %5524 = vst [vmem:[#allocation40_spill] sm:$0xff] %v2650_v44 }
  0xf1   : > { %v574_v51 = vpop.permute.xlu1 %573  ;;  %v607_v33 = vpop.permute.xlu0 %606 }
  0xf2   : > { %v2616_v1 = vsel %vm500_vm8, %v574_v51, 2147483647  ;;  %v2620_v37 = vsel %vm1293_vm9, %v574_v51, 2147483647  ;;  %v595_v51 = vpop.permute.xlu2 %594 }
  0xf3   : > { %5520 = vst [vmem:[#allocation36_spill] sm:$0xff] %v2616_v1  ;;  %vm624_vm14 = vcmp.lt.s32.totalorder %v2612_v45, %v2616_v1  ;;  %vm1369_vm6 = vcmp.lt.s32.totalorder %v2433_v30, %v2620_v37  ;;  %v2676_v60 = vsel %vm1300_vm7, %v595_v51, 2147483647 }
  0xf4   : > { %5521 = vst [vmem:[#allocation37_spill] sm:$0xff] %v2620_v37  ;;  %v625_v12 = vsel %vm624_vm14, %v2612_v45, %v2616_v1  ;;  %v1370_v18 = vsel %vm1369_vm6, %v2433_v30, %v2620_v37  ;;  %vm5529_vm14 = vcmp.lt.f32.partialorder %v2457_v5, 0.09  ;;  %v2691_v5 = vsel %vm1304_vm13, %v607_v33, 2147483647 }
  0xf5   : > { %vm632_vm4 = vcmp.lt.s32.totalorder %v625_v12, %v2628_v35  ;;  %vm1377_vm9 = vcmp.lt.s32.totalorder %v1370_v18, %v2632_v46  ;;  %v2672_v59 = vsel %vm5529_vm14, %v595_v51, 2147483647  ;;  %5531 = vst [vmem:[#allocation45_spill] sm:$0xff] %v2676_v60 }
  0xf6   : > { %v633_v7 = vsel %vm632_vm4, %v625_v12, %v2628_v35  ;;  %v1378_v54 = vsel %vm1377_vm9, %v1370_v18, %v2632_v46  ;;  %v2656_v12 = vsel %vm1292_vm1, %v2462_v26, 2147483647  ;;  %5530 = vst [vmem:[#allocation44_spill] sm:$0xff] %v2672_v59  ;;  %vm5532_vm1 = vcmp.lt.f32.partialorder %v2315_v24, 0.09 }
  0xf7   : > { %5525 = vst [vmem:[#allocation41_spill] sm:$0xff] %v2656_v12  ;;  %vm501_vm9 = vcmp.lt.f32.partialorder %v2222_v63, 0.09 }
  0xf8   : > { %5534 = vst [vmem:[#allocation47_spill] sm:$0xff] %v2691_v5  ;;  %v2698_v24 = vsel %vm501_vm9, %v2553_v27, 2147483647  ;;  %v2713_v27 = vsel %vm511_vm12, %v607_v33, 2147483647 }
  0xf9   : > { %v583_v2 = vpop.permute.xlu1 %582  ;;  %5535 = vst [vmem:[#allocation48_spill] sm:$0xff] %v2698_v24 }
  0xfa   : > { %v2660_v18 = vsel %vm503_vm15, %v583_v2, 2147483647  ;;  %v2664_v0 = vsel %vm5527_vm5, %v583_v2, 2147483647  ;;  %v2684_v2 = vsel %vm5532_vm1, %v565_v56, 2147483647 }
  0xfb   : > { %5526 = vst [vmem:[#allocation42_spill] sm:$0xff] %v2660_v18  ;;  %vm630_vm0 = vcmp.lt.s32.totalorder %v2650_v44, %v2660_v18  ;;  %vm1375_vm2 = vcmp.lt.s32.totalorder %v2656_v12, %v2664_v0  ;;  %v2703_v56 = vsel %vm1301_vm3, %v2606_v39, 2147483647  ;;  %vm626_vm13 = vcmp.lt.s32.totalorder %v2684_v2, %v2698_v24 }
  0xfc   : > { %5528 = vst [vmem:[#allocation43_spill] sm:$0xff] %v2664_v0  ;;  %v631_v62 = vsel %vm630_vm0, %v2650_v44, %v2660_v18  ;;  %v1376_v26 = vsel %vm1375_vm2, %v2656_v12, %v2664_v0  ;;  %vm1385_vm5 = vcmp.lt.s32.totalorder %v1378_v54, %v2703_v56  ;;  %vm5538_vm3 = vcmp.lt.f32.partialorder %v2386_v52, 0.09 }
  0xfd   : > { %5533 = vst [vmem:[#allocation46_spill] sm:$0xff] %v2684_v2  ;;  %vm638_vm6 = vcmp.lt.s32.totalorder %v631_v62, %v2672_v59  ;;  %vm1383_vm4 = vcmp.lt.s32.totalorder %v1376_v26, %v2676_v60  ;;  %v1386_v32 = vsel %vm1385_vm5, %v1378_v54, %v2703_v56  ;;  %vm5540_vm0 = vcmp.lt.f32.partialorder %v2388_v53, 0.09 }
  0xfe   : > { %v639_v16 = vsel %vm638_vm6, %v631_v62, %v2672_v59  ;;  %v1384_v51 = vsel %vm1383_vm4, %v1376_v26, %v2676_v60  ;;  %5536 = vst [vmem:[#allocation49_spill] sm:$0xff] %v2703_v56  ;;  %v604_v62 = vpop.permute.xlu2 %603  ;;  %vm5544_vm4 = vcmp.lt.f32.partialorder %v2382_v50, 0.09 }
  0xff   : > { %vm1391_vm7 = vcmp.lt.s32.totalorder %v1384_v51, %v2691_v5  ;;  %5537 = vst [vmem:[#allocation50_spill] sm:$0xff] %v2713_v27  ;;  %vm646_vm2 = vcmp.lt.s32.totalorder %v639_v16, %v2713_v27  ;;  %v2732_v19 = vsel %vm510_vm10, %v604_v62, 2147483647  ;;  %v2736_v52 = vsel %vm1303_vm11, %v604_v62, 2147483647 }
 0x100   : > { %v1392_v8 = vsel %vm1391_vm7, %v1384_v51, %v2691_v5  ;;  %v627_v51 = vsel %vm626_vm13, %v2684_v2, %v2698_v24  ;;  %5542 = vst [vmem:[#allocation53_spill] sm:$0xff] %v2732_v19  ;;  %v2747_v13 = vsel %vm5544_vm4, %v2573_v31, 2147483647  ;;  %v647_v22 = vsel %vm646_vm2, %v639_v16, %v2713_v27 }
 0x101   : > { %v592_v26 = vpop.permute.xlu1 %591  ;;  %5543 = vst [vmem:[#allocation54_spill] sm:$0xff] %v2736_v52  ;;  %vm634_vm10 = vcmp.lt.s32.totalorder %v627_v51, %v2747_v13  ;;  %vm5546_vm13 = vcmp.lt.f32.partialorder %v2539_v41, 0.09 }
 0x102   : > { %v2717_v23 = vsel %vm5538_vm3, %v592_v26, 2147483647  ;;  %v2721_v21 = vsel %vm5540_vm0, %v592_v26, 2147483647  ;;  %5545 = vst [vmem:[#allocation55_spill] sm:$0xff] %v2747_v13  ;;  %v635_v31 = vsel %vm634_vm10, %v627_v51, %v2747_v13 }
 0x103   : > { %5539 = vst [vmem:[#allocation51_spill] sm:$0xff] %v2717_v23  ;;  %vm636_vm14 = vcmp.lt.s32.totalorder %v2524_v3, %v2717_v23  ;;  %vm1381_vm12 = vcmp.lt.s32.totalorder %v2528_v6, %v2721_v21  ;;  %vm5548_vm3 = vcmp.lt.f32.partialorder %v2486_v9, 0.09  ;;  %v517_v51 = vmul.f32 11.111111, %v2222_v63 }
 0x104   : > { %5541 = vst [vmem:[#allocation52_spill] sm:$0xff] %v2721_v21  ;;  %v637_v53 = vsel %vm636_vm14, %v2524_v3, %v2717_v23  ;;  %v1382_v33 = vsel %vm1381_vm12, %v2528_v6, %v2721_v21  ;;  %v2756_v3 = vsel %vm5546_vm13, %v2606_v39, 2147483647 }
 0x105   : > { %vm644_vm1 = vcmp.lt.s32.totalorder %v637_v53, %v2732_v19  ;;  %vm1389_vm6 = vcmp.lt.s32.totalorder %v1382_v33, %v2736_v52  ;;  %5547 = vst [vmem:[#allocation56_spill] sm:$0xff] %v2756_v3  ;;  %vm640_vm5 = vcmp.lt.s32.totalorder %v633_v7, %v2756_v3 }
 0x106   : > { %v645_v54 = vsel %vm644_vm1, %v637_v53, %v2732_v19  ;;  %v1390_v62 = vsel %vm1389_vm6, %v1382_v33, %v2736_v52  ;;  %v641_v16 = vsel %vm640_vm5, %v633_v7, %v2756_v3  ;;  %vm5550_vm1 = vcmp.lt.f32.partialorder %v2543_v49, 0.09 }
 0x107   : > { %vm650_vm11 = vcmp.lt.s32.totalorder %v645_v54, %v647_v22  ;;  %vm1395_vm7 = vcmp.lt.s32.totalorder %v1390_v62, %v1392_v8 }
 0x108   : > { %v651_v6 = vsel %vm650_vm11, %v645_v54, %v647_v22  ;;  %v1396_v54 = vsel %vm1395_vm7, %v1390_v62, %v1392_v8  ;;  %v533_v62 = vsub.f32 1.0, %v517_v51 }
 0x109   : > { %v601_v26 = vpop.permute.xlu1 %600 }
 0x10a   : > { %v2761_v50 = vsel %vm5548_vm3, %v601_v26, 2147483647  ;;  %v2769_v9 = vsel %vm5550_vm1, %v601_v26, 2147483647 }
 0x10b   : > { %5549 = vst [vmem:[#allocation57_spill] sm:$0xff] %v2761_v50  ;;  %vm642_vm0 = vcmp.lt.s32.totalorder %v635_v31, %v2761_v50  ;;  %vm1387_vm6 = vcmp.lt.s32.totalorder %v2645_v55, %v2769_v9 }
 0x10c   : > { %v643_v53 = vsel %vm642_vm0, %v635_v31, %v2761_v50  ;;  %5551 = vst [vmem:[#allocation58_spill] sm:$0xff] %v2769_v9  ;;  %v1388_v31 = vsel %vm1387_vm6, %v2645_v55, %v2769_v9  ;;  %v2782_v55 = vsel %vm501_vm9, %v533_v62, 0.0 }
 0x10d   : > { %vm648_vm2 = vcmp.lt.s32.totalorder %v641_v16, %v643_v53  ;;  %vm1393_vm4 = vcmp.lt.s32.totalorder %v1386_v32, %v1388_v31  ;;  %5553 = vst [vmem:[#allocation60_spill] sm:$0xff] %v2782_v55 }
 0x10e   : > { %v649_v41 = vsel %vm648_vm2, %v641_v16, %v643_v53  ;;  %v516_v16 = vmul.f32 11.111111, %v2301_v17  ;;  %v1394_v8 = vsel %vm1393_vm4, %v1386_v32, %v1388_v31 }
 0x10f   : > { %vm652_vm14 = vcmp.lt.s32.totalorder %v649_v41, %v651_v6  ;;  %vm1397_vm11 = vcmp.lt.s32.totalorder %v1394_v8, %v1396_v54 }
 0x110   : > { %v653_v39 = vsel %vm652_vm14, %v649_v41, %v651_v6  ;;  %v519_v6 = vmul.f32 11.111111, %v2343_v61  ;;  %v1398_v53 = vsel %vm1397_vm11, %v1394_v8, %v1396_v54  ;;  %v532_v41 = vsub.f32 1.0, %v516_v16 }
 0x111   : > { %v654_v33 = vrot.slane %v653_v39, 4 }
 0x112   : > { %v2786_v52 = vsel %vm500_vm8, %v532_v41, 0.0 }
 0x113   : > { %vm655_vm12 = vcmp.lt.s32.totalorder %v653_v39, %v654_v33  ;;  %5554 = vst [vmem:[#allocation61_spill] sm:$0xff] %v2786_v52 }
 0x114   : > { %v656_v22 = vsel %vm655_vm12, %v653_v39, %v654_v33  ;;  %v535_v39 = vsub.f32 1.0, %v519_v6  ;;  %v1399_v33 = vrot.slane %v1398_v53, 4 }
 0x115   : > { %v657_v7 = vrot.slane %v656_v22, 2 }
 0x116   : > { %v2790_v32 = vsel %vm503_vm15, %v535_v39, 0.0  ;;  %vm2802_vm0 = vcmp.lt.s32.totalorder %v1398_v53, %v1399_v33 }
 0x117   : > { %vm658_vm10 = vcmp.lt.s32.totalorder %v656_v22, %v657_v7  ;;  %5555 = vst [vmem:[#allocation62_spill] sm:$0xff] %v2790_v32 }
 0x118   : > { %v659_v49 = vsel %vm658_vm10, %v656_v22, %v657_v7 }
 0x119   : > { %v660_v26 = vrot.slane %v659_v49, 1 }
 0x11b   : > { %vm661_vm7 = vcmp.lt.s32.totalorder %v659_v49, %v660_v26 }
 0x11c   : > { %v2778_v5 = vsel %vm661_vm7, %v659_v49, %v660_v26  ;;  %v1401_v26 = vsel %vm2802_vm0, %v1398_v53, %v1399_v33 }
 0x11d   : > { %5552 = vst [vmem:[#allocation59_spill] sm:$0xff] %v2778_v5  ;;  %vm5177_vm13 = vcmp.eq.s32.totalorder %v2612_v45, %v2778_v5  ;;  %vm5184_vm5 = vcmp.eq.s32.totalorder %v2684_v2, %v2778_v5  ;;  %vm5187_vm3 = vcmp.eq.s32.totalorder %v2491_v40, %v2778_v5  ;;  %vm5190_vm9 = vcmp.eq.s32.totalorder %v2650_v44, %v2778_v5 }
 0x11e   : > { %vm5193_vm8 = vcmp.eq.s32.totalorder %v2616_v1, %v2778_v5  ;;  %vm5198_vm15 = vcmp.eq.s32.totalorder %v2698_v24, %v2778_v5  ;;  %vm5206_vm2 = vcmp.eq.s32.totalorder %v2505_v15, %v2778_v5  ;;  %vm5207_vm14 = vcmp.eq.s32.totalorder %v2660_v18, %v2778_v5 }
 0x11f   : > { %vm5208_vm12 = vcmp.eq.s32.totalorder %v2628_v35, %v2778_v5  ;;  %vm5209_vm1 = vcmp.eq.s32.totalorder %v2747_v13, %v2778_v5  ;;  %v679_v17 = vsel %vm5177_vm13, %v2307_v20, 0.0  ;;  %v680_v61 = vsel %vm5184_vm5, %v2340_v57, 0.0 }
 0x120   : > { %vm5210_vm4 = vcmp.eq.s32.totalorder %v2672_v59, %v2778_v5  ;;  %vm5211_vm10 = vcmp.eq.s32.totalorder %v2756_v3, %v2778_v5  ;;  %vm5218_vm11 = vcmp.eq.s32.totalorder %v2761_v50, %v2778_v5  ;;  %vm5219_vm7 = vcmp.eq.s32.totalorder %v2732_v19, %v2778_v5 }
 0x121   : > { %vm5220_vm6 = vcmp.eq.s32.totalorder %v2713_v27, %v2778_v5  ;;  %v681_v54 = vsel %vm5187_vm3, %v2297_v14, 0.0  ;;  %v682_v22 = vsel %vm5190_vm9, %v2239_v10, 0.0  ;;  %v683_v51 = vsel %vm5193_vm8, %v2786_v52, 0.0 }
 0x122   : > { %v684_v7 = vsel %vm5198_vm15, %v2782_v55, 0.0  ;;  %v685_v31 = vsel %vm5206_vm2, %v2376_v4, 0.0  ;;  %v686_v16 = vsel %vm5207_vm14, %v2790_v32, 0.0  ;;  %v695_v6 = vadd.f32 %v680_v61, %v679_v17 }
 0x123   : > { %v2864_v8 = vsel %vm5177_vm13, 2147483647, %v2612_v45  ;;  %v2870_v49 = vsel %vm5184_vm5, 2147483647, %v2684_v2  ;;  %v2876_v62 = vsel %vm5187_vm3, 2147483647, %v2491_v40  ;;  %vm5568_vm13 = vcmp.eq.s32.totalorder %v2717_v23, %v2778_v5 }
 0x124   : > { %5558 = vst [vmem:[#allocation63_spill] sm:$0xff] %v2864_v8  ;;  %v696_v41 = vadd.f32 %v695_v6, %v681_v54  ;;  %v2884_v39 = vsel %vm5190_vm9, 2147483647, %v2650_v44  ;;  %v2890_v17 = vsel %vm5193_vm8, 2147483647, %v2616_v1 }
 0x125   : > { %5559 = vst [vmem:[#allocation64_spill] sm:$0xff] %v2870_v49  ;;  %v2896_v61 = vsel %vm5198_vm15, 2147483647, %v2698_v24  ;;  %v2902_v53 = vsel %vm5206_vm2, 2147483647, %v2505_v15  ;;  %vm767_vm0 = vcmp.lt.s32.totalorder %v2864_v8, %v2890_v17 }
 0x126   : > { %5560 = vst [vmem:[#allocation65_spill] sm:$0xff] %v2876_v62  ;;  %v2908_v33 = vsel %vm5207_vm14, 2147483647, %v2660_v18  ;;  %v2914_v63 = vsel %vm5208_vm12, 2147483647, %v2628_v35  ;;  %v697_v54 = vadd.f32 %v696_v41, %v682_v22  ;;  %v768_v44 = vsel %vm767_vm0, %v2864_v8, %v2890_v17 }
 0x127   : > { %5561 = vst [vmem:[#allocation66_spill] sm:$0xff] %v2884_v39  ;;  %v2922_v6 = vsel %vm5209_vm1, 2147483647, %v2747_v13  ;;  %v2928_v45 = vsel %vm5568_vm13, 2147483647, %v2717_v23  ;;  %vm769_vm13 = vcmp.lt.s32.totalorder %v2870_v49, %v2896_v61  ;;  %vm771_vm5 = vcmp.lt.s32.totalorder %v2876_v62, %v2902_v53 }
 0x128   : > { %5562 = vst [vmem:[#allocation67_spill] sm:$0xff] %v2890_v17  ;;  %v2934_v2 = vsel %vm5210_vm4, 2147483647, %v2672_v59  ;;  %v2940_v22 = vsel %vm5211_vm10, 2147483647, %v2756_v3  ;;  %v698_v1 = vadd.f32 %v697_v54, %v683_v51  ;;  %v770_v15 = vsel %vm769_vm13, %v2870_v49, %v2896_v61  ;;  %v5588_v3 = vld [vmem:[#allocation16_spill] sm:$0xff] }
 0x129   : > { %5563 = vst [vmem:[#allocation68_spill] sm:$0xff] %v2896_v61  ;;  %v2946_v41 = vsel %vm5218_vm11, 2147483647, %v2761_v50  ;;  %v2952_v40 = vsel %vm5219_vm7, 2147483647, %v2732_v19  ;;  %v772_v18 = vsel %vm771_vm5, %v2876_v62, %v2902_v53  ;;  %vm773_vm0 = vcmp.lt.s32.totalorder %v2884_v39, %v2908_v33  ;;  %v5589_v19 = vld [vmem:[#allocation18_spill] sm:$0xff] }
 0x12a   : > { %5564 = vst [vmem:[#allocation69_spill] sm:$0xff] %v2902_v53  ;;  %v2960_v24 = vsel %vm5220_vm6, 2147483647, %v2713_v27  ;;  %vm775_vm3 = vcmp.lt.s32.totalorder %v768_v44, %v2914_v63  ;;  %v699_v51 = vadd.f32 %v698_v1, %v684_v7  ;;  %v774_v54 = vsel %vm773_vm0, %v2884_v39, %v2908_v33 }
 0x12b   : > { %5565 = vst [vmem:[#allocation70_spill] sm:$0xff] %v2908_v33  ;;  %v776_v27 = vsel %vm775_vm3, %v768_v44, %v2914_v63  ;;  %vm777_vm9 = vcmp.lt.s32.totalorder %v770_v15, %v2922_v6  ;;  %vm779_vm13 = vcmp.lt.s32.totalorder %v772_v18, %v2928_v45  ;;  %vm781_vm8 = vcmp.lt.s32.totalorder %v774_v54, %v2934_v2 }
 0x12c   : > { %5566 = vst [vmem:[#allocation71_spill] sm:$0xff] %v2914_v63  ;;  %v778_v9 = vsel %vm777_vm9, %v770_v15, %v2922_v6  ;;  %vm783_vm5 = vcmp.lt.s32.totalorder %v776_v27, %v2940_v22  ;;  %v700_v56 = vadd.f32 %v699_v51, %v685_v31  ;;  %v780_v32 = vsel %vm779_vm13, %v772_v18, %v2928_v45 }
 0x12d   : > { %5567 = vst [vmem:[#allocation72_spill] sm:$0xff] %v2922_v6  ;;  %v782_v1 = vsel %vm781_vm8, %v774_v54, %v2934_v2  ;;  %v784_v7 = vsel %vm783_vm5, %v776_v27, %v2940_v22  ;;  %vm785_vm0 = vcmp.lt.s32.totalorder %v778_v9, %v2946_v41  ;;  %vm787_vm3 = vcmp.lt.s32.totalorder %v780_v32, %v2952_v40 }
 0x12e   : > { %5569 = vst [vmem:[#allocation73_spill] sm:$0xff] %v2928_v45  ;;  %vm789_vm15 = vcmp.lt.s32.totalorder %v782_v1, %v2960_v24  ;;  %v1402_v15 = vrot.slane %v1401_v26, 2  ;;  %v701_v44 = vadd.f32 %v700_v56, %v686_v16  ;;  %v786_v4 = vsel %vm785_vm0, %v778_v9, %v2946_v41 }
 0x12f   : > { %5570 = vst [vmem:[#allocation74_spill] sm:$0xff] %v2934_v2  ;;  %v788_v55 = vsel %vm787_vm3, %v780_v32, %v2952_v40  ;;  %v790_v31 = vsel %vm789_vm15, %v782_v1, %v2960_v24  ;;  %v687_v18 = vsel %vm5208_vm12, %v2448_v34, 0.0  ;;  %vm791_vm9 = vcmp.lt.s32.totalorder %v784_v7, %v786_v4 }
 0x130   : > { %5571 = vst [vmem:[#allocation75_spill] sm:$0xff] %v2940_v22  ;;  %vm793_vm8 = vcmp.lt.s32.totalorder %v788_v55, %v790_v31  ;;  %vm1403_vm13 = vcmp.lt.s32.totalorder %v1401_v26, %v1402_v15  ;;  %v702_v27 = vadd.f32 %v701_v44, %v687_v18  ;;  %v792_v51 = vsel %vm791_vm9, %v784_v7, %v786_v4 }
 0x131   : > { %5572 = vst [vmem:[#allocation76_spill] sm:$0xff] %v2946_v41  ;;  %v794_v54 = vsel %vm793_vm8, %v788_v55, %v790_v31  ;;  %v1404_v52 = vsel %vm1403_vm13, %v1401_v26, %v1402_v15  ;;  %v688_v56 = vsel %vm5209_vm1, %v2409_v28, 0.0  ;;  %vm5575_vm15 = vcmp.eq.s32.totalorder %v2717_v23, %v2778_v5  ;;  %v5587_v23 = vld [vmem:[#allocation20_spill] sm:$0xff] }
 0x132   : > { %5573 = vst [vmem:[#allocation77_spill] sm:$0xff] %v2952_v40  ;;  %vm795_vm5 = vcmp.lt.s32.totalorder %v792_v51, %v794_v54  ;;  %v1405_v9 = vrot.slane %v1404_v52, 1  ;;  %v703_v32 = vadd.f32 %v702_v27, %v688_v56  ;;  %v689_v1 = vsel %vm5575_vm15, %v2420_v42, 0.0  ;;  %v5595_v5 = vld [vmem:[#allocation12_spill] sm:$0xff] }
 0x133   : > { %5574 = vst [vmem:[#allocation78_spill] sm:$0xff] %v2960_v24  ;;  %v796_v16 = vsel %vm795_vm5, %v792_v51, %v794_v54  ;;  %v690_v4 = vsel %vm5210_vm4, %v2474_v47, 0.0  ;;  %v691_v15 = vsel %vm5211_vm10, %v2559_v11, 0.0  ;;  %v692_v31 = vsel %vm5218_vm11, %v2535_v58, 0.0 }
 0x134   : > { %v797_v35 = vrot.slane %v796_v16, 4  ;;  %vm1406_vm0 = vcmp.lt.s32.totalorder %v1404_v52, %v1405_v9  ;;  %v704_v44 = vadd.f32 %v703_v32, %v689_v1  ;;  %v693_v27 = vsel %vm5219_vm7, %v2599_v25, 0.0 }
 0x135   : > { %v3006_v55 = vsel %vm1406_vm0, %v1404_v52, %v1405_v9  ;;  %v5578_v9 = vld [vmem:[#allocation7_spill] sm:$0xff] }
 0x136   : > { %vm798_vm3 = vcmp.lt.s32.totalorder %v796_v16, %v797_v35  ;;  %5576 = vst [vmem:[#allocation79_spill] sm:$0xff] %v3006_v55  ;;  %v705_v26 = vadd.f32 %v704_v44, %v690_v4  ;;  %vm5232_vm9 = vcmp.eq.s32.totalorder %v2433_v30, %v3006_v55  ;;  %vm5231_vm8 = vcmp.eq.s32.totalorder %v2584_v48, %v3006_v55  ;;  %v5580_v44 = vld [vmem:[#allocation8_spill] sm:$0xff] }
 0x137   : > { %v799_v7 = vsel %vm798_vm3, %v796_v16, %v797_v35  ;;  %vm5230_vm5 = vcmp.eq.s32.totalorder %v2495_v29, %v3006_v55  ;;  %vm5228_vm15 = vcmp.eq.s32.totalorder %v2656_v12, %v3006_v55  ;;  %vm5229_vm0 = vcmp.eq.s32.totalorder %v2620_v37, %v3006_v55  ;;  %v5579_v16 = vld [vmem:[#allocation10_spill] sm:$0xff] }
 0x138   : > { %v800_v18 = vrot.slane %v799_v7, 2  ;;  %v706_v52 = vadd.f32 %v705_v26, %v691_v15  ;;  %vm5227_vm3 = vcmp.eq.s32.totalorder %v2580_v38, %v3006_v55  ;;  %vm5225_vm2 = vcmp.eq.s32.totalorder %v2509_v43, %v3006_v55  ;;  %v5581_v26 = vld [vmem:[#allocation3_spill] sm:$0xff] }
 0x139   : > { %vm5224_vm14 = vcmp.eq.s32.totalorder %v2664_v0, %v3006_v55  ;;  %vm5223_vm12 = vcmp.eq.s32.totalorder %v2632_v46, %v3006_v55  ;;  %vm5222_vm1 = vcmp.eq.s32.totalorder %v2593_v36, %v3006_v55  ;;  %vm5226_vm4 = vcmp.eq.s32.totalorder %v2676_v60, %v3006_v55 }
 0x13a   : > { %vm801_vm13 = vcmp.lt.s32.totalorder %v799_v7, %v800_v18  ;;  %v707_v35 = vadd.f32 %v706_v52, %v692_v31  ;;  %v1424_v32 = vsel %vm5232_vm9, %v5578_v9, 0.0  ;;  %v1425_v1 = vsel %vm5231_vm8, %v5579_v16, 0.0  ;;  %v5583_v31 = vld [vmem:[#allocation11_spill] sm:$0xff]  ;;  %v5596_v9 = vld [vmem:[#allocation62_spill] sm:$0xff] }
 0x13b   : > { %v802_v51 = vsel %vm801_vm13, %v799_v7, %v800_v18  ;;  %vm5221_vm13 = vcmp.eq.s32.totalorder %v2721_v21, %v3006_v55  ;;  %v3058_v4 = vsel %vm5230_vm5, %v5580_v44, 0.0  ;;  %v3064_v7 = vsel %vm5228_vm15, %v5581_v26, 0.0  ;;  %v5594_v26 = vld [vmem:[#allocation60_spill] sm:$0xff] }
 0x13c   : > { %v803_v54 = vrot.slane %v802_v51, 1  ;;  %v3040_v56 = vadd.f32 %v707_v35, %v693_v27  ;;  %v3072_v18 = vsel %vm5229_vm0, %v5583_v31, 0.0  ;;  %v5584_v27 = vld [vmem:[#allocation4_spill] sm:$0xff]  ;;  %v5585_v35 = vld [vmem:[#allocation13_spill] sm:$0xff]  ;;  %v3096_v59 = vsel %vm5223_vm12, %v5587_v23, 0.0 }
 0x13d   : > { %v3078_v52 = vsel %vm5227_vm3, %v5584_v27, 0.0  ;;  %v3084_v13 = vsel %vm5225_vm2, %v5585_v35, 0.0  ;;  %v3102_v50 = vsel %vm5222_vm1, %v5588_v3, 0.0  ;;  %v5591_v23 = vld [vmem:[#allocation21_spill] sm:$0xff] }
 0x13e   : > { %5577 = vst [vmem:[#allocation80_spill] sm:$0xff] %v3040_v56  ;;  %vm804_vm10 = vcmp.lt.s32.totalorder %v802_v51, %v803_v54  ;;  %v3108_v56 = vsel %vm5221_vm13, %v5589_v19, 0.0  ;;  %v3120_v3 = vsel %vm5226_vm4, %v5591_v23, 0.0  ;;  %v5593_v27 = vld [vmem:[#allocation61_spill] sm:$0xff] }
 0x13f   : > { %v3066_v15 = vsel %vm804_vm10, %v802_v51, %v803_v54  ;;  %v5586_v51 = vld [vmem:[#allocation14_spill] sm:$0xff]  ;;  %5590 = vst [vmem:[#allocation82_spill] sm:$0xff] %v3108_v56 }
 0x140   : > { %5582 = vst [vmem:[#allocation81_spill] sm:$0xff] %v3066_v15  ;;  %v3090_v54 = vsel %vm5224_vm14, %v5586_v51, 0.0  ;;  %vm5241_vm10 = vcmp.eq.s32.totalorder %v2864_v8, %v3066_v15  ;;  %vm5245_vm11 = vcmp.eq.s32.totalorder %v2870_v49, %v3066_v15  ;;  %vm5250_vm7 = vcmp.eq.s32.totalorder %v2876_v62, %v3066_v15 }
 0x141   : > { %5592 = vst [vmem:[#allocation83_spill] sm:$0xff] %v3120_v3  ;;  %vm5254_vm6 = vcmp.eq.s32.totalorder %v2884_v39, %v3066_v15  ;;  %vm5255_vm13 = vcmp.eq.s32.totalorder %v2890_v17, %v3066_v15  ;;  %vm5258_vm1 = vcmp.eq.s32.totalorder %v2896_v61, %v3066_v15  ;;  %vm5261_vm12 = vcmp.eq.s32.totalorder %v2902_v53, %v3066_v15 }
 0x142   : > { %vm5266_vm14 = vcmp.eq.s32.totalorder %v2908_v33, %v3066_v15  ;;  %vm5269_vm2 = vcmp.eq.s32.totalorder %v2914_v63, %v3066_v15  ;;  %vm5283_vm4 = vcmp.eq.s32.totalorder %v2922_v6, %v3066_v15  ;;  %vm5288_vm3 = vcmp.eq.s32.totalorder %v2928_v45, %v3066_v15 }
 0x143   : > { %vm5289_vm15 = vcmp.eq.s32.totalorder %v2934_v2, %v3066_v15  ;;  %vm5291_vm0 = vcmp.eq.s32.totalorder %v2940_v22, %v3066_v15  ;;  %v822_v23 = vsel %vm5241_vm10, %v2307_v20, 0.0  ;;  %v823_v19 = vsel %vm5245_vm11, %v2340_v57, 0.0 }
 0x144   : > { %vm5294_vm5 = vcmp.eq.s32.totalorder %v2946_v41, %v3066_v15  ;;  %vm5295_vm8 = vcmp.eq.s32.totalorder %v2952_v40, %v3066_v15  ;;  %vm5296_vm9 = vcmp.eq.s32.totalorder %v2960_v24, %v3066_v15  ;;  %v824_v51 = vsel %vm5250_vm7, %v2297_v14, 0.0  ;;  %v5615_v14 = vld [vmem:[#allocation54_spill] sm:$0xff] }
 0x145   : > { %v825_v35 = vsel %vm5254_vm6, %v2239_v10, 0.0  ;;  %v826_v31 = vsel %vm5255_vm13, %v5593_v27, 0.0  ;;  %v827_v44 = vsel %vm5258_vm1, %v5594_v26, 0.0  ;;  %v828_v16 = vsel %vm5261_vm12, %v5595_v5, 0.0 }
 0x146   : > { %v829_v3 = vsel %vm5266_vm14, %v5596_v9, 0.0  ;;  %v830_v56 = vsel %vm5269_vm2, %v2448_v34, 0.0  ;;  %v3188_v26 = vsel %vm5283_vm4, %v2409_v28, 0.0  ;;  %v838_v27 = vadd.f32 %v823_v19, %v822_v23 }
 0x147   : > { %v3194_v5 = vsel %vm5241_vm10, 2147483647, %v2864_v8  ;;  %v3200_v9 = vsel %vm5245_vm11, 2147483647, %v2870_v49  ;;  %v3206_v34 = vsel %vm5250_vm7, 2147483647, %v2876_v62  ;;  %v1440_v28 = vadd.f32 %v1425_v1, %v1424_v32 }
 0x148   : > { %5597 = vst [vmem:[#allocation84_spill] sm:$0xff] %v3194_v5  ;;  %v839_v23 = vadd.f32 %v838_v27, %v824_v51  ;;  %v3212_v19 = vsel %vm5254_vm6, 2147483647, %v2884_v39  ;;  %v3218_v8 = vsel %vm5255_vm13, 2147483647, %v2890_v17 }
 0x149   : > { %5598 = vst [vmem:[#allocation85_spill] sm:$0xff] %v3200_v9  ;;  %v3224_v49 = vsel %vm5258_vm1, 2147483647, %v2896_v61  ;;  %v3230_v32 = vsel %vm5261_vm12, 2147483647, %v2902_v53  ;;  %vm912_vm10 = vcmp.lt.s32.totalorder %v3194_v5, %v3218_v8  ;;  %vm5293_vm1 = vcmp.eq.s32.totalorder %v5615_v14, %v3006_v55 }
 0x14a   : > { %5599 = vst [vmem:[#allocation86_spill] sm:$0xff] %v3206_v34  ;;  %v3236_v1 = vsel %vm5266_vm14, 2147483647, %v2908_v33  ;;  %v3242_v27 = vsel %vm5269_vm2, 2147483647, %v2914_v63  ;;  %v840_v51 = vadd.f32 %v839_v23, %v825_v35  ;;  %v5609_v35 = vld [vmem:[#allocation49_spill] sm:$0xff]  ;;  %v913_v33 = vsel %vm912_vm10, %v3194_v5, %v3218_v8 }
 0x14b   : > { %5600 = vst [vmem:[#allocation87_spill] sm:$0xff] %v3212_v19  ;;  %v3250_v62 = vsel %vm5283_vm4, 2147483647, %v2922_v6  ;;  %v3256_v39 = vsel %vm5288_vm3, 2147483647, %v2928_v45  ;;  %vm5290_vm11 = vcmp.eq.s32.totalorder %v5609_v35, %v3006_v55  ;;  %v5613_v63 = vld [vmem:[#allocation58_spill] sm:$0xff]  ;;  %vm914_vm6 = vcmp.lt.s32.totalorder %v3200_v9, %v3224_v49 }
 0x14c   : > { %5601 = vst [vmem:[#allocation88_spill] sm:$0xff] %v3218_v8  ;;  %v3262_v17 = vsel %vm5289_vm15, 2147483647, %v2934_v2  ;;  %v3270_v23 = vsel %vm5291_vm0, 2147483647, %v2940_v22  ;;  %vm5292_vm7 = vcmp.eq.s32.totalorder %v5613_v63, %v3006_v55  ;;  %v841_v6 = vadd.f32 %v840_v51, %v826_v31  ;;  %v5616_v2 = vld [vmem:[#allocation28_spill] sm:$0xff] }
 0x14d   : > { %5602 = vst [vmem:[#allocation89_spill] sm:$0xff] %v3224_v49  ;;  %v3276_v61 = vsel %vm5294_vm5, 2147483647, %v2946_v41  ;;  %v3282_v53 = vsel %vm5295_vm8, 2147483647, %v2952_v40  ;;  %vm916_vm13 = vcmp.lt.s32.totalorder %v3206_v34, %v3230_v32  ;;  %v915_v57 = vsel %vm914_vm6, %v3200_v9, %v3224_v49  ;;  %v5658_v40 = vld [vmem:[#allocation60_spill] sm:$0xff] }
 0x14e   : > { %5603 = vst [vmem:[#allocation90_spill] sm:$0xff] %v3230_v32  ;;  %v3292_v10 = vsel %vm5296_vm9, 2147483647, %v2960_v24  ;;  %v917_v31 = vsel %vm916_vm13, %v3206_v34, %v3230_v32  ;;  %vm918_vm10 = vcmp.lt.s32.totalorder %v3212_v19, %v3236_v1  ;;  %vm920_vm12 = vcmp.lt.s32.totalorder %v913_v33, %v3242_v27 }
 0x14f   : > { %5604 = vst [vmem:[#allocation91_spill] sm:$0xff] %v3236_v1  ;;  %v842_v51 = vadd.f32 %v841_v6, %v827_v44  ;;  %v919_v24 = vsel %vm918_vm10, %v3212_v19, %v3236_v1  ;;  %v921_v20 = vsel %vm920_vm12, %v913_v33, %v3242_v27  ;;  %vm922_vm14 = vcmp.lt.s32.totalorder %v915_v57, %v3250_v62 }
 0x150   : > { %5605 = vst [vmem:[#allocation92_spill] sm:$0xff] %v3242_v27  ;;  %v923_v8 = vsel %vm922_vm14, %v915_v57, %v3250_v62  ;;  %vm924_vm6 = vcmp.lt.s32.totalorder %v917_v31, %v3256_v39  ;;  %vm926_vm2 = vcmp.lt.s32.totalorder %v919_v24, %v3262_v17  ;;  %vm928_vm13 = vcmp.lt.s32.totalorder %v921_v20, %v3270_v23 }
 0x151   : > { %5606 = vst [vmem:[#allocation93_spill] sm:$0xff] %v3250_v62  ;;  %v843_v49 = vadd.f32 %v842_v51, %v828_v16  ;;  %v925_v32 = vsel %vm924_vm6, %v917_v31, %v3256_v39  ;;  %v927_v6 = vsel %vm926_vm2, %v919_v24, %v3262_v17  ;;  %v929_v44 = vsel %vm928_vm13, %v921_v20, %v3270_v23 }
 0x152   : > { %5607 = vst [vmem:[#allocation94_spill] sm:$0xff] %v3256_v39  ;;  %v832_v33 = vsel %vm5288_vm3, %v2420_v42, 0.0  ;;  %vm930_vm14 = vcmp.lt.s32.totalorder %v923_v8, %v3276_v61  ;;  %vm932_vm12 = vcmp.lt.s32.totalorder %v925_v32, %v3282_v53  ;;  %vm934_vm10 = vcmp.lt.s32.totalorder %v927_v6, %v3292_v10 }
 0x153   : > { %5608 = vst [vmem:[#allocation95_spill] sm:$0xff] %v3262_v17  ;;  %v844_v57 = vadd.f32 %v843_v49, %v829_v3  ;;  %v931_v16 = vsel %vm930_vm14, %v923_v8, %v3276_v61  ;;  %v933_v31 = vsel %vm932_vm12, %v925_v32, %v3282_v53  ;;  %v935_v24 = vsel %vm934_vm10, %v927_v6, %v3292_v10 }
 0x154   : > { %5610 = vst [vmem:[#allocation96_spill] sm:$0xff] %v3270_v23  ;;  %v833_v20 = vsel %vm5289_vm15, %v2474_v47, 0.0  ;;  %v834_v51 = vsel %vm5291_vm0, %v2559_v11, 0.0  ;;  %vm936_vm2 = vcmp.lt.s32.totalorder %v929_v44, %v931_v16  ;;  %vm938_vm6 = vcmp.lt.s32.totalorder %v933_v31, %v935_v24 }
 0x155   : > { %5611 = vst [vmem:[#allocation97_spill] sm:$0xff] %v3276_v61  ;;  %v845_v45 = vadd.f32 %v844_v57, %v830_v56  ;;  %v937_v3 = vsel %vm936_vm2, %v929_v44, %v931_v16  ;;  %v939_v49 = vsel %vm938_vm6, %v933_v31, %v935_v24  ;;  %v1441_v8 = vadd.f32 %v1440_v28, %v3058_v4  ;;  %v5617_v4 = vld [vmem:[#allocation29_spill] sm:$0xff]  ;;  %v5618_v24 = vld [vmem:[#allocation34_spill] sm:$0xff] }
 0x156   : > { %5612 = vst [vmem:[#allocation98_spill] sm:$0xff] %v3282_v53  ;;  %v835_v32 = vsel %vm5294_vm5, %v2535_v58, 0.0  ;;  %v836_v6 = vsel %vm5295_vm8, %v2599_v25, 0.0  ;;  %vm940_vm13 = vcmp.lt.s32.totalorder %v937_v3, %v939_v49  ;;  %v3349_v56 = vsel %vm5290_vm11, %v5616_v2, 0.0 }
 0x157   : > { %5614 = vst [vmem:[#allocation99_spill] sm:$0xff] %v3292_v10  ;;  %v846_v44 = vadd.f32 %v845_v45, %v3188_v26  ;;  %v941_v28 = vsel %vm940_vm13, %v937_v3, %v939_v49  ;;  %v3356_v57 = vsel %vm5292_vm7, %v5617_v4, 0.0  ;;  %v1442_v16 = vadd.f32 %v1441_v8, %v3064_v7  ;;  %v5659_v4 = vld [vmem:[#allocation12_spill] sm:$0xff] }
 0x158   : > { %v942_v31 = vrot.slane %v941_v28, 4  ;;  %v3363_v22 = vsel %vm5293_vm1, %v5618_v24, 0.0  ;;  %vm5619_vm14 = vcmp.eq.s32.totalorder %v2433_v30, %v3006_v55  ;;  %vm5621_vm12 = vcmp.eq.s32.totalorder %v2584_v48, %v3006_v55 }
 0x159   : > { %v3369_v45 = vsel %vm5619_vm14, 2147483647, %v2433_v30  ;;  %v3375_v26 = vsel %vm5621_vm12, 2147483647, %v2584_v48  ;;  %v847_v7 = vadd.f32 %v846_v44, %v832_v33  ;;  %v1443_v3 = vadd.f32 %v1442_v16, %v3072_v18  ;;  %v5633_v48 = vld [vmem:[#allocation47_spill] sm:$0xff] }
 0x15a   : > { %5620 = vst [vmem:[#allocation100_spill] sm:$0xff] %v3369_v45  ;;  %vm5623_vm10 = vcmp.eq.s32.totalorder %v2495_v29, %v3006_v55  ;;  %vm5625_vm2 = vcmp.eq.s32.totalorder %v2620_v37, %v3006_v55  ;;  %vm943_vm6 = vcmp.lt.s32.totalorder %v941_v28, %v942_v31  ;;  %vm5627_vm13 = vcmp.eq.s32.totalorder %v2656_v12, %v3006_v55 }
 0x15b   : > { %5622 = vst [vmem:[#allocation101_spill] sm:$0xff] %v3375_v26  ;;  %v3382_v49 = vsel %vm5623_vm10, 2147483647, %v2495_v29  ;;  %v3388_v8 = vsel %vm5625_vm2, 2147483647, %v2620_v37  ;;  %vm5629_vm14 = vcmp.eq.s32.totalorder %v2580_v38, %v3006_v55  ;;  %vm5631_vm12 = vcmp.eq.s32.totalorder %v2509_v43, %v3006_v55 }
 0x15c   : > { %5624 = vst [vmem:[#allocation102_spill] sm:$0xff] %v3382_v49  ;;  %v3394_v33 = vsel %vm5627_vm13, 2147483647, %v2656_v12  ;;  %v3400_v18 = vsel %vm5629_vm14, 2147483647, %v2580_v38  ;;  %v848_v16 = vadd.f32 %v847_v7, %v833_v20  ;;  %v944_v30 = vsel %vm943_vm6, %v941_v28, %v942_v31 }
 0x15d   : > { %5626 = vst [vmem:[#allocation103_spill] sm:$0xff] %v3388_v8  ;;  %v3406_v44 = vsel %vm5631_vm12, 2147483647, %v2509_v43  ;;  %vm5297_vm10 = vcmp.eq.s32.totalorder %v5633_v48, %v3006_v55  ;;  %v1444_v29 = vadd.f32 %v1443_v3, %v3078_v52  ;;  %vm5634_vm2 = vcmp.eq.s32.totalorder %v2664_v0, %v3006_v55 }
 0x15e   : > { %5628 = vst [vmem:[#allocation104_spill] sm:$0xff] %v3394_v33  ;;  %v3415_v12 = vsel %vm5634_vm2, 2147483647, %v2664_v0  ;;  %v945_v37 = vrot.slane %v944_v30, 2  ;;  %vm5636_vm13 = vcmp.eq.s32.totalorder %v2632_v46, %v3006_v55  ;;  %vm5638_vm6 = vcmp.eq.s32.totalorder %v2593_v36, %v3006_v55 }
 0x15f   : > { %5630 = vst [vmem:[#allocation105_spill] sm:$0xff] %v3400_v18  ;;  %v3421_v38 = vsel %vm5636_vm13, 2147483647, %v2632_v46  ;;  %v3427_v20 = vsel %vm5638_vm6, 2147483647, %v2593_v36  ;;  %vm1512_vm14 = vcmp.lt.s32.totalorder %v3369_v45, %v3388_v8  ;;  %v849_v52 = vadd.f32 %v848_v16, %v834_v51 }
 0x160   : > { %5632 = vst [vmem:[#allocation106_spill] sm:$0xff] %v3406_v44  ;;  %v1445_v28 = vadd.f32 %v1444_v29, %v3084_v13  ;;  %vm5640_vm12 = vcmp.eq.s32.totalorder %v2721_v21, %v3006_v55  ;;  %vm5642_vm2 = vcmp.eq.s32.totalorder %v2676_v60, %v3006_v55  ;;  %vm946_vm13 = vcmp.lt.s32.totalorder %v944_v30, %v945_v37  ;;  %v5661_v55 = vld [vmem:[#allocation19_spill] sm:$0xff] }
 0x161   : > { %5635 = vst [vmem:[#allocation107_spill] sm:$0xff] %v3415_v12  ;;  %v3436_v31 = vsel %vm5640_vm12, 2147483647, %v2721_v21  ;;  %v3442_v7 = vsel %vm5642_vm2, 2147483647, %v2676_v60  ;;  %v1513_v3 = vsel %vm1512_vm14, %v3369_v45, %v3388_v8  ;;  %vm1514_vm6 = vcmp.lt.s32.totalorder %v3375_v26, %v3400_v18  ;;  %v5655_v21 = vld [vmem:[#allocation5_spill] sm:$0xff] }
 0x162   : > { %5637 = vst [vmem:[#allocation108_spill] sm:$0xff] %v3421_v38  ;;  %vm1516_vm4 = vcmp.lt.s32.totalorder %v3382_v49, %v3406_v44  ;;  %v850_v29 = vadd.f32 %v849_v52, %v835_v32  ;;  %v947_v13 = vsel %vm946_vm13, %v944_v30, %v945_v37  ;;  %v1446_v51 = vadd.f32 %v1445_v28, %v3090_v54  ;;  %v5651_v28 = vld [vmem:[#allocation88_spill] sm:$0xff] }
 0x163   : > { %5639 = vst [vmem:[#allocation109_spill] sm:$0xff] %v3427_v20  ;;  %v1515_v16 = vsel %vm1514_vm6, %v3375_v26, %v3400_v18  ;;  %v948_v43 = vrot.slane %v947_v13, 1  ;;  %v1517_v0 = vsel %vm1516_vm4, %v3382_v49, %v3406_v44  ;;  %vm1518_vm14 = vcmp.lt.s32.totalorder %v3394_v33, %v3415_v12 }
 0x164   : > { %5641 = vst [vmem:[#allocation110_spill] sm:$0xff] %v3436_v31  ;;  %vm1520_vm12 = vcmp.lt.s32.totalorder %v1513_v3, %v3421_v38  ;;  %v3458_v46 = vadd.f32 %v850_v29, %v836_v6  ;;  %v1447_v36 = vadd.f32 %v1446_v51, %v3096_v59  ;;  %v3463_v30 = vsel %vm1518_vm14, %v3394_v33, %v3415_v12  ;;  %v5653_v29 = vld [vmem:[#allocation6_spill] sm:$0xff]  ;;  %v5654_v51 = vld [vmem:[#allocation9_spill] sm:$0xff] }
 0x165   : > { %5643 = vst [vmem:[#allocation111_spill] sm:$0xff] %v3442_v7  ;;  %v3466_v37 = vsel %vm1520_vm12, %v1513_v3, %v3421_v38  ;;  %vm949_vm2 = vcmp.lt.s32.totalorder %v947_v13, %v948_v43  ;;  %vm1522_vm13 = vcmp.lt.s32.totalorder %v1515_v16, %v3427_v20  ;;  %vm1524_vm4 = vcmp.lt.s32.totalorder %v1517_v0, %v3436_v31  ;;  %v5652_v3 = vld [vmem:[#allocation89_spill] sm:$0xff]  ;;  %v5666_v33 = vld [vmem:[#allocation82_spill] sm:$0xff] }
 0x166   : > { %5644 = vst [vmem:[#allocation112_spill] sm:$0xff] %v3458_v46  ;;  %v3472_v54 = vsel %vm949_vm2, %v947_v13, %v948_v43  ;;  %v1448_v32 = vadd.f32 %v1447_v36, %v3102_v50  ;;  %v3476_v59 = vsel %vm1522_vm13, %v1515_v16, %v3427_v20  ;;  %v3479_v6 = vsel %vm1524_vm4, %v1517_v0, %v3436_v31  ;;  %v5646_v43 = vld [vmem:[#allocation90_spill] sm:$0xff]  ;;  %v5662_v31 = vld [vmem:[#allocation15_spill] sm:$0xff] }
 0x167   : > { %5645 = vst [vmem:[#allocation113_spill] sm:$0xff] %v3472_v54  ;;  %vm5329_vm14 = vcmp.eq.s32.totalorder %v3194_v5, %v3472_v54  ;;  %vm5337_vm12 = vcmp.eq.s32.totalorder %v3200_v9, %v3472_v54  ;;  %vm5338_vm3 = vcmp.eq.s32.totalorder %v3206_v34, %v3472_v54  ;;  %vm5342_vm2 = vcmp.eq.s32.totalorder %v3212_v19, %v3472_v54  ;;  %v5660_v46 = vld [vmem:[#allocation62_spill] sm:$0xff] }
 0x168   : > { %vm5351_vm15 = vcmp.eq.s32.totalorder %v5646_v43, %v3472_v54  ;;  %v3495_v36 = vsel %vm5290_vm11, 2147483647, %v5609_v35  ;;  %v3501_v0 = vsel %vm5292_vm7, 2147483647, %v5613_v63  ;;  %v3507_v50 = vsel %vm5293_vm1, 2147483647, %v5615_v14 }
 0x169   : > { %5647 = vst [vmem:[#allocation114_spill] sm:$0xff] %v3495_v36  ;;  %vm5355_vm13 = vcmp.eq.s32.totalorder %v3242_v27, %v3472_v54  ;;  %vm5357_vm4 = vcmp.eq.s32.totalorder %v3256_v39, %v3472_v54  ;;  %vm5358_vm11 = vcmp.eq.s32.totalorder %v3262_v17, %v3472_v54  ;;  %v3519_v52 = vsel %vm5297_vm10, 2147483647, %v5633_v48  ;;  %v5656_v35 = vld [vmem:[#allocation2_spill] sm:$0xff]  ;;  %v5657_v14 = vld [vmem:[#allocation61_spill] sm:$0xff] }
 0x16a   : > { %5648 = vst [vmem:[#allocation115_spill] sm:$0xff] %v3501_v0  ;;  %vm5345_vm0 = vcmp.eq.s32.totalorder %v5651_v28, %v3472_v54  ;;  %vm5348_vm7 = vcmp.eq.s32.totalorder %v5652_v3, %v3472_v54  ;;  %vm5354_vm1 = vcmp.eq.s32.totalorder %v3236_v1, %v3472_v54  ;;  %vm5356_vm5 = vcmp.eq.s32.totalorder %v3250_v62, %v3472_v54 }
 0x16b   : > { %5649 = vst [vmem:[#allocation116_spill] sm:$0xff] %v3507_v50  ;;  %vm5359_vm8 = vcmp.eq.s32.totalorder %v3270_v23, %v3472_v54  ;;  %vm5374_vm9 = vcmp.eq.s32.totalorder %v3276_v61, %v3472_v54  ;;  %v967_v13 = vsel %vm5329_vm14, %v5653_v29, 0.0  ;;  %v968_v16 = vsel %vm5337_vm12, %v5654_v51, 0.0 }
 0x16c   : > { %5650 = vst [vmem:[#allocation117_spill] sm:$0xff] %v3519_v52  ;;  %vm5375_vm10 = vcmp.eq.s32.totalorder %v3282_v53, %v3472_v54  ;;  %vm5376_vm6 = vcmp.eq.s32.totalorder %v3292_v10, %v3472_v54  ;;  %v969_v60 = vsel %vm5338_vm3, %v5655_v21, 0.0  ;;  %v970_v63 = vsel %vm5342_vm2, %v5656_v35, 0.0 }
 0x16d   : > { %v971_v41 = vsel %vm5345_vm0, %v5657_v14, 0.0  ;;  %v972_v24 = vsel %vm5348_vm7, %v5658_v40, 0.0  ;;  %v973_v2 = vsel %vm5351_vm15, %v5659_v4, 0.0  ;;  %v974_v15 = vsel %vm5354_vm1, %v5660_v46, 0.0 }
 0x16e   : > { %v975_v48 = vsel %vm5355_vm13, %v5661_v55, 0.0  ;;  %v3577_v20 = vsel %vm5356_vm5, %v5662_v31, 0.0  ;;  %v3583_v38 = vsel %vm5357_vm4, %v2420_v42, 0.0  ;;  %v983_v12 = vadd.f32 %v968_v16, %v967_v13 }
 0x16f   : > { %v3589_v44 = vsel %vm5329_vm14, 2147483647, %v3194_v5  ;;  %v3595_v18 = vsel %vm5337_vm12, 2147483647, %v3200_v9  ;;  %v3601_v8 = vsel %vm5338_vm3, 2147483647, %v3206_v34  ;;  %v1449_v13 = vadd.f32 %v1448_v32, %v5666_v33 }
 0x170   : > { %5663 = vst [vmem:[#allocation6_spill] sm:$0xff] %v3589_v44  ;;  %v984_v16 = vadd.f32 %v983_v12, %v969_v60  ;;  %v3608_v5 = vsel %vm5342_vm2, 2147483647, %v3212_v19  ;;  %v3614_v9 = vsel %vm5345_vm0, 2147483647, %v5651_v28 }
 0x171   : > { %5664 = vst [vmem:[#allocation9_spill] sm:$0xff] %v3595_v18  ;;  %v3620_v34 = vsel %vm5348_vm7, 2147483647, %v5652_v3  ;;  %v3626_v12 = vsel %vm5351_vm15, 2147483647, %v5646_v43  ;;  %vm1057_vm14 = vcmp.lt.s32.totalorder %v3589_v44, %v3614_v9 }
 0x172   : > { %5665 = vst [vmem:[#allocation60_spill] sm:$0xff] %v3601_v8  ;;  %v3632_v60 = vsel %vm5354_vm1, 2147483647, %v3236_v1  ;;  %v3638_v33 = vsel %vm5355_vm13, 2147483647, %v3242_v27  ;;  %v985_v32 = vadd.f32 %v984_v16, %v970_v63  ;;  %v1058_v1 = vsel %vm1057_vm14, %v3589_v44, %v3614_v9 }
 0x173   : > { %5667 = vst [vmem:[#allocation12_spill] sm:$0xff] %v3608_v5  ;;  %v3646_v19 = vsel %vm5356_vm5, 2147483647, %v3250_v62  ;;  %v3652_v28 = vsel %vm5357_vm4, 2147483647, %v3256_v39  ;;  %vm1059_vm12 = vcmp.lt.s32.totalorder %v3595_v18, %v3620_v34  ;;  %vm1061_vm3 = vcmp.lt.s32.totalorder %v3601_v8, %v3626_v12 }
 0x174   : > { %5668 = vst [vmem:[#allocation62_spill] sm:$0xff] %v3614_v9  ;;  %v3658_v3 = vsel %vm5358_vm11, 2147483647, %v3262_v17  ;;  %v3664_v63 = vsel %vm5359_vm8, 2147483647, %v3270_v23  ;;  %v986_v27 = vadd.f32 %v985_v32, %v971_v41  ;;  %v1060_v39 = vsel %vm1059_vm12, %v3595_v18, %v3620_v34 }
 0x175   : > { %5669 = vst [vmem:[#allocation19_spill] sm:$0xff] %v3620_v34  ;;  %v3670_v16 = vsel %vm5374_vm9, 2147483647, %v3276_v61  ;;  %v3676_v43 = vsel %vm5375_vm10, 2147483647, %v3282_v53  ;;  %v1062_v49 = vsel %vm1061_vm3, %v3601_v8, %v3626_v12  ;;  %vm1063_vm14 = vcmp.lt.s32.totalorder %v3608_v5, %v3632_v60 }
 0x176   : > { %5670 = vst [vmem:[#allocation15_spill] sm:$0xff] %v3626_v12  ;;  %v3684_v62 = vsel %vm5376_vm6, 2147483647, %v3292_v10  ;;  %vm1065_vm2 = vcmp.lt.s32.totalorder %v1058_v1, %v3638_v33  ;;  %v987_v41 = vadd.f32 %v986_v27, %v972_v24  ;;  %v1064_v32 = vsel %vm1063_vm14, %v3608_v5, %v3632_v60 }
 0x177   : > { %5671 = vst [vmem:[#allocation82_spill] sm:$0xff] %v3632_v60  ;;  %v1066_v10 = vsel %vm1065_vm2, %v1058_v1, %v3638_v33  ;;  %vm1067_vm0 = vcmp.lt.s32.totalorder %v1060_v39, %v3646_v19  ;;  %vm1069_vm12 = vcmp.lt.s32.totalorder %v1062_v49, %v3652_v28  ;;  %vm1071_vm7 = vcmp.lt.s32.totalorder %v1064_v32, %v3658_v3 }
 0x178   : > { %5672 = vst [vmem:[#allocation118_spill] sm:$0xff] %v3638_v33  ;;  %v1068_v26 = vsel %vm1067_vm0, %v1060_v39, %v3646_v19  ;;  %vm1073_vm3 = vcmp.lt.s32.totalorder %v1066_v10, %v3664_v63  ;;  %v988_v45 = vadd.f32 %v987_v41, %v973_v2  ;;  %v1070_v14 = vsel %vm1069_vm12, %v1062_v49, %v3652_v28  ;;  %v5680_v39 = vld [vmem:[#allocation83_spill] sm:$0xff] }
 0x179   : > { %5673 = vst [vmem:[#allocation119_spill] sm:$0xff] %v3646_v19  ;;  %v1072_v27 = vsel %vm1071_vm7, %v1064_v32, %v3658_v3  ;;  %v1074_v24 = vsel %vm1073_vm3, %v1066_v10, %v3664_v63  ;;  %vm1075_vm14 = vcmp.lt.s32.totalorder %v1068_v26, %v3670_v16  ;;  %vm1077_vm2 = vcmp.lt.s32.totalorder %v1070_v14, %v3676_v43 }
 0x17a   : > { %5674 = vst [vmem:[#allocation120_spill] sm:$0xff] %v3652_v28  ;;  %vm1079_vm15 = vcmp.lt.s32.totalorder %v1072_v27, %v3684_v62  ;;  %v1450_v1 = vadd.f32 %v1449_v13, %v5680_v39  ;;  %v989_v35 = vadd.f32 %v988_v45, %v974_v15  ;;  %v1076_v9 = vsel %vm1075_vm14, %v1068_v26, %v3670_v16 }
 0x17b   : > { %5675 = vst [vmem:[#allocation121_spill] sm:$0xff] %v3658_v3  ;;  %v1078_v21 = vsel %vm1077_vm2, %v1070_v14, %v3676_v43  ;;  %v1080_v2 = vsel %vm1079_vm15, %v1072_v27, %v3684_v62  ;;  %vm1081_vm0 = vcmp.lt.s32.totalorder %v1074_v24, %v1076_v9  ;;  %vm5681_vm7 = vcmp.lt.s32.totalorder %v3463_v30, %v3442_v7 }
 0x17c   : > { %5676 = vst [vmem:[#allocation122_spill] sm:$0xff] %v3664_v63  ;;  %vm1083_vm12 = vcmp.lt.s32.totalorder %v1078_v21, %v1080_v2  ;;  %v1451_v49 = vadd.f32 %v1450_v1, %v3349_v56  ;;  %v1527_v10 = vsel %vm5681_vm7, %v3463_v30, %v3442_v7  ;;  %v990_v41 = vadd.f32 %v989_v35, %v975_v48 }
 0x17d   : > { %5677 = vst [vmem:[#allocation123_spill] sm:$0xff] %v3670_v16  ;;  %v1082_v32 = vsel %vm1081_vm0, %v1074_v24, %v1076_v9  ;;  %v1084_v13 = vsel %vm1083_vm12, %v1078_v21, %v1080_v2  ;;  %vm1528_vm3 = vcmp.lt.s32.totalorder %v3466_v37, %v3495_v36  ;;  %vm1530_vm15 = vcmp.lt.s32.totalorder %v3476_v59, %v3501_v0 }
 0x17e   : > { %5678 = vst [vmem:[#allocation124_spill] sm:$0xff] %v3676_v43  ;;  %vm1085_vm14 = vcmp.lt.s32.totalorder %v1082_v32, %v1084_v13  ;;  %v1452_v14 = vadd.f32 %v1451_v49, %v3356_v57  ;;  %v1529_v15 = vsel %vm1528_vm3, %v3466_v37, %v3495_v36  ;;  %v991_v56 = vadd.f32 %v990_v41, %v3577_v20  ;;  %v5743_v43 = vld [vmem:[#allocation29_spill] sm:$0xff] }
 0x17f   : > { %5679 = vst [vmem:[#allocation125_spill] sm:$0xff] %v3684_v62  ;;  %v1086_v45 = vsel %vm1085_vm14, %v1082_v32, %v1084_v13  ;;  %v1531_v48 = vsel %vm1530_vm15, %v3476_v59, %v3501_v0  ;;  %vm1532_vm2 = vcmp.lt.s32.totalorder %v3479_v6, %v3507_v50  ;;  %vm1534_vm0 = vcmp.lt.s32.totalorder %v1527_v10, %v3519_v52 }
 0x180   : > { %v1087_v21 = vrot.slane %v1086_v45, 4  ;;  %v3734_v9 = vadd.f32 %v1452_v14, %v3363_v22  ;;  %v1533_v35 = vsel %vm1532_vm2, %v3479_v6, %v3507_v50  ;;  %v992_v57 = vadd.f32 %v991_v56, %v3583_v38 }
 0x181   : > { %v1535_v26 = vsel %vm1534_vm0, %v1527_v10, %v3519_v52  ;;  %vm1536_vm12 = vcmp.lt.s32.totalorder %v1529_v15, %v1531_v48  ;;  %v978_v20 = vsel %vm5358_vm11, %v2474_v47, 0.0  ;;  %v979_v6 = vsel %vm5359_vm8, %v2559_v11, 0.0 }
 0x182   : > { %vm1088_vm7 = vcmp.lt.s32.totalorder %v1086_v45, %v1087_v21  ;;  %v1537_v30 = vsel %vm1536_vm12, %v1529_v15, %v1531_v48  ;;  %vm1538_vm3 = vcmp.lt.s32.totalorder %v1533_v35, %v1535_v26  ;;  %v993_v22 = vadd.f32 %v992_v57, %v978_v20 }
 0x183   : > { %v1089_v37 = vsel %vm1088_vm7, %v1086_v45, %v1087_v21  ;;  %v1539_v59 = vsel %vm1538_vm3, %v1533_v35, %v1535_v26  ;;  %v980_v39 = vsel %vm5374_vm9, %v2535_v58, 0.0  ;;  %v981_v10 = vsel %vm5375_vm10, %v2599_v25, 0.0  ;;  %v5683_v26 = vld [vmem:[#allocation62_spill] sm:$0xff] }
 0x184   : > { %v1090_v38 = vrot.slane %v1089_v37, 2  ;;  %vm1540_vm14 = vcmp.lt.s32.totalorder %v1537_v30, %v1539_v59  ;;  %v994_v27 = vadd.f32 %v993_v22, %v979_v6 }
 0x185   : > { %v1541_v24 = vsel %vm1540_vm14, %v1537_v30, %v1539_v59  ;;  %v5684_v30 = vld [vmem:[#allocation2_spill] sm:$0xff] }
 0x186   : > { %vm1091_vm15 = vcmp.lt.s32.totalorder %v1089_v37, %v1090_v38  ;;  %v1542_v1 = vrot.slane %v1541_v24, 4  ;;  %v995_v2 = vadd.f32 %v994_v27, %v980_v39  ;;  %v5686_v27 = vld [vmem:[#allocation100_spill] sm:$0xff]  ;;  %v5688_v39 = vld [vmem:[#allocation102_spill] sm:$0xff] }
 0x187   : > { %v1092_v49 = vsel %vm1091_vm15, %v1089_v37, %v1090_v38  ;;  %v5685_v37 = vld [vmem:[#allocation61_spill] sm:$0xff] }
 0x188   : > { %v1093_v41 = vrot.slane %v1092_v49, 1  ;;  %vm1543_vm2 = vcmp.lt.s32.totalorder %v1541_v24, %v1542_v1  ;;  %v3757_v32 = vadd.f32 %v995_v2, %v981_v10  ;;  %v5690_v2 = vld [vmem:[#allocation103_spill] sm:$0xff]  ;;  %v5692_v10 = vld [vmem:[#allocation106_spill] sm:$0xff] }
 0x189   : > { %v1544_v14 = vsel %vm1543_vm2, %v1541_v24, %v1542_v1  ;;  %v5687_v24 = vld [vmem:[#allocation101_spill] sm:$0xff]  ;;  %v5689_v1 = vld [vmem:[#allocation104_spill] sm:$0xff] }
 0x18a   : > { %vm1094_vm0 = vcmp.lt.s32.totalorder %v1092_v49, %v1093_v41  ;;  %v1545_v15 = vrot.slane %v1544_v14, 2 }
 0x18b   : > { %v3759_v13 = vsel %vm1094_vm0, %v1092_v49, %v1093_v41  ;;  %v5691_v49 = vld [vmem:[#allocation105_spill] sm:$0xff] }
 0x18c   : > { %vm5360_vm12 = vcmp.eq.s32.totalorder %v3589_v44, %v3759_v13  ;;  %vm5361_vm7 = vcmp.eq.s32.totalorder %v3595_v18, %v3759_v13  ;;  %vm5363_vm3 = vcmp.eq.s32.totalorder %v3601_v8, %v3759_v13  ;;  %vm5365_vm14 = vcmp.eq.s32.totalorder %v3608_v5, %v3759_v13  ;;  %v5707_v44 = vld [vmem:[#allocation47_spill] sm:$0xff] }
 0x18d   : > { %vm5362_vm15 = vcmp.eq.s32.totalorder %v3620_v34, %v3759_v13  ;;  %vm5364_vm0 = vcmp.eq.s32.totalorder %v3626_v12, %v3759_v13  ;;  %vm5366_vm2 = vcmp.eq.s32.totalorder %v3632_v60, %v3759_v13  ;;  %vm5368_vm1 = vcmp.eq.s32.totalorder %v3638_v33, %v3759_v13  ;;  %v5708_v18 = vld [vmem:[#allocation79_spill] sm:$0xff]  ;;  %v5711_v12 = vld [vmem:[#allocation13_spill] sm:$0xff]  ;;  %v5712_v33 = vld [vmem:[#allocation14_spill] sm:$0xff] }
 0x18e   : > { %vm5369_vm13 = vcmp.eq.s32.totalorder %v3646_v19, %v3759_v13  ;;  %vm5370_vm5 = vcmp.eq.s32.totalorder %v3652_v28, %v3759_v13  ;;  %vm5371_vm4 = vcmp.eq.s32.totalorder %v3658_v3, %v3759_v13  ;;  %vm5372_vm11 = vcmp.eq.s32.totalorder %v3664_v63, %v3759_v13 }
 0x18f   : > { %vm5373_vm8 = vcmp.eq.s32.totalorder %v3670_v16, %v3759_v13  ;;  %v1112_v56 = vsel %vm5360_vm12, %v5653_v29, 0.0  ;;  %v1113_v45 = vsel %vm5361_vm7, %v5654_v51, 0.0  ;;  %v1117_v48 = vsel %vm5362_vm15, %v5658_v40, 0.0 }
 0x190   : > { %v1118_v21 = vsel %vm5364_vm0, %v5659_v4, 0.0  ;;  %v1119_v29 = vsel %vm5366_vm2, %v5660_v46, 0.0  ;;  %v1120_v51 = vsel %vm5368_vm1, %v5661_v55, 0.0  ;;  %v1121_v40 = vsel %vm5369_vm13, %v5662_v31, 0.0 }
 0x191   : > { %v1122_v4 = vsel %vm5370_vm5, %v2420_v42, 0.0  ;;  %v3823_v46 = vsel %vm5371_vm4, %v2474_v47, 0.0  ;;  %v3829_v55 = vsel %vm5372_vm11, %v2559_v11, 0.0  ;;  %v3835_v31 = vsel %vm5373_vm8, %v2535_v58, 0.0  ;;  %v5682_v42 = vld [vmem:[#allocation5_spill] sm:$0xff] }
 0x192   : > { %v1128_v35 = vadd.f32 %v1113_v45, %v1112_v56  ;;  %vm1546_vm12 = vcmp.lt.s32.totalorder %v1544_v14, %v1545_v15  ;;  %v1114_v47 = vsel %vm5363_vm3, %v5682_v42, 0.0  ;;  %vm5367_vm7 = vcmp.eq.s32.totalorder %v5683_v26, %v3759_v13  ;;  %v5695_v56 = vld [vmem:[#allocation109_spill] sm:$0xff]  ;;  %v5696_v45 = vld [vmem:[#allocation110_spill] sm:$0xff]  ;;  %v5697_v42 = vld [vmem:[#allocation7_spill] sm:$0xff] }
 0x193   : > { %v1547_v57 = vsel %vm1546_vm12, %v1544_v14, %v1545_v15  ;;  %v1115_v22 = vsel %vm5365_vm14, %v5684_v30, 0.0  ;;  %v1116_v59 = vsel %vm5367_vm7, %v5685_v37, 0.0  ;;  %v5693_v14 = vld [vmem:[#allocation107_spill] sm:$0xff]  ;;  %v5694_v15 = vld [vmem:[#allocation108_spill] sm:$0xff]  ;;  %v5700_v30 = vld [vmem:[#allocation50_spill] sm:$0xff] }
 0x194   : > { %v1129_v20 = vadd.f32 %v1128_v35, %v1114_v47  ;;  %v1548_v11 = vrot.slane %v1547_v57, 1  ;;  %v5704_v37 = vld [vmem:[#allocation3_spill] sm:$0xff]  ;;  %v5710_v26 = vld [vmem:[#allocation4_spill] sm:$0xff] }
 0x196   : > { %v1130_v58 = vadd.f32 %v1129_v20, %v1115_v22  ;;  %vm1549_vm15 = vcmp.lt.s32.totalorder %v1547_v57, %v1548_v11 }
 0x197   : > { %v3851_v6 = vsel %vm1549_vm15, %v1547_v57, %v1548_v11  ;;  %v5698_v57 = vld [vmem:[#allocation10_spill] sm:$0xff]  ;;  %v5699_v11 = vld [vmem:[#allocation24_spill] sm:$0xff] }
 0x198   : > { %v1131_v38 = vadd.f32 %v1130_v58, %v1116_v59  ;;  %vm5397_vm12 = vcmp.eq.s32.totalorder %v5686_v27, %v3851_v6  ;;  %vm5401_vm3 = vcmp.eq.s32.totalorder %v5687_v24, %v3851_v6  ;;  %vm5402_vm0 = vcmp.eq.s32.totalorder %v5688_v39, %v3851_v6  ;;  %v5703_v58 = vld [vmem:[#allocation8_spill] sm:$0xff] }
 0x199   : > { %vm5403_vm14 = vcmp.eq.s32.totalorder %v5689_v1, %v3851_v6  ;;  %vm5407_vm2 = vcmp.eq.s32.totalorder %v5690_v2, %v3851_v6  ;;  %vm5408_vm15 = vcmp.eq.s32.totalorder %v5691_v49, %v3851_v6  ;;  %vm5421_vm7 = vcmp.eq.s32.totalorder %v5692_v10, %v3851_v6 }
 0x19a   : > { %v1132_v41 = vadd.f32 %v1131_v38, %v1117_v48  ;;  %vm5422_vm1 = vcmp.eq.s32.totalorder %v5693_v14, %v3851_v6  ;;  %vm5423_vm13 = vcmp.eq.s32.totalorder %v5694_v15, %v3851_v6  ;;  %vm5424_vm5 = vcmp.eq.s32.totalorder %v5695_v56, %v3851_v6  ;;  %v5705_v38 = vld [vmem:[#allocation11_spill] sm:$0xff] }
 0x19b   : > { %vm5425_vm4 = vcmp.eq.s32.totalorder %v5696_v45, %v3851_v6  ;;  %vm5426_vm11 = vcmp.eq.s32.totalorder %v3442_v7, %v3851_v6  ;;  %vm5427_vm8 = vcmp.eq.s32.totalorder %v3495_v36, %v3851_v6  ;;  %vm5428_vm10 = vcmp.eq.s32.totalorder %v3507_v50, %v3851_v6 }
 0x19c   : > { %v1133_v48 = vadd.f32 %v1132_v41, %v1118_v21  ;;  %vm5429_vm6 = vcmp.eq.s32.totalorder %v3519_v52, %v3851_v6  ;;  %v1567_v47 = vsel %vm5397_vm12, %v5697_v42, 0.0  ;;  %v1568_v20 = vsel %vm5401_vm3, %v5698_v57, 0.0  ;;  %v5701_v21 = vld [vmem:[#allocation59_spill] sm:$0xff] }
 0x19d   : > { %vm5702_vm9 = vcmp.eq.s32.totalorder %v5700_v30, %v5701_v21  ;;  %v1570_v59 = vsel %vm5403_vm14, %v5704_v37, 0.0  ;;  %v1571_v41 = vsel %vm5407_vm2, %v5705_v38, 0.0  ;;  %v1572_v34 = vsel %vm5408_vm15, %v5710_v26, 0.0  ;;  %v5736_v30 = vld [vmem:[#allocation18_spill] sm:$0xff] }
 0x19e   : > { %v1134_v35 = vadd.f32 %v1133_v48, %v1119_v29  ;;  %v3897_v22 = vsel %vm5702_vm9, %v5699_v11, 0.0  ;;  %v1569_v29 = vsel %vm5402_vm0, %v5703_v58, 0.0  ;;  %v5706_v48 = vld [vmem:[#allocation27_spill] sm:$0xff]  ;;  %vm5709_vm9 = vcmp.eq.s32.totalorder %v5707_v44, %v5708_v18 }
 0x19f   : > { %v3915_v8 = vsel %vm5709_vm9, %v5706_v48, 0.0  ;;  %v1573_v60 = vsel %vm5421_vm7, %v5711_v12, 0.0  ;;  %v1574_v19 = vsel %vm5422_vm1, %v5712_v33, 0.0  ;;  %v1583_v28 = vadd.f32 %v1568_v20, %v1567_v47 }
 0x1a0   : > { %v1135_v5 = vadd.f32 %v1134_v35, %v1120_v51  ;;  %v3933_v51 = vsel %vm5397_vm12, 2147483647, %v5686_v27  ;;  %v3939_v35 = vsel %vm5401_vm3, 2147483647, %v5687_v24  ;;  %v3945_v3 = vsel %vm5402_vm0, 2147483647, %v5688_v39 }
 0x1a1   : > { %5713 = vst [vmem:[#allocation83_spill] sm:$0xff] %v3933_v51  ;;  %v3951_v47 = vsel %vm5403_vm14, 2147483647, %v5689_v1  ;;  %v3957_v20 = vsel %vm5407_vm2, 2147483647, %v5690_v2  ;;  %v1584_v24 = vadd.f32 %v1583_v28, %v1569_v29  ;;  %vm5726_vm9 = vcmp.eq.s32.totalorder %v3501_v0, %v3851_v6 }
 0x1a2   : > { %5714 = vst [vmem:[#allocation5_spill] sm:$0xff] %v3939_v35  ;;  %v1136_v17 = vadd.f32 %v1135_v5, %v1121_v40  ;;  %v3963_v27 = vsel %vm5408_vm15, 2147483647, %v5691_v49  ;;  %v3969_v5 = vsel %vm5421_vm7, 2147483647, %v5692_v10  ;;  %vm1657_vm12 = vcmp.lt.s32.totalorder %v3933_v51, %v3957_v20 }
 0x1a3   : > { %5715 = vst [vmem:[#allocation2_spill] sm:$0xff] %v3945_v3  ;;  %v3975_v40 = vsel %vm5422_vm1, 2147483647, %v5693_v14  ;;  %v3981_v39 = vsel %vm5423_vm13, 2147483647, %v5694_v15  ;;  %v1585_v49 = vadd.f32 %v1584_v24, %v1570_v59  ;;  %v1658_v63 = vsel %vm1657_vm12, %v3933_v51, %v3957_v20 }
 0x1a4   : > { %5716 = vst [vmem:[#allocation61_spill] sm:$0xff] %v3951_v47  ;;  %v1137_v1 = vadd.f32 %v1136_v17, %v1122_v4  ;;  %v3987_v28 = vsel %vm5424_vm5, 2147483647, %v5695_v56  ;;  %v3993_v29 = vsel %vm5425_vm4, 2147483647, %v5696_v45  ;;  %vm1661_vm3 = vcmp.lt.s32.totalorder %v3945_v3, %v3969_v5  ;;  %v5741_v45 = vld [vmem:[#allocation112_spill] sm:$0xff] }
 0x1a5   : > { %5717 = vst [vmem:[#allocation7_spill] sm:$0xff] %v3957_v20  ;;  %v3999_v2 = vsel %vm5426_vm11, 2147483647, %v3442_v7  ;;  %v4005_v17 = vsel %vm5427_vm8, 2147483647, %v3495_v36  ;;  %v1586_v14 = vadd.f32 %v1585_v49, %v1571_v41  ;;  %vm1663_vm0 = vcmp.lt.s32.totalorder %v3951_v47, %v3975_v40 }
 0x1a6   : > { %5718 = vst [vmem:[#allocation10_spill] sm:$0xff] %v3963_v27  ;;  %v4011_v4 = vsel %vm5726_vm9, 2147483647, %v3501_v0  ;;  %v4017_v10 = vsel %vm5428_vm10, 2147483647, %v3507_v50  ;;  %v1138_v24 = vadd.f32 %v1137_v1, %v3823_v46  ;;  %vm1659_vm9 = vcmp.lt.s32.totalorder %v3939_v35, %v3963_v27 }
 0x1a7   : > { %5719 = vst [vmem:[#allocation24_spill] sm:$0xff] %v3969_v5  ;;  %v4024_v59 = vsel %vm5429_vm6, 2147483647, %v3519_v52  ;;  %v1660_v16 = vsel %vm1659_vm9, %v3939_v35, %v3963_v27  ;;  %v1662_v1 = vsel %vm1661_vm3, %v3945_v3, %v3969_v5  ;;  %vm1665_vm14 = vcmp.lt.s32.totalorder %v1658_v63, %v3981_v39 }
 0x1a8   : > { %5720 = vst [vmem:[#allocation59_spill] sm:$0xff] %v3975_v40  ;;  %v1139_v46 = vadd.f32 %v1138_v24, %v3829_v55  ;;  %v1587_v49 = vadd.f32 %v1586_v14, %v1572_v34  ;;  %v1664_v41 = vsel %vm1663_vm0, %v3951_v47, %v3975_v40  ;;  %v1666_v23 = vsel %vm1665_vm14, %v1658_v63, %v3981_v39 }
 0x1a9   : > { %5721 = vst [vmem:[#allocation8_spill] sm:$0xff] %v3981_v39  ;;  %vm1667_vm12 = vcmp.lt.s32.totalorder %v1660_v16, %v3987_v28  ;;  %vm1669_vm3 = vcmp.lt.s32.totalorder %v1662_v1, %v3993_v29  ;;  %vm1671_vm9 = vcmp.lt.s32.totalorder %v1664_v41, %v3999_v2  ;;  %vm1673_vm0 = vcmp.lt.s32.totalorder %v1666_v23, %v4005_v17 }
 0x1aa   : > { %5722 = vst [vmem:[#allocation3_spill] sm:$0xff] %v3987_v28  ;;  %v4047_v61 = vadd.f32 %v1139_v46, %v3835_v31  ;;  %v1668_v55 = vsel %vm1667_vm12, %v1660_v16, %v3987_v28  ;;  %v1588_v24 = vadd.f32 %v1587_v49, %v1573_v60  ;;  %v1670_v53 = vsel %vm1669_vm3, %v1662_v1, %v3993_v29  ;;  %v5731_v46 = vld [vmem:[#allocation20_spill] sm:$0xff] }
 0x1ab   : > { %5723 = vst [vmem:[#allocation11_spill] sm:$0xff] %v3993_v29  ;;  %v1672_v34 = vsel %vm1671_vm9, %v1664_v41, %v3999_v2  ;;  %v1674_v63 = vsel %vm1673_vm0, %v1666_v23, %v4005_v17  ;;  %vm1675_vm14 = vcmp.lt.s32.totalorder %v1668_v55, %v4011_v4  ;;  %vm1677_vm2 = vcmp.lt.s32.totalorder %v1670_v53, %v4017_v10  ;;  %v5732_v23 = vld [vmem:[#allocation80_spill] sm:$0xff] }
 0x1ac   : > { %5724 = vst [vmem:[#allocation27_spill] sm:$0xff] %v3999_v2  ;;  %vm1679_vm15 = vcmp.lt.s32.totalorder %v1672_v34, %v4024_v59  ;;  %v1589_v16 = vadd.f32 %v1588_v24, %v1574_v19  ;;  %v1676_v31 = vsel %vm1675_vm14, %v1668_v55, %v4011_v4  ;;  %v1678_v14 = vsel %vm1677_vm2, %v1670_v53, %v4017_v10  ;;  %v5733_v41 = vld [vmem:[#allocation16_spill] sm:$0xff] }
 0x1ad   : > { %5725 = vst [vmem:[#allocation79_spill] sm:$0xff] %v4005_v17  ;;  %v1680_v60 = vsel %vm1679_vm15, %v1672_v34, %v4024_v59  ;;  %v1575_v1 = vsel %vm5423_vm13, %v5731_v46, 0.0  ;;  %vm1681_vm12 = vcmp.lt.s32.totalorder %v1674_v63, %v1676_v31  ;;  %v709_v49 = vadd.f32 %v5732_v23, %v3897_v22 }
 0x1ae   : > { %5727 = vst [vmem:[#allocation4_spill] sm:$0xff] %v4011_v4  ;;  %vm1683_vm3 = vcmp.lt.s32.totalorder %v1678_v14, %v1680_v60  ;;  %v1576_v19 = vsel %vm5424_vm5, %v5733_v41, 0.0  ;;  %v1590_v55 = vadd.f32 %v1589_v16, %v1575_v1  ;;  %v1682_v24 = vsel %vm1681_vm12, %v1674_v63, %v1676_v31 }
 0x1af   : > { %5728 = vst [vmem:[#allocation13_spill] sm:$0xff] %v4017_v10  ;;  %v1684_v53 = vsel %vm1683_vm3, %v1678_v14, %v1680_v60  ;;  %v710_v34 = vrot.slane %v709_v49, 4  ;;  %v1454_v44 = vadd.f32 %v3734_v9, %v3915_v8  ;;  %v1577_v16 = vsel %vm5425_vm4, %v5736_v30, 0.0  ;;  %v5737_v60 = vld [vmem:[#allocation21_spill] sm:$0xff]  ;;  %v5738_v8 = vld [vmem:[#allocation78_spill] sm:$0xff] }
 0x1b0   : > { %5729 = vst [vmem:[#allocation14_spill] sm:$0xff] %v4024_v59  ;;  %vm1685_vm2 = vcmp.lt.s32.totalorder %v1682_v24, %v1684_v53  ;;  %v1591_v22 = vadd.f32 %v1590_v55, %v1576_v19  ;;  %v1578_v1 = vsel %vm5426_vm11, %v5737_v60, 0.0  ;;  %v5739_v9 = vld [vmem:[#allocation81_spill] sm:$0xff]  ;;  %vm5744_vm14 = vcmp.eq.s32.totalorder %v3501_v0, %v3851_v6 }
 0x1b1   : > { %5730 = vst [vmem:[#allocation126_spill] sm:$0xff] %v4047_v61  ;;  %v5734_v61 = vld [vmem:[#allocation99_spill] sm:$0xff]  ;;  %v1686_v23 = vsel %vm1685_vm2, %v1682_v24, %v1684_v53  ;;  %v711_v31 = vadd.f32 %v710_v34, %v709_v49  ;;  %v1455_v14 = vrot.slane %v1454_v44, 4  ;;  %vm5740_vm0 = vcmp.eq.s32.totalorder %v5738_v8, %v5739_v9  ;;  %v5742_v49 = vld [vmem:[#allocation28_spill] sm:$0xff] }
 0x1b2   : > { %vm5735_vm15 = vcmp.eq.s32.totalorder %v5734_v61, %v3472_v54  ;;  %v1687_v63 = vrot.slane %v1686_v23, 4  ;;  %v1592_v56 = vadd.f32 %v1591_v22, %v1577_v16  ;;  %v837_v19 = vsel %vm5740_vm0, %v5699_v11, 0.0 }
 0x1b3   : > { %v4076_v15 = vsel %vm5735_vm15, %v5699_v11, 0.0  ;;  %v712_v61 = vrot.slane %v711_v31, 2  ;;  %v1456_v55 = vadd.f32 %v1455_v14, %v1454_v44  ;;  %v852_v54 = vadd.f32 %v5741_v45, %v837_v19  ;;  %v5745_v14 = vld [vmem:[#allocation34_spill] sm:$0xff] }
 0x1b4   : > { %vm1688_vm9 = vcmp.lt.s32.totalorder %v1686_v23, %v1687_v63  ;;  %v1593_v24 = vadd.f32 %v1592_v56, %v1578_v1  ;;  %v1579_v34 = vsel %vm5427_vm8, %v5742_v49, 0.0  ;;  %v1580_v8 = vsel %vm5744_vm14, %v5743_v43, 0.0 }
 0x1b5   : > { %v1689_v53 = vsel %vm1688_vm9, %v1686_v23, %v1687_v63  ;;  %v713_v25 = vadd.f32 %v712_v61, %v711_v31  ;;  %v1457_v22 = vrot.slane %v1456_v55, 2  ;;  %v853_v62 = vrot.slane %v852_v54, 4 }
 0x1b6   : > { %v1690_v7 = vrot.slane %v1689_v53, 2  ;;  %v1594_v16 = vadd.f32 %v1593_v24, %v1579_v34  ;;  %v1581_v1 = vsel %vm5428_vm10, %v5745_v14, 0.0  ;;  %vm716_vm3 = vcmp.lt.s32.totalorder %v5701_v21, 2147483647 }
 0x1b7   : > { %v714_v44 = vrot.slane %v713_v25, 1  ;;  %v1458_v56 = vadd.f32 %v1457_v22, %v1456_v55  ;;  %v854_v63 = vadd.f32 %v853_v62, %v852_v54  ;;  %v1582_v62 = vsel %vm5429_vm6, %v5706_v48, 0.0 }
 0x1b8   : > { %vm1691_vm12 = vcmp.lt.s32.totalorder %v1689_v53, %v1690_v7  ;;  %v1595_v23 = vadd.f32 %v1594_v16, %v1580_v8 }
 0x1b9   : > { %v1692_v45 = vsel %vm1691_vm12, %v1689_v53, %v1690_v7  ;;  %v715_v31 = vadd.f32 %v714_v44, %v713_v25  ;;  %v1459_v19 = vrot.slane %v1458_v56, 1  ;;  %v855_v34 = vrot.slane %v854_v63, 2 }
 0x1ba   : > { %v1693_v61 = vrot.slane %v1692_v45, 1  ;;  %v1596_v24 = vadd.f32 %v1595_v23, %v1581_v1 }
 0x1bb   : > { %v4106_v36 = vsel %vm716_vm3, %v715_v31, 0.0  ;;  %v4115_v8 = vadd.f32 %v855_v34, %v854_v63  ;;  %v4117_v25 = vadd.f32 %v1459_v19, %v1458_v56 }
 0x1bc   : > { %vm1694_vm2 = vcmp.lt.s32.totalorder %v1692_v45, %v1693_v61 }
 0x1bd   : > { %v4112_v7 = vsel %vm1694_vm2, %v1692_v45, %v1693_v61 }
 0x1be   : > { %vm5437_vm15 = vcmp.eq.s32.totalorder %v3933_v51, %v4112_v7  ;;  %vm5445_vm9 = vcmp.eq.s32.totalorder %v3939_v35, %v4112_v7  ;;  %vm5446_vm0 = vcmp.eq.s32.totalorder %v3945_v3, %v4112_v7  ;;  %vm5447_vm14 = vcmp.eq.s32.totalorder %v3951_v47, %v4112_v7 }
 0x1bf   : > { %vm5449_vm12 = vcmp.eq.s32.totalorder %v3957_v20, %v4112_v7  ;;  %vm5452_vm3 = vcmp.eq.s32.totalorder %v3963_v27, %v4112_v7  ;;  %vm5454_vm2 = vcmp.eq.s32.totalorder %v3969_v5, %v4112_v7  ;;  %vm5457_vm7 = vcmp.eq.s32.totalorder %v3975_v40, %v4112_v7 }
 0x1c0   : > { %vm5462_vm1 = vcmp.eq.s32.totalorder %v3981_v39, %v4112_v7  ;;  %vm5466_vm13 = vcmp.eq.s32.totalorder %v3987_v28, %v4112_v7  ;;  %vm5467_vm5 = vcmp.eq.s32.totalorder %v3993_v29, %v4112_v7  ;;  %vm5468_vm4 = vcmp.eq.s32.totalorder %v3999_v2, %v4112_v7 }
 0x1c1   : > { %vm5469_vm11 = vcmp.eq.s32.totalorder %v4005_v17, %v4112_v7  ;;  %vm5470_vm8 = vcmp.eq.s32.totalorder %v4011_v4, %v4112_v7  ;;  %vm5471_vm10 = vcmp.eq.s32.totalorder %v4017_v10, %v4112_v7  ;;  %vm5472_vm6 = vcmp.eq.s32.totalorder %v4024_v59, %v4112_v7 }
 0x1c2   : > { %v1712_v55 = vsel %vm5437_vm15, %v5697_v42, 0.0  ;;  %v1713_v53 = vsel %vm5445_vm9, %v5698_v57, 0.0  ;;  %v1714_v22 = vsel %vm5446_vm0, %v5703_v58, 0.0  ;;  %v1715_v16 = vsel %vm5447_vm14, %v5704_v37, 0.0 }
 0x1c3   : > { %v1716_v44 = vsel %vm5449_vm12, %v5705_v38, 0.0  ;;  %v1717_v56 = vsel %vm5452_vm3, %v5710_v26, 0.0  ;;  %v1718_v23 = vsel %vm5454_vm2, %v5711_v12, 0.0  ;;  %v1719_v45 = vsel %vm5457_vm7, %v5712_v33, 0.0 }
 0x1c4   : > { %v1720_v63 = vsel %vm5462_vm1, %v5731_v46, 0.0  ;;  %v4191_v1 = vsel %vm5466_vm13, %v5733_v41, 0.0  ;;  %v4197_v61 = vsel %vm5467_vm5, %v5736_v30, 0.0  ;;  %v4203_v31 = vsel %vm5468_vm4, %v5737_v60, 0.0  ;;  %v5751_v41 = vld [vmem:[#allocation124_spill] sm:$0xff] }
 0x1c5   : > { %v4209_v19 = vsel %vm5469_vm11, %v5742_v49, 0.0  ;;  %v4215_v34 = vsel %vm5470_vm8, %v5743_v43, 0.0  ;;  %v4221_v54 = vsel %vm5471_vm10, %v5745_v14, 0.0  ;;  %v1728_v0 = vadd.f32 %v1713_v53, %v1712_v55 }
 0x1c6   : > { %v4227_v50 = vsel %vm5437_vm15, 2147483647, %v3933_v51  ;;  %v4233_v52 = vsel %vm5445_vm9, 2147483647, %v3939_v35  ;;  %v4239_v43 = vsel %vm5446_vm0, 2147483647, %v3945_v3  ;;  %v4241_v14 = vadd.f32 %v1596_v24, %v1582_v62 }
 0x1c7   : > { %5746 = vst [vmem:[#allocation20_spill] sm:$0xff] %v4227_v50  ;;  %v1729_v55 = vadd.f32 %v1728_v0, %v1714_v22  ;;  %v4247_v53 = vsel %vm5447_vm14, 2147483647, %v3951_v47  ;;  %v4253_v51 = vsel %vm5449_vm12, 2147483647, %v3957_v20 }
 0x1c8   : > { %5747 = vst [vmem:[#allocation80_spill] sm:$0xff] %v4233_v52  ;;  %v4259_v35 = vsel %vm5452_vm3, 2147483647, %v3963_v27  ;;  %v4265_v0 = vsel %vm5454_vm2, 2147483647, %v3969_v5  ;;  %vm1802_vm15 = vcmp.lt.s32.totalorder %v4227_v50, %v4253_v51 }
 0x1c9   : > { %5748 = vst [vmem:[#allocation81_spill] sm:$0xff] %v4239_v43  ;;  %v4271_v24 = vsel %vm5457_vm7, 2147483647, %v3975_v40  ;;  %v4277_v62 = vsel %vm5462_vm1, 2147483647, %v3981_v39  ;;  %v1730_v22 = vadd.f32 %v1729_v55, %v1715_v16  ;;  %v1803_v5 = vsel %vm1802_vm15, %v4227_v50, %v4253_v51 }
 0x1ca   : > { %5749 = vst [vmem:[#allocation112_spill] sm:$0xff] %v4247_v53  ;;  %v4285_v3 = vsel %vm5466_vm13, 2147483647, %v3987_v28  ;;  %v4291_v47 = vsel %vm5467_vm5, 2147483647, %v3993_v29  ;;  %vm1804_vm9 = vcmp.lt.s32.totalorder %v4233_v52, %v4259_v35  ;;  %vm1806_vm0 = vcmp.lt.s32.totalorder %v4239_v43, %v4265_v0 }
 0x1cb   : > { %5750 = vst [vmem:[#allocation127_spill] sm:$0xff] %v4253_v51  ;;  %v4297_v20 = vsel %vm5468_vm4, 2147483647, %v3999_v2  ;;  %v4303_v16 = vsel %vm5469_vm11, 2147483647, %v4005_v17  ;;  %v1731_v40 = vadd.f32 %v1730_v22, %v1716_v44  ;;  %v1805_v28 = vsel %vm1804_vm9, %v4233_v52, %v4259_v35 }
 0x1cc   : > { %v4309_v55 = vsel %vm5470_vm8, 2147483647, %v4011_v4  ;;  %v4315_v27 = vsel %vm5471_vm10, 2147483647, %v4017_v10  ;;  %v4323_v39 = vsel %vm5472_vm6, 2147483647, %v4024_v59  ;;  %v1807_v44 = vsel %vm1806_vm0, %v4239_v43, %v4265_v0 }
 0x1cd   : > { %vm859_vm14 = vcmp.lt.s32.totalorder %v5739_v9, 2147483647  ;;  %vm1808_vm15 = vcmp.lt.s32.totalorder %v4247_v53, %v4271_v24  ;;  %vm1810_vm12 = vcmp.lt.s32.totalorder %v1803_v5, %v4277_v62  ;;  %v1732_v22 = vadd.f32 %v1731_v40, %v1717_v56 }
 0x1ce   : > { %v1809_v29 = vsel %vm1808_vm15, %v4247_v53, %v4271_v24  ;;  %v1811_v2 = vsel %vm1810_vm12, %v1803_v5, %v4277_v62  ;;  %vm1812_vm3 = vcmp.lt.s32.totalorder %v1805_v28, %v4285_v3  ;;  %vm1814_vm9 = vcmp.lt.s32.totalorder %v1807_v44, %v4291_v47 }
 0x1cf   : > { %v1813_v17 = vsel %vm1812_vm3, %v1805_v28, %v4285_v3  ;;  %vm1816_vm2 = vcmp.lt.s32.totalorder %v1809_v29, %v4297_v20  ;;  %vm1818_vm0 = vcmp.lt.s32.totalorder %v1811_v2, %v4303_v16  ;;  %v1733_v4 = vadd.f32 %v1732_v22, %v1718_v23 }
 0x1d0   : > { %v1815_v10 = vsel %vm1814_vm9, %v1807_v44, %v4291_v47  ;;  %v1817_v40 = vsel %vm1816_vm2, %v1809_v29, %v4297_v20  ;;  %v1819_v56 = vsel %vm1818_vm0, %v1811_v2, %v4303_v16  ;;  %vm1461_vm15 = vcmp.lt.s32.totalorder %v5708_v18, 2147483647 }
 0x1d1   : > { %vm1820_vm12 = vcmp.lt.s32.totalorder %v1813_v17, %v4309_v55  ;;  %vm1822_vm7 = vcmp.lt.s32.totalorder %v1815_v10, %v4315_v27  ;;  %vm1824_vm3 = vcmp.lt.s32.totalorder %v1817_v40, %v4323_v39  ;;  %v857_v5 = vrot.slane %v4115_v8, 1 }
 0x1d2   : > { %v1734_v28 = vadd.f32 %v1733_v4, %v1719_v45  ;;  %v1821_v49 = vsel %vm1820_vm12, %v1813_v17, %v4309_v55  ;;  %v1823_v23 = vsel %vm1822_vm7, %v1815_v10, %v4315_v27  ;;  %v1825_v44 = vsel %vm1824_vm3, %v1817_v40, %v4323_v39  ;;  %v5752_v4 = vld [vmem:[#allocation125_spill] sm:$0xff] }
 0x1d3   : > { %vm1826_vm2 = vcmp.lt.s32.totalorder %v1819_v56, %v1821_v49  ;;  %vm1828_vm9 = vcmp.lt.s32.totalorder %v1823_v23, %v1825_v44  ;;  %v858_v2 = vadd.f32 %v857_v5, %v4115_v8  ;;  %v997_v29 = vadd.f32 %v3757_v32, %v4076_v15 }
 0x1d4   : > { %v1735_v22 = vadd.f32 %v1734_v28, %v1720_v63  ;;  %v1827_v60 = vsel %vm1826_vm2, %v1819_v56, %v1821_v49  ;;  %v1829_v30 = vsel %vm1828_vm9, %v1823_v23, %v1825_v44  ;;  %vm5473_vm0 = vcmp.eq.s32.totalorder %v5751_v41, %v3759_v13  ;;  %v5754_v56 = vld [vmem:[#allocation33_spill] sm:$0xff]  ;;  %v5757_v23 = vld [vmem:[#allocation78_spill] sm:$0xff] }
 0x1d5   : > { %vm1830_vm1 = vcmp.lt.s32.totalorder %v1827_v60, %v1829_v30  ;;  %v860_v17 = vsel %vm859_vm14, %v858_v2, 0.0  ;;  %v998_v10 = vrot.slane %v997_v29, 4  ;;  %vm1111_vm7 = vcmp.eq.s32.totalorder %v5752_v4, %v3759_v13  ;;  %v5769_v4 = vld [vmem:[#allocation76_spill] sm:$0xff] }
 0x1d6   : > { %v1736_v45 = vadd.f32 %v1735_v22, %v4191_v1  ;;  %v1831_v8 = vsel %vm1830_vm1, %v1827_v60, %v1829_v30  ;;  %v5753_v40 = vsub.f32 1.0, %v4106_v36  ;;  %v894_v15 = vsub.f32 1.0, %v860_v17  ;;  %v5755_v60 = vld [vmem:[#allocation50_spill] sm:$0xff] }
 0x1d7   : > { %v1832_v49 = vrot.slane %v1831_v8, 4  ;;  %v999_v63 = vadd.f32 %v998_v10, %v997_v29  ;;  %v1126_v5 = vsel %vm5473_vm0, %v5754_v56, 0.0  ;;  %v4378_v28 = vsel %vm1111_vm7, %v5699_v11, 0.0 }
 0x1d8   : > { %v4368_v32 = vmul.f32 %v860_v17, %v5753_v40  ;;  %v1737_v30 = vadd.f32 %v1736_v45, %v4197_v61  ;;  %vm5756_vm1 = vcmp.eq.s32.totalorder %v5755_v60, %v5701_v21  ;;  %vm5758_vm14 = vcmp.eq.s32.totalorder %v5757_v23, %v5739_v9  ;;  %v5760_v45 = vld [vmem:[#allocation113_spill] sm:$0xff] }
 0x1d9   : > { %v733_v1 = vsel %vm5756_vm1, %v4106_v36, 0.0  ;;  %v5759_v2 = vmov %v5753_v40  ;;  %vm1833_vm12 = vcmp.lt.s32.totalorder %v1831_v8, %v1832_v49  ;;  %v1000_v11 = vrot.slane %v999_v63, 2 }
 0x1da   : > { %v877_v44 = vsel %vm5758_vm14, %v4368_v32, 0.0  ;;  %v4391_v29 = vmul.f32 %v894_v15, %v5759_v2  ;;  %v4398_v61 = vsel %vm1461_vm15, %v4117_v25, 0.0  ;;  %v1738_v17 = vadd.f32 %v1737_v30, %v4203_v31  ;;  %v5761_v25 = vld [vmem:[#allocation47_spill] sm:$0xff] }
 0x1db   : > { %v4393_v22 = vadd.f32 %v877_v44, %v733_v1  ;;  %v1834_v10 = vsel %vm1833_vm12, %v1831_v8, %v1832_v49  ;;  %vm1004_vm3 = vcmp.lt.s32.totalorder %v5760_v45, 2147483647  ;;  %v1001_v56 = vadd.f32 %v1000_v11, %v999_v63  ;;  %v5763_v8 = vld [vmem:[#allocation53_spill] sm:$0xff] }
 0x1dc   : > { %v1835_v40 = vrot.slane %v1834_v10, 2  ;;  %v1598_v60 = vrot.slane %v4241_v14, 4  ;;  %v4407_v15 = vsel %vm5472_vm6, %v5706_v48, 0.0  ;;  %v1739_v1 = vadd.f32 %v1738_v17, %v4209_v19  ;;  %v5765_v63 = vld [vmem:[#allocation77_spill] sm:$0xff] }
 0x1dd   : > { %vm5762_vm15 = vcmp.eq.s32.totalorder %v5761_v25, %v5708_v18  ;;  %vm5764_vm2 = vcmp.eq.s32.totalorder %v5763_v8, %v5701_v21  ;;  %vm5766_vm9 = vcmp.eq.s32.totalorder %v5765_v63, %v5739_v9  ;;  %v1002_v23 = vrot.slane %v1001_v56, 1  ;;  %v5767_v25 = vld [vmem:[#allocation57_spill] sm:$0xff] }
 0x1de   : > { %v4414_v31 = vsel %vm5762_vm15, %v4398_v61, 0.0  ;;  %v732_v49 = vsel %vm5764_vm2, %v4106_v36, 0.0  ;;  %v876_v30 = vsel %vm5766_vm9, %v4368_v32, 0.0  ;;  %vm1836_vm1 = vcmp.lt.s32.totalorder %v1834_v10, %v1835_v40 }
 0x1df   : > { %v1599_v19 = vadd.f32 %v1598_v60, %v4241_v14  ;;  %v4425_v44 = vadd.f32 %v876_v30, %v732_v49  ;;  %v1740_v2 = vadd.f32 %v1739_v1, %v4215_v34  ;;  %v1837_v11 = vsel %vm1836_vm1, %v1834_v10, %v1835_v40  ;;  %v5771_v34 = vld [vmem:[#allocation54_spill] sm:$0xff] }
 0x1e0   : > { %vm5768_vm14 = vcmp.eq.s32.totalorder %v5767_v25, %v5701_v21  ;;  %v1838_v59 = vrot.slane %v1837_v11, 1  ;;  %v1003_v41 = vadd.f32 %v1002_v23, %v1001_v56  ;;  %vm5770_vm12 = vcmp.eq.s32.totalorder %v5769_v4, %v5739_v9  ;;  %v5773_v1 = vld [vmem:[#allocation58_spill] sm:$0xff] }
 0x1e1   : > { %v731_v8 = vsel %vm5768_vm14, %v4106_v36, 0.0  ;;  %v1600_v63 = vrot.slane %v1599_v19, 2  ;;  %v875_v14 = vsel %vm5770_vm12, %v4368_v32, 0.0  ;;  %v1741_v60 = vadd.f32 %v1740_v2, %v4221_v54  ;;  %v5775_v54 = vld [vmem:[#allocation75_spill] sm:$0xff] }
 0x1e2   : > { %vm5772_vm15 = vcmp.eq.s32.totalorder %v5771_v34, %v5708_v18  ;;  %v4444_v40 = vadd.f32 %v875_v14, %v731_v8  ;;  %vm5774_vm2 = vcmp.eq.s32.totalorder %v5773_v1, %v5708_v18  ;;  %vm1839_vm9 = vcmp.lt.s32.totalorder %v1837_v11, %v1838_v59  ;;  %v5777_v8 = vld [vmem:[#allocation126_spill] sm:$0xff]  ;;  %v5780_v34 = vld [vmem:[#allocation21_spill] sm:$0xff] }
 0x1e3   : > { %v4442_v10 = vsel %vm5772_vm15, %v4398_v61, 0.0  ;;  %v4450_v56 = vsel %vm5774_vm2, %v4398_v61, 0.0  ;;  %v1005_v4 = vsel %vm1004_vm3, %v1003_v41, 0.0  ;;  %v1601_v49 = vadd.f32 %v1600_v63, %v1599_v19  ;;  %v5779_v63 = vld [vmem:[#allocation18_spill] sm:$0xff] }
 0x1e4   : > { %vm5776_vm1 = vcmp.eq.s32.totalorder %v5775_v54, %v5739_v9  ;;  %v4458_v23 = vsel %vm1839_vm9, %v1837_v11, %v1838_v59  ;;  %v4461_v2 = vmul.f32 %v1005_v4, %v4391_v29  ;;  %v1039_v25 = vsub.f32 1.0, %v1005_v4  ;;  %v5778_v11 = vld [vmem:[#allocation16_spill] sm:$0xff]  ;;  %v5782_v4 = vld [vmem:[#allocation29_spill] sm:$0xff] }
 0x1e5   : > { %v874_v30 = vsel %vm5776_vm1, %v4368_v32, 0.0  ;;  %v1141_v14 = vadd.f32 %v5777_v8, %v1126_v5  ;;  %vm5474_vm14 = vcmp.eq.s32.totalorder %v4227_v50, %v4458_v23  ;;  %vm5477_vm3 = vcmp.eq.s32.totalorder %v4233_v52, %v4458_v23 }
 0x1e6   : > { %vm5478_vm12 = vcmp.eq.s32.totalorder %v4239_v43, %v4458_v23  ;;  %vm5479_vm15 = vcmp.eq.s32.totalorder %v4247_v53, %v4458_v23  ;;  %vm5480_vm2 = vcmp.eq.s32.totalorder %v4253_v51, %v4458_v23  ;;  %vm5481_vm9 = vcmp.eq.s32.totalorder %v4259_v35, %v4458_v23 }
 0x1e7   : > { %vm5482_vm1 = vcmp.eq.s32.totalorder %v4265_v0, %v4458_v23  ;;  %vm1848_vm13 = vcmp.eq.s32.totalorder %v4271_v24, %v4458_v23  ;;  %vm1849_vm5 = vcmp.eq.s32.totalorder %v4277_v62, %v4458_v23  ;;  %vm1850_vm4 = vcmp.eq.s32.totalorder %v4285_v3, %v4458_v23 }
 0x1e8   : > { %vm1851_vm11 = vcmp.eq.s32.totalorder %v4291_v47, %v4458_v23  ;;  %vm1852_vm8 = vcmp.eq.s32.totalorder %v4297_v20, %v4458_v23  ;;  %vm1853_vm10 = vcmp.eq.s32.totalorder %v4303_v16, %v4458_v23  ;;  %vm1854_vm6 = vcmp.eq.s32.totalorder %v4309_v55, %v4458_v23 }
 0x1e9   : > { %v1857_v59 = vsel %vm5474_vm14, %v5697_v42, 0.0  ;;  %v1858_v41 = vsel %vm5477_vm3, %v5698_v57, 0.0  ;;  %vm1604_vm0 = vcmp.lt.s32.totalorder %v3851_v6, 2147483647  ;;  %v1859_v5 = vsel %vm5478_vm12, %v5703_v58, 0.0 }
 0x1ea   : > { %v1860_v19 = vsel %vm5479_vm15, %v5704_v37, 0.0  ;;  %v1861_v42 = vsel %vm5480_vm2, %v5705_v38, 0.0  ;;  %v1862_v57 = vsel %vm5481_vm9, %v5710_v26, 0.0  ;;  %v1863_v58 = vsel %vm5482_vm1, %v5711_v12, 0.0 }
 0x1eb   : > { %v1864_v37 = vsel %vm1848_vm13, %v5712_v33, 0.0  ;;  %v4529_v38 = vsel %vm1849_vm5, %v5731_v46, 0.0  ;;  %v4535_v26 = vsel %vm1850_vm4, %v5778_v11, 0.0  ;;  %v4541_v12 = vsel %vm1851_vm11, %v5779_v63, 0.0  ;;  %v5781_v46 = vld [vmem:[#allocation28_spill] sm:$0xff]  ;;  %v5783_v11 = vld [vmem:[#allocation99_spill] sm:$0xff] }
 0x1ec   : > { %v4547_v33 = vsel %vm1852_vm8, %v5780_v34, 0.0  ;;  %v4553_v1 = vsel %vm1853_vm10, %v5781_v46, 0.0  ;;  %v4559_v54 = vsel %vm1854_vm6, %v5782_v4, 0.0  ;;  %v1873_v8 = vadd.f32 %v1858_v41, %v1857_v59  ;;  %v5785_v41 = vld [vmem:[#allocation34_spill] sm:$0xff] }
 0x1ed   : > { %vm5784_vm14 = vcmp.eq.s32.totalorder %v5783_v11, %v5760_v45  ;;  %v1040_v34 = vmul.f32 %v1039_v25, %v4391_v29  ;;  %v1142_v17 = vadd.f32 %v1141_v14, %v4378_v28  ;;  %v1602_v46 = vrot.slane %v1601_v49, 1 }
 0x1ee   : > { %v1022_v63 = vsel %vm5784_vm14, %v4461_v2, 0.0  ;;  %v1742_v52 = vadd.f32 %v1741_v60, %v4407_v15  ;;  %vm1855_vm3 = vcmp.eq.s32.totalorder %v4315_v27, %v4458_v23  ;;  %v1874_v4 = vadd.f32 %v1873_v8, %v1859_v5  ;;  %v5786_v60 = vld [vmem:[#allocation56_spill] sm:$0xff]  ;;  %v5788_v8 = vld [vmem:[#allocation98_spill] sm:$0xff] }
 0x1ef   : > { %v4568_v50 = vadd.f32 %v1022_v63, %v4393_v22  ;;  %v1143_v59 = vrot.slane %v1142_v17, 4  ;;  %vm1856_vm12 = vcmp.eq.s32.totalorder %v4323_v39, %v4458_v23  ;;  %v4579_v29 = vsel %vm1855_vm3, %v5785_v41, 0.0  ;;  %v5790_v41 = vld [vmem:[#allocation49_spill] sm:$0xff] }
 0x1f0   : > { %v1603_v28 = vadd.f32 %v1602_v46, %v1601_v49  ;;  %v1743_v22 = vrot.slane %v1742_v52, 4  ;;  %v4585_v15 = vsel %vm1856_vm12, %v5706_v48, 0.0  ;;  %vm5787_vm14 = vcmp.eq.s32.totalorder %v5786_v60, %v5701_v21 }
 0x1f1   : > { %v730_v25 = vsel %vm5787_vm14, %v4106_v36, 0.0  ;;  %v1875_v14 = vadd.f32 %v1874_v4, %v1860_v19  ;;  %v1144_v5 = vadd.f32 %v1143_v59, %v1142_v17  ;;  %vm5789_vm15 = vcmp.eq.s32.totalorder %v5788_v8, %v5760_v45 }
 0x1f2   : > { %v1021_v11 = vsel %vm5789_vm15, %v4461_v2, 0.0  ;;  %v890_v49 = vadd.f32 %v874_v30, %v730_v25  ;;  %vm1149_vm2 = vcmp.lt.s32.totalorder %v3759_v13, 2147483647  ;;  %v1605_v63 = vsel %vm1604_vm0, %v1603_v28, 0.0  ;;  %v5793_v28 = vld [vmem:[#allocation97_spill] sm:$0xff] }
 0x1f3   : > { %v1744_v48 = vadd.f32 %v1743_v22, %v1742_v52  ;;  %v1037_v46 = vadd.f32 %v1021_v11, %v4425_v44  ;;  %vm5791_vm14 = vcmp.eq.s32.totalorder %v5790_v41, %v5708_v18  ;;  %v1876_v17 = vadd.f32 %v1875_v14, %v1861_v42  ;;  %v5795_v44 = vld [vmem:[#allocation44_spill] sm:$0xff]  ;;  %v5797_v42 = vld [vmem:[#allocation74_spill] sm:$0xff] }
 0x1f4   : > { %v1475_v19 = vsel %vm5791_vm14, %v4398_v61, 0.0  ;;  %v1145_v4 = vrot.slane %v1144_v5, 2  ;;  %v5792_v59 = vsub.f32 1.0, %v4398_v61  ;;  %v1639_v30 = vsub.f32 1.0, %v1605_v63 }
 0x1f5   : > { %vm1749_vm15 = vcmp.lt.s32.totalorder %v4112_v7, 2147483647  ;;  %v1745_v25 = vrot.slane %v1744_v48, 2  ;;  %vm5794_vm0 = vcmp.eq.s32.totalorder %v5793_v28, %v5760_v45  ;;  %vm5796_vm9 = vcmp.eq.s32.totalorder %v5795_v44, %v5701_v21  ;;  %v5801_v44 = vld [vmem:[#allocation116_spill] sm:$0xff] }
 0x1f6   : > { %v4605_v60 = vmul.f32 %v1605_v63, %v5792_v59  ;;  %v1020_v52 = vsel %vm5794_vm0, %v4461_v2, 0.0  ;;  %v729_v22 = vsel %vm5796_vm9, %v4106_v36, 0.0  ;;  %vm5798_vm14 = vcmp.eq.s32.totalorder %v5797_v42, %v5739_v9  ;;  %v5799_v63 = vld [vmem:[#allocation117_spill] sm:$0xff] }
 0x1f7   : > { %v873_v14 = vsel %vm5798_vm14, %v4368_v32, 0.0  ;;  %v1877_v8 = vadd.f32 %v1876_v17, %v1862_v57  ;;  %v1146_v11 = vadd.f32 %v1145_v4, %v1144_v5  ;;  %vm5800_vm1 = vcmp.eq.s32.totalorder %v5799_v63, %v3851_v6  ;;  %v5803_v4 = vld [vmem:[#allocation115_spill] sm:$0xff] }
 0x1f8   : > { %v1622_v41 = vsel %vm5800_vm1, %v4605_v60, 0.0  ;;  %v1640_v28 = vmul.f32 %v1639_v30, %v5792_v59  ;;  %v1746_v53 = vadd.f32 %v1745_v25, %v1744_v48  ;;  %vm5802_vm9 = vcmp.eq.s32.totalorder %v5801_v44, %v3851_v6  ;;  %v5805_v48 = vld [vmem:[#allocation96_spill] sm:$0xff]  ;;  %v5809_v44 = vld [vmem:[#allocation45_spill] sm:$0xff] }
 0x1f9   : > { %v1638_v43 = vadd.f32 %v1622_v41, %v4414_v31  ;;  %v1621_v51 = vsel %vm5802_vm9, %v4605_v60, 0.0  ;;  %v1036_v42 = vadd.f32 %v1020_v52, %v4444_v40  ;;  %v1878_v57 = vadd.f32 %v1877_v8, %v1863_v58  ;;  %v5807_v41 = vld [vmem:[#allocation114_spill] sm:$0xff] }
 0x1fa   : > { %v1147_v5 = vrot.slane %v1146_v11, 1  ;;  %v1637_v17 = vadd.f32 %v1621_v51, %v4442_v10  ;;  %vm5804_vm1 = vcmp.eq.s32.totalorder %v5803_v4, %v3851_v6  ;;  %v1747_v30 = vrot.slane %v1746_v53, 1  ;;  %v5811_v4 = vld [vmem:[#allocation111_spill] sm:$0xff] }
 0x1fb   : > { %v1620_v63 = vsel %vm5804_vm1, %v4605_v60, 0.0  ;;  %vm5806_vm0 = vcmp.eq.s32.totalorder %v5805_v48, %v5760_v45  ;;  %vm5808_vm14 = vcmp.eq.s32.totalorder %v5807_v41, %v3851_v6  ;;  %v1879_v58 = vadd.f32 %v1878_v57, %v1864_v37 }
 0x1fc   : > { %v1636_v31 = vadd.f32 %v1620_v63, %v4450_v56  ;;  %v1019_v25 = vsel %vm5806_vm0, %v4461_v2, 0.0  ;;  %v1619_v40 = vsel %vm5808_vm14, %v4605_v60, 0.0  ;;  %v1148_v51 = vadd.f32 %v1147_v5, %v1146_v11 }
 0x1fd   : > { %v1035_v10 = vadd.f32 %v1019_v25, %v890_v49  ;;  %v1635_v52 = vadd.f32 %v1619_v40, %v1475_v19  ;;  %v1748_v8 = vadd.f32 %v1747_v30, %v1746_v53  ;;  %v889_v59 = vadd.f32 %v873_v14, %v729_v22  ;;  %v5813_v49 = vld [vmem:[#allocation51_spill] sm:$0xff]  ;;  %v5815_v14 = vld [vmem:[#allocation73_spill] sm:$0xff] }
 0x1fe   : > { %vm5810_vm9 = vcmp.eq.s32.totalorder %v5809_v44, %v5708_v18  ;;  %vm5812_vm1 = vcmp.eq.s32.totalorder %v5811_v4, %v3851_v6  ;;  %v1880_v48 = vadd.f32 %v1879_v58, %v4529_v38  ;;  %v1150_v37 = vsel %vm1149_vm2, %v1148_v51, 0.0  ;;  %v5817_v38 = vld [vmem:[#allocation52_spill] sm:$0xff]  ;;  %v5822_v44 = vld [vmem:[#allocation110_spill] sm:$0xff]  ;;  %v5830_v40 = vld [vmem:[#allocation123_spill] sm:$0xff] }
 0x1ff   : > { %v1474_v56 = vsel %vm5810_vm9, %v4398_v61, 0.0  ;;  %v1618_v63 = vsel %vm5812_vm1, %v4605_v60, 0.0  ;;  %vm5814_vm0 = vcmp.eq.s32.totalorder %v5813_v49, %v5701_v21  ;;  %v4661_v19 = vmul.f32 %v1150_v37, %v1040_v34  ;;  %v5820_v51 = vld [vmem:[#allocation124_spill] sm:$0xff]  ;;  %v5826_v37 = vld [vmem:[#allocation14_spill] sm:$0xff] }
 0x200   : > { %v1634_v11 = vadd.f32 %v1618_v63, %v1474_v56  ;;  %v728_v53 = vsel %vm5814_vm0, %v4106_v36, 0.0  ;;  %v1750_v22 = vsel %vm1749_vm15, %v1748_v8, 0.0  ;;  %vm5816_vm14 = vcmp.eq.s32.totalorder %v5815_v14, %v5739_v9 }
 0x201   : > { %v872_v57 = vsel %vm5816_vm14, %v4368_v32, 0.0  ;;  %vm5818_vm2 = vcmp.eq.s32.totalorder %v5817_v38, %v5708_v18  ;;  %v1881_v30 = vadd.f32 %v1880_v48, %v4535_v26  ;;  %v4674_v25 = vmul.f32 %v1750_v22, %v1640_v28  ;;  %v5824_v26 = vld [vmem:[#allocation55_spill] sm:$0xff] }
 0x202   : > { %v1473_v5 = vsel %vm5818_vm2, %v4398_v61, 0.0  ;;  %v1784_v41 = vsub.f32 1.0, %v1750_v22  ;;  %v888_v34 = vadd.f32 %v872_v57, %v728_v53  ;;  %v1167_v58 = vsel %vm1111_vm7, %v4661_v19, 0.0  ;;  %v5828_v57 = vld [vmem:[#allocation13_spill] sm:$0xff] }
 0x203   : > { %vm5821_vm15 = vcmp.eq.s32.totalorder %v5820_v51, %v3759_v13  ;;  %vm5823_vm9 = vcmp.eq.s32.totalorder %v5822_v44, %v3851_v6  ;;  %vm5825_vm1 = vcmp.eq.s32.totalorder %v5824_v26, %v5701_v21  ;;  %v1882_v63 = vadd.f32 %v1881_v30, %v4541_v12 }
 0x204   : > { %v1166_v8 = vsel %vm5821_vm15, %v4661_v19, 0.0  ;;  %v1617_v56 = vsel %vm5823_vm9, %v4605_v60, 0.0  ;;  %v727_v4 = vsel %vm5825_vm1, %v4106_v36, 0.0  ;;  %v1183_v48 = vadd.f32 %v1167_v58, %v4568_v50  ;;  %v5834_v58 = vld [vmem:[#allocation122_spill] sm:$0xff] }
 0x205   : > { %vm5827_vm7 = vcmp.eq.s32.totalorder %v5826_v37, %v4112_v7  ;;  %v4698_v53 = vmul.f32 %v1784_v41, %v1640_v28  ;;  %v1182_v14 = vadd.f32 %v1166_v8, %v1037_v46  ;;  %vm5829_vm0 = vcmp.eq.s32.totalorder %v5828_v57, %v4112_v7  ;;  %v5836_v8 = vld [vmem:[#allocation79_spill] sm:$0xff]  ;;  %v5840_v37 = vld [vmem:[#allocation121_spill] sm:$0xff] }
 0x206   : > { %v1767_v49 = vsel %vm5827_vm7, %v4674_v25, 0.0  ;;  %v1766_v38 = vsel %vm5829_vm0, %v4674_v25, 0.0  ;;  %vm5831_vm14 = vcmp.eq.s32.totalorder %v5830_v40, %v3759_v13  ;;  %v1883_v12 = vadd.f32 %v1882_v63, %v4547_v33  ;;  %1184 = vmatpush.msra.mxu0 %v1183_v48  ;;  %v5842_v57 = vld [vmem:[#allocation27_spill] sm:$0xff] }
 0x207   : > { %v4700_v22 = vadd.f32 %v1767_v49, %v1638_v43  ;;  %v1165_v50 = vsel %vm5831_vm14, %v4661_v19, 0.0  ;;  %v4711_v30 = vadd.f32 %v1766_v38, %v1637_v17  ;;  %v5832_v43 = vld [vmem:[#allocation4_spill] sm:$0xff]  ;;  %vm5835_vm15 = vcmp.eq.s32.totalorder %v5834_v58, %v3759_v13  ;;  %v5852_v58 = vld [vmem:[#allocation93_spill] sm:$0xff] }
 0x208   : > { %v1181_v28 = vadd.f32 %v1165_v50, %v1036_v42  ;;  %vm5833_vm2 = vcmp.eq.s32.totalorder %v5832_v43, %v4112_v7  ;;  %v1164_v51 = vsel %vm5835_vm15, %v4661_v19, 0.0  ;;  %vm5837_vm9 = vcmp.eq.s32.totalorder %v5836_v8, %v4112_v7  ;;  %1185 = vmatpush.msra.mxu0 %v1182_v14  ;;  %v5848_v38 = vld [vmem:[#allocation120_spill] sm:$0xff]  ;;  %v5850_v43 = vld [vmem:[#allocation11_spill] sm:$0xff] }
 0x209   : > { %v1765_v46 = vsel %vm5833_vm2, %v4674_v25, 0.0  ;;  %v1764_v33 = vsel %vm5837_vm9, %v4674_v25, 0.0  ;;  %v1633_v17 = vadd.f32 %v1617_v56, %v1473_v5  ;;  %v1884_v42 = vadd.f32 %v1883_v12, %v4553_v1  ;;  %v5854_v8 = vld [vmem:[#allocation119_spill] sm:$0xff] }
 0x20a   : > { %v4717_v41 = vadd.f32 %v1765_v46, %v1636_v31  ;;  %v1180_v44 = vadd.f32 %v1164_v51, %v1035_v10  ;;  %v4728_v26 = vadd.f32 %v1764_v33, %v1635_v52  ;;  %v5838_v31 = vld [vmem:[#allocation95_spill] sm:$0xff]  ;;  %vm5841_vm7 = vcmp.eq.s32.totalorder %v5840_v37, %v3759_v13  ;;  %v5844_v10 = vld [vmem:[#allocation72_spill] sm:$0xff]  ;;  %1186 = vmatpush.msra.mxu0 %v1181_v28 }
 0x20b   : > { %vm5839_vm1 = vcmp.eq.s32.totalorder %v5838_v31, %v5760_v45  ;;  %v1163_v49 = vsel %vm5841_vm7, %v4661_v19, 0.0  ;;  %vm5843_vm0 = vcmp.eq.s32.totalorder %v5842_v57, %v4112_v7  ;;  %vm5845_vm14 = vcmp.eq.s32.totalorder %v5844_v10, %v5739_v9  ;;  %v5856_v31 = vld [vmem:[#allocation32_spill] sm:$0xff]  ;;  %v5864_v10 = vld [vmem:[#allocation71_spill] sm:$0xff] }
 0x20c   : > { %v1018_v63 = vsel %vm5839_vm1, %v4461_v2, 0.0  ;;  %v1763_v1 = vsel %vm5843_vm0, %v4674_v25, 0.0  ;;  %v871_v52 = vsel %vm5845_vm14, %v4368_v32, 0.0  ;;  %v1885_v5 = vadd.f32 %v1884_v42, %v4559_v54  ;;  %1187 = vmatpush.msra.mxu0 %v1180_v44 }
 0x20d   : > { %v1034_v48 = vadd.f32 %v1018_v63, %v889_v59  ;;  %v4747_v56 = vadd.f32 %v1763_v1, %v1634_v11  ;;  %v5846_v59 = vld [vmem:[#allocation94_spill] sm:$0xff]  ;;  %vm5849_vm15 = vcmp.eq.s32.totalorder %v5848_v38, %v3759_v13  ;;  %vm5851_vm9 = vcmp.eq.s32.totalorder %v5850_v43, %v4112_v7 }
 0x20e   : > { %vm5847_vm2 = vcmp.eq.s32.totalorder %v5846_v59, %v5760_v45  ;;  %v1162_v40 = vsel %vm5849_vm15, %v4661_v19, 0.0  ;;  %v1762_v54 = vsel %vm5851_vm9, %v4674_v25, 0.0  ;;  %v887_v28 = vadd.f32 %v871_v52, %v727_v4  ;;  %v5858_v4 = vld [vmem:[#allocation109_spill] sm:$0xff]  ;;  %v5868_v59 = vld [vmem:[#allocation118_spill] sm:$0xff] }
 0x20f   : > { %v1017_v14 = vsel %vm5847_vm2, %v4461_v2, 0.0  ;;  %v1179_v50 = vadd.f32 %v1163_v49, %v1034_v48  ;;  %v1886_v11 = vadd.f32 %v1885_v5, %v4579_v29  ;;  %v4762_v46 = vadd.f32 %v1762_v54, %v1633_v17  ;;  %v5860_v48 = vld [vmem:[#allocation3_spill] sm:$0xff]  ;;  %v5862_v49 = vld [vmem:[#allocation38_spill] sm:$0xff]  ;;  %v5872_v54 = vld [vmem:[#allocation108_spill] sm:$0xff] }
 0x210   : > { %v1033_v12 = vadd.f32 %v1017_v14, %v888_v34  ;;  %vm5853_vm1 = vcmp.eq.s32.totalorder %v5852_v58, %v5760_v45  ;;  %vm5855_vm7 = vcmp.eq.s32.totalorder %v5854_v8, %v3759_v13  ;;  %vm5857_vm0 = vcmp.eq.s32.totalorder %v5856_v31, %v5708_v18 }
 0x211   : > { %v1016_v51 = vsel %vm5853_vm1, %v4461_v2, 0.0  ;;  %v1161_v34 = vsel %vm5855_vm7, %v4661_v19, 0.0  ;;  %v1472_v29 = vsel %vm5857_vm0, %v4398_v61, 0.0  ;;  %vm5859_vm14 = vcmp.eq.s32.totalorder %v5858_v4, %v3851_v6  ;;  %1188 = vmatpush.msra.mxu0 %v1179_v50 }
 0x212   : > { %v1178_v33 = vadd.f32 %v1162_v40, %v1033_v12  ;;  %v1032_v42 = vadd.f32 %v1016_v51, %v887_v28  ;;  %v1616_v17 = vsel %vm5859_vm14, %v4605_v60, 0.0  ;;  %v1887_v44 = vadd.f32 %v1886_v11, %v4585_v15  ;;  %v5866_v15 = vld [vmem:[#allocation92_spill] sm:$0xff]  ;;  %v5870_v12 = vld [vmem:[#allocation39_spill] sm:$0xff]  ;;  %v5876_v51 = vld [vmem:[#allocation42_spill] sm:$0xff] }
 0x213   : > { %v1632_v63 = vadd.f32 %v1616_v17, %v1472_v29  ;;  %vm5861_vm2 = vcmp.eq.s32.totalorder %v5860_v48, %v4112_v7  ;;  %vm5863_vm15 = vcmp.eq.s32.totalorder %v5862_v49, %v5701_v21  ;;  %vm5865_vm9 = vcmp.eq.s32.totalorder %v5864_v10, %v5739_v9  ;;  %v5874_v11 = vld [vmem:[#allocation8_spill] sm:$0xff]  ;;  %v5880_v17 = vld [vmem:[#allocation91_spill] sm:$0xff]  ;;  %v5882_v48 = vld [vmem:[#allocation82_spill] sm:$0xff] }
 0x214   : > { %v1761_v37 = vsel %vm5861_vm2, %v4674_v25, 0.0  ;;  %v726_v57 = vsel %vm5863_vm15, %v4106_v36, 0.0  ;;  %v1177_v1 = vadd.f32 %v1161_v34, %v1032_v42  ;;  %v870_v52 = vsel %vm5865_vm9, %v4368_v32, 0.0  ;;  %1189 = vmatpush.msra.mxu0 %v1178_v33  ;;  %v5878_v34 = vld [vmem:[#allocation70_spill] sm:$0xff]  ;;  %v5884_v49 = vld [vmem:[#allocation43_spill] sm:$0xff] }
 0x215   : > { %vm5867_vm1 = vcmp.eq.s32.totalorder %v5866_v15, %v5760_v45  ;;  %vm5869_vm7 = vcmp.eq.s32.totalorder %v5868_v59, %v3759_v13  ;;  %v1888_v38 = vrot.slane %v1887_v44, 4  ;;  %v4801_v40 = vadd.f32 %v1761_v37, %v1632_v63 }
 0x216   : > { %v1015_v5 = vsel %vm5867_vm1, %v4461_v2, 0.0  ;;  %v1160_v14 = vsel %vm5869_vm7, %v4661_v19, 0.0  ;;  %v886_v50 = vadd.f32 %v870_v52, %v726_v57  ;;  %vm5871_vm0 = vcmp.eq.s32.totalorder %v5870_v12, %v5708_v18  ;;  %1190 = vmatpush.msra.mxu0 %v1177_v1  ;;  %v5886_v57 = vld [vmem:[#allocation107_spill] sm:$0xff]  ;;  %v5890_v12 = vld [vmem:[#allocation25_spill] sm:$0xff] }
 0x217   : > { %v1471_v43 = vsel %vm5871_vm0, %v4398_v61, 0.0  ;;  %vm5873_vm14 = vcmp.eq.s32.totalorder %v5872_v54, %v3851_v6  ;;  %vm5875_vm2 = vcmp.eq.s32.totalorder %v5874_v11, %v4112_v7  ;;  %vm5877_vm15 = vcmp.eq.s32.totalorder %v5876_v51, %v5701_v21  ;;  %v5892_v54 = vld [vmem:[#allocation69_spill] sm:$0xff]  ;;  %v5894_v51 = vld [vmem:[#allocation90_spill] sm:$0xff] }
 0x218   : > { %v1615_v28 = vsel %vm5873_vm14, %v4605_v60, 0.0  ;;  %v1760_v58 = vsel %vm5875_vm2, %v4674_v25, 0.0  ;;  %v725_v8 = vsel %vm5877_vm15, %v4106_v36, 0.0  ;;  %vm5879_vm9 = vcmp.eq.s32.totalorder %v5878_v34, %v5739_v9 }
 0x219   : > { %v869_v33 = vsel %vm5879_vm9, %v4368_v32, 0.0  ;;  %v1889_v42 = vadd.f32 %v1888_v38, %v1887_v44  ;;  %v1031_v31 = vadd.f32 %v1015_v5, %v886_v50  ;;  %v1631_v29 = vadd.f32 %v1615_v28, %v1471_v43  ;;  %v5888_v38 = vld [vmem:[#allocation59_spill] sm:$0xff] }
 0x21a   : > { %v885_v4 = vadd.f32 %v869_v33, %v725_v8  ;;  %vm1894_vm1 = vcmp.lt.s32.totalorder %v4458_v23, 2147483647  ;;  %vm5881_vm7 = vcmp.eq.s32.totalorder %v5880_v17, %v5760_v45  ;;  %vm5883_vm0 = vcmp.eq.s32.totalorder %v5882_v48, %v3759_v13  ;;  %v5896_v33 = vld [vmem:[#allocation15_spill] sm:$0xff] }
 0x21b   : > { %v1014_v63 = vsel %vm5881_vm7, %v4461_v2, 0.0  ;;  %v1159_v37 = vsel %vm5883_vm0, %v4661_v19, 0.0  ;;  %vm5885_vm14 = vcmp.eq.s32.totalorder %v5884_v49, %v5708_v18  ;;  %vm5887_vm2 = vcmp.eq.s32.totalorder %v5886_v57, %v3851_v6  ;;  %v5902_v49 = vld [vmem:[#allocation24_spill] sm:$0xff] }
 0x21c   : > { %v1470_v44 = vsel %vm5885_vm14, %v4398_v61, 0.0  ;;  %v1614_v1 = vsel %vm5887_vm2, %v4605_v60, 0.0  ;;  %v1890_v10 = vrot.slane %v1889_v42, 2  ;;  %v1176_v52 = vadd.f32 %v1160_v14, %v1031_v31  ;;  %v5904_v57 = vld [vmem:[#allocation48_spill] sm:$0xff] }
 0x21d   : > { %v1776_v15 = vadd.f32 %v1760_v58, %v1631_v29  ;;  %v1030_v5 = vadd.f32 %v1014_v63, %v885_v4  ;;  %v1630_v59 = vadd.f32 %v1614_v1, %v1470_v44  ;;  %vm5889_vm15 = vcmp.eq.s32.totalorder %v5888_v38, %v4112_v7  ;;  %v5898_v29 = vld [vmem:[#allocation26_spill] sm:$0xff]  ;;  %v5910_v38 = vld [vmem:[#allocation19_spill] sm:$0xff] }
 0x21e   : > { %v1759_v50 = vsel %vm5889_vm15, %v4674_v25, 0.0  ;;  %vm5891_vm9 = vcmp.eq.s32.totalorder %v5890_v12, %v5701_v21  ;;  %vm5893_vm7 = vcmp.eq.s32.totalorder %v5892_v54, %v5739_v9  ;;  %v1891_v11 = vadd.f32 %v1890_v10, %v1889_v42  ;;  %1191 = vmatpush.msra.mxu0 %v1176_v52  ;;  %v5900_v42 = vld [vmem:[#allocation106_spill] sm:$0xff]  ;;  %v5906_v10 = vld [vmem:[#allocation68_spill] sm:$0xff] }
 0x21f   : > { %v724_v43 = vsel %vm5891_vm9, %v4106_v36, 0.0  ;;  %v868_v28 = vsel %vm5893_vm7, %v4368_v32, 0.0  ;;  %v1175_v14 = vadd.f32 %v1159_v37, %v1030_v5  ;;  %vm5895_vm0 = vcmp.eq.s32.totalorder %v5894_v51, %v5760_v45  ;;  %v5908_v5 = vld [vmem:[#allocation89_spill] sm:$0xff] }
 0x220   : > { %v884_v58 = vadd.f32 %v868_v28, %v724_v43  ;;  %v1013_v8 = vsel %vm5895_vm0, %v4461_v2, 0.0  ;;  %v1775_v34 = vadd.f32 %v1759_v50, %v1630_v59  ;;  %vm5897_vm14 = vcmp.eq.s32.totalorder %v5896_v33, %v3759_v13  ;;  %v5914_v51 = vld [vmem:[#allocation105_spill] sm:$0xff]  ;;  %v5916_v33 = vld [vmem:[#allocation10_spill] sm:$0xff] }
 0x221   : > { %v1158_v31 = vsel %vm5897_vm14, %v4661_v19, 0.0  ;;  %vm5899_vm2 = vcmp.eq.s32.totalorder %v5898_v29, %v5708_v18  ;;  %vm5901_vm15 = vcmp.eq.s32.totalorder %v5900_v42, %v3851_v6  ;;  %v1892_v63 = vrot.slane %v1891_v11, 1  ;;  %1192 = vmatpush.msra.mxu0 %v1175_v14  ;;  %v5912_v14 = vld [vmem:[#allocation30_spill] sm:$0xff] }
 0x222   : > { %v1469_v4 = vsel %vm5899_vm2, %v4398_v61, 0.0  ;;  %v1613_v17 = vsel %vm5901_vm15, %v4605_v60, 0.0  ;;  %v1029_v48 = vadd.f32 %v1013_v8, %v884_v58  ;;  %vm5903_vm9 = vcmp.eq.s32.totalorder %v5902_v49, %v4112_v7 }
 0x223   : > { %v1629_v37 = vadd.f32 %v1613_v17, %v1469_v4  ;;  %v1758_v44 = vsel %vm5903_vm9, %v4674_v25, 0.0  ;;  %vm5905_vm7 = vcmp.eq.s32.totalorder %v5904_v57, %v5701_v21  ;;  %vm5907_vm0 = vcmp.eq.s32.totalorder %v5906_v10, %v5739_v9 }
 0x224   : > { %v723_v1 = vsel %vm5905_vm7, %v4106_v36, 0.0  ;;  %v867_v52 = vsel %vm5907_vm0, %v4368_v32, 0.0  ;;  %vm5909_vm14 = vcmp.eq.s32.totalorder %v5908_v5, %v5760_v45  ;;  %vm5911_vm2 = vcmp.eq.s32.totalorder %v5910_v38, %v3759_v13 }
 0x225   : > { %v1012_v59 = vsel %vm5909_vm14, %v4461_v2, 0.0  ;;  %v1157_v50 = vsel %vm5911_vm2, %v4661_v19, 0.0  ;;  %v1893_v12 = vadd.f32 %v1892_v63, %v1891_v11  ;;  %v1174_v43 = vadd.f32 %v1158_v31, %v1029_v48  ;;  %v5918_v11 = vld [vmem:[#allocation36_spill] sm:$0xff]  ;;  %v5920_v63 = vld [vmem:[#allocation67_spill] sm:$0xff] }
 0x226   : > { %v1774_v54 = vadd.f32 %v1758_v44, %v1629_v37  ;;  %v883_v28 = vadd.f32 %v867_v52, %v723_v1  ;;  %vm5913_vm15 = vcmp.eq.s32.totalorder %v5912_v14, %v5708_v18  ;;  %vm5915_vm9 = vcmp.eq.s32.totalorder %v5914_v51, %v3851_v6  ;;  %v5922_v44 = vld [vmem:[#allocation88_spill] sm:$0xff]  ;;  %v5924_v1 = vld [vmem:[#allocation62_spill] sm:$0xff] }
 0x227   : > { %v1468_v58 = vsel %vm5913_vm15, %v4398_v61, 0.0  ;;  %v1612_v8 = vsel %vm5915_vm9, %v4605_v60, 0.0  ;;  %vm5917_vm7 = vcmp.eq.s32.totalorder %v5916_v33, %v4112_v7  ;;  %vm5919_vm0 = vcmp.eq.s32.totalorder %v5918_v11, %v5701_v21  ;;  %1193 = vmatpush.msra.mxu0 %v1174_v43  ;;  %v5934_v11 = vld [vmem:[#allocation127_spill] sm:$0xff] }
 0x228   : > { %v1757_v29 = vsel %vm5917_vm7, %v4674_v25, 0.0  ;;  %v722_v31 = vsel %vm5919_vm0, %v4106_v36, 0.0  ;;  %v1895_v4 = vsel %vm1894_vm1, %v1893_v12, 0.0  ;;  %v1028_v42 = vadd.f32 %v1012_v59, %v883_v28  ;;  %v5926_v59 = vld [vmem:[#allocation37_spill] sm:$0xff] }
 0x229   : > { %v1628_v17 = vadd.f32 %v1612_v8, %v1468_v58  ;;  %vm5921_vm14 = vcmp.eq.s32.totalorder %v5920_v63, %v5739_v9  ;;  %v4911_v37 = vmul.f32 %v1895_v4, %v4698_v53  ;;  %vm5923_vm2 = vcmp.eq.s32.totalorder %v5922_v44, %v5760_v45  ;;  %v5928_v53 = vld [vmem:[#allocation103_spill] sm:$0xff]  ;;  %v5938_v4 = vld [vmem:[#allocation66_spill] sm:$0xff] }
 0x22a   : > { %v866_v48 = vsel %vm5921_vm14, %v4368_v32, 0.0  ;;  %v1011_v57 = vsel %vm5923_vm2, %v4461_v2, 0.0  ;;  %vm5925_vm1 = vcmp.eq.s32.totalorder %v5924_v1, %v3759_v13  ;;  %v1173_v52 = vadd.f32 %v1157_v50, %v1028_v42 }
 0x22b   : > { %v882_v49 = vadd.f32 %v866_v48, %v722_v31  ;;  %v1156_v10 = vsel %vm5925_vm1, %v4661_v19, 0.0  ;;  %v1773_v5 = vadd.f32 %v1757_v29, %v1628_v17  ;;  %vm5927_vm15 = vcmp.eq.s32.totalorder %v5926_v59, %v5708_v18  ;;  %v5932_v29 = vld [vmem:[#allocation7_spill] sm:$0xff]  ;;  %v5936_v31 = vld [vmem:[#allocation40_spill] sm:$0xff] }
 0x22c   : > { %v1467_v38 = vsel %vm5927_vm15, %v4398_v61, 0.0  ;;  %vm5929_vm9 = vcmp.eq.s32.totalorder %v5928_v53, %v3851_v6  ;;  %v1912_v43 = vsel %vm1856_vm12, %v4911_v37, 0.0  ;;  %v1911_v50 = vsel %vm1855_vm3, %v4911_v37, 0.0  ;;  %1194 = vmatpush.msra.mxu0 %v1173_v52  ;;  %v5940_v17 = vld [vmem:[#allocation87_spill] sm:$0xff]  ;;  %v5942_v48 = vld [vmem:[#allocation12_spill] sm:$0xff] }
 0x22d   : > { %v1611_v12 = vsel %vm5929_vm9, %v4605_v60, 0.0  ;;  %v1910_v28 = vsel %vm1854_vm6, %v4911_v37, 0.0  ;;  %v1909_v14 = vsel %vm1853_vm10, %v4911_v37, 0.0  ;;  %v1928_v58 = vadd.f32 %v1912_v43, %v4700_v22 }
 0x22e   : > { %v1927_v39 = vadd.f32 %v1911_v50, %v4711_v30  ;;  %v1926_v51 = vadd.f32 %v1910_v28, %v4717_v41  ;;  %v1925_v8 = vadd.f32 %v1909_v14, %v4728_v26  ;;  %v1908_v27 = vsel %vm1852_vm8, %v4911_v37, 0.0  ;;  %v5952_v50 = vld [vmem:[#allocation22_spill] sm:$0xff] }
 0x22f   : > { %v1907_v16 = vsel %vm1851_vm11, %v4911_v37, 0.0  ;;  %v1906_v55 = vsel %vm1850_vm4, %v4911_v37, 0.0  ;;  %v1905_v22 = vsel %vm1849_vm5, %v4911_v37, 0.0  ;;  %1929 = vmatpush.msra.mxu1 %v1928_v58  ;;  %v1924_v30 = vadd.f32 %v1908_v27, %v4747_v56  ;;  %v5954_v58 = vld [vmem:[#allocation65_spill] sm:$0xff]  ;;  %v5958_v27 = vld [vmem:[#allocation60_spill] sm:$0xff] }
 0x230   : > { %v1923_v20 = vadd.f32 %v1907_v16, %v4762_v46  ;;  %v1922_v41 = vadd.f32 %v1906_v55, %v4801_v40  ;;  %v1921_v26 = vadd.f32 %v1905_v22, %v1776_v15  ;;  %v1904_v47 = vsel %vm1848_vm13, %v4911_v37, 0.0 }
 0x231   : > { %vm5930_vm11 = vcmp.eq.s32.totalorder %v4265_v0, %v4458_v23  ;;  %vm5931_vm8 = vcmp.eq.s32.totalorder %v4259_v35, %v4458_v23  ;;  %v1027_v56 = vadd.f32 %v1011_v57, %v882_v49  ;;  %1930 = vmatpush.msra.mxu1 %v1927_v39  ;;  %v4980_v46 = vadd.f32 %v1904_v47, %v1775_v34  ;;  %v5944_v57 = vld [vmem:[#allocation41_spill] sm:$0xff]  ;;  %v5960_v47 = vld [vmem:[#allocation23_spill] sm:$0xff] }
 0x232   : > { %v1903_v3 = vsel %vm5930_vm11, %v4911_v37, 0.0  ;;  %v1902_v62 = vsel %vm5931_vm8, %v4911_v37, 0.0  ;;  %v1627_v24 = vadd.f32 %v1611_v12, %v1467_v38  ;;  %vm5933_vm5 = vcmp.eq.s32.totalorder %v5932_v29, %v4112_v7  ;;  %v5950_v12 = vld [vmem:[#allocation112_spill] sm:$0xff]  ;;  %v5964_v29 = vld [vmem:[#allocation2_spill] sm:$0xff] }
 0x233   : > { %v4982_v40 = vadd.f32 %v1903_v3, %v1774_v54  ;;  %v4984_v15 = vadd.f32 %v1902_v62, %v1773_v5  ;;  %v1172_v33 = vadd.f32 %v1156_v10, %v1027_v56  ;;  %v1756_v0 = vsel %vm5933_vm5, %v4674_v25, 0.0  ;;  %1931 = vmatpush.msra.mxu1 %v1926_v51  ;;  %v5946_v10 = vld [vmem:[#allocation104_spill] sm:$0xff]  ;;  %v5948_v5 = vld [vmem:[#allocation61_spill] sm:$0xff]  ;;  %v5956_v51 = vld [vmem:[#allocation86_spill] sm:$0xff] }
 0x234   : > { %vm5935_vm10 = vcmp.eq.s32.totalorder %v5934_v11, %v4458_v23  ;;  %vm5937_vm6 = vcmp.eq.s32.totalorder %v5936_v31, %v5701_v21  ;;  %v1772_v54 = vadd.f32 %v1756_v0, %v1627_v24  ;;  %vm5939_vm13 = vcmp.eq.s32.totalorder %v5938_v4, %v5739_v9  ;;  %v5962_v62 = vld [vmem:[#allocation102_spill] sm:$0xff]  ;;  %v5970_v4 = vld [vmem:[#allocation64_spill] sm:$0xff] }
 0x235   : > { %v1901_v35 = vsel %vm5935_vm10, %v4911_v37, 0.0  ;;  %v721_v34 = vsel %vm5937_vm6, %v4106_v36, 0.0  ;;  %v865_v42 = vsel %vm5939_vm13, %v4368_v32, 0.0  ;;  %vm5941_vm4 = vcmp.eq.s32.totalorder %v5940_v17, %v5760_v45  ;;  %1195 = vmatpush.msra.mxu0 %v1172_v33  ;;  %1932 = vmatpush.msra.mxu1 %v1925_v8 }
 0x236   : > { %v1010_v63 = vsel %vm5941_vm4, %v4461_v2, 0.0  ;;  %vm5943_vm3 = vcmp.eq.s32.totalorder %v5942_v48, %v3759_v13  ;;  %v881_v44 = vadd.f32 %v865_v42, %v721_v34  ;;  %vm5945_vm12 = vcmp.eq.s32.totalorder %v5944_v57, %v5708_v18  ;;  %v5968_v34 = vld [vmem:[#allocation46_spill] sm:$0xff]  ;;  %v5972_v48 = vld [vmem:[#allocation85_spill] sm:$0xff] }
 0x237   : > { %v1155_v49 = vsel %vm5943_vm3, %v4661_v19, 0.0  ;;  %v1466_v1 = vsel %vm5945_vm12, %v4398_v61, 0.0  ;;  %vm5947_vm7 = vcmp.eq.s32.totalorder %v5946_v10, %v3851_v6  ;;  %vm5949_vm0 = vcmp.eq.s32.totalorder %v5948_v5, %v4112_v7  ;;  %1933 = vmatpush.msra.mxu1 %v1924_v30  ;;  %v5966_v30 = vld [vmem:[#allocation81_spill] sm:$0xff] }
 0x238   : > { %v1610_v52 = vsel %vm5947_vm7, %v4605_v60, 0.0  ;;  %v1755_v59 = vsel %vm5949_vm0, %v4674_v25, 0.0  ;;  %v5022_v38 = vadd.f32 %v1901_v35, %v1772_v54  ;;  %vm5951_vm14 = vcmp.eq.s32.totalorder %v5950_v12, %v4458_v23 }
 0x239   : > { %v1626_v53 = vadd.f32 %v1610_v52, %v1466_v1  ;;  %v1900_v43 = vsel %vm5951_vm14, %v4911_v37, 0.0  ;;  %vm5953_vm2 = vcmp.eq.s32.totalorder %v5952_v50, %v5701_v21  ;;  %v1026_v14 = vadd.f32 %v1010_v63, %v881_v44  ;;  %1934 = vmatpush.msra.mxu1 %v1923_v20  ;;  %v5976_v1 = vld [vmem:[#allocation31_spill] sm:$0xff]  ;;  %v5978_v52 = vld [vmem:[#allocation101_spill] sm:$0xff] }
 0x23a   : > { %v720_v28 = vsel %vm5953_vm2, %v4106_v36, 0.0  ;;  %vm5955_vm1 = vcmp.eq.s32.totalorder %v5954_v58, %v5739_v9  ;;  %vm5957_vm15 = vcmp.eq.s32.totalorder %v5956_v51, %v5760_v45  ;;  %vm5959_vm9 = vcmp.eq.s32.totalorder %v5958_v27, %v3759_v13 }
 0x23b   : > { %v864_v39 = vsel %vm5955_vm1, %v4368_v32, 0.0  ;;  %v1009_v8 = vsel %vm5957_vm15, %v4461_v2, 0.0  ;;  %v1154_v16 = vsel %vm5959_vm9, %v4661_v19, 0.0  ;;  %v1771_v55 = vadd.f32 %v1755_v59, %v1626_v53  ;;  %1935 = vmatpush.msra.mxu1 %v1922_v41  ;;  %v5980_v59 = vld [vmem:[#allocation5_spill] sm:$0xff]  ;;  %v5982_v41 = vld [vmem:[#allocation80_spill] sm:$0xff] }
 0x23c   : > { %v880_v22 = vadd.f32 %v864_v39, %v720_v28  ;;  %vm5961_vm11 = vcmp.eq.s32.totalorder %v5960_v47, %v5708_v18  ;;  %vm5963_vm8 = vcmp.eq.s32.totalorder %v5962_v62, %v3851_v6  ;;  %v1171_v24 = vadd.f32 %v1155_v49, %v1026_v14  ;;  %v5974_v49 = vld [vmem:[#allocation9_spill] sm:$0xff]  ;;  %v5984_v14 = vld [vmem:[#allocation35_spill] sm:$0xff] }
 0x23d   : > { %v1465_v3 = vsel %vm5961_vm11, %v4398_v61, 0.0  ;;  %v1609_v56 = vsel %vm5963_vm8, %v4605_v60, 0.0  ;;  %vm5965_vm5 = vcmp.eq.s32.totalorder %v5964_v29, %v4112_v7  ;;  %vm5967_vm10 = vcmp.eq.s32.totalorder %v5966_v30, %v4458_v23  ;;  %1936 = vmatpush.msra.mxu1 %v1921_v26  ;;  %v5986_v39 = vld [vmem:[#allocation63_spill] sm:$0xff] }
 0x23e   : > { %v1625_v33 = vadd.f32 %v1609_v56, %v1465_v3  ;;  %v1754_v0 = vsel %vm5965_vm5, %v4674_v25, 0.0  ;;  %v1899_v11 = vsel %vm5967_vm10, %v4911_v37, 0.0  ;;  %v1916_v35 = vadd.f32 %v1900_v43, %v1771_v55  ;;  %1196 = vmatpush.msra.mxu0 %v1171_v24 }
 0x23f   : > { %v1025_v31 = vadd.f32 %v1009_v8, %v880_v22  ;;  %vm5969_vm6 = vcmp.eq.s32.totalorder %v5968_v34, %v5701_v21  ;;  %vm5971_vm13 = vcmp.eq.s32.totalorder %v5970_v4, %v5739_v9  ;;  %vm5973_vm4 = vcmp.eq.s32.totalorder %v5972_v48, %v5760_v45  ;;  %v5988_v8 = vld [vmem:[#allocation84_spill] sm:$0xff]  ;;  %1937 = vmatpush.msra.mxu1 %v4980_v46  ;;  %v5990_v22 = vld [vmem:[#allocation6_spill] sm:$0xff] }
 0x240   : > { %v719_v54 = vsel %vm5969_vm6, %v4106_v36, 0.0  ;;  %v863_v42 = vsel %vm5971_vm13, %v4368_v32, 0.0  ;;  %v1770_v17 = vadd.f32 %v1754_v0, %v1625_v33  ;;  %v1008_v20 = vsel %vm5973_vm4, %v4461_v2, 0.0 }
 0x241   : > { %v879_v63 = vadd.f32 %v863_v42, %v719_v54  ;;  %vm5975_vm3 = vcmp.eq.s32.totalorder %v5974_v49, %v3759_v13  ;;  %v1170_v57 = vadd.f32 %v1154_v16, %v1025_v31  ;;  %vm5977_vm12 = vcmp.eq.s32.totalorder %v5976_v1, %v5708_v18  ;;  %1938 = vmatpush.msra.mxu1 %v4982_v40 }
 0x242   : > { %v1153_v44 = vsel %vm5975_vm3, %v4661_v19, 0.0  ;;  %v1464_v10 = vsel %vm5977_vm12, %v4398_v61, 0.0  ;;  %vm5979_vm7 = vcmp.eq.s32.totalorder %v5978_v52, %v3851_v6  ;;  %vm5981_vm0 = vcmp.eq.s32.totalorder %v5980_v59, %v4112_v7 }
 0x243   : > { %v1608_v5 = vsel %vm5979_vm7, %v4605_v60, 0.0  ;;  %v1753_v53 = vsel %vm5981_vm0, %v4674_v25, 0.0  ;;  %v1915_v12 = vadd.f32 %v1899_v11, %v1770_v17  ;;  %v1024_v43 = vadd.f32 %v1008_v20, %v879_v63  ;;  %1197 = vmatpush.msra.mxu0 %v1170_v57  ;;  %1939 = vmatpush.msra.mxu1 %v4984_v15 }
 0x244   : > { %v1624_v50 = vadd.f32 %v1608_v5, %v1464_v10  ;;  %vm5983_vm14 = vcmp.eq.s32.totalorder %v5982_v41, %v4458_v23  ;;  %vm5985_vm2 = vcmp.eq.s32.totalorder %v5984_v14, %v5701_v21  ;;  %vm5987_vm1 = vcmp.eq.s32.totalorder %v5986_v39, %v5739_v9  ;;  %v5992_v21 = vld [vmem:[#allocation17_spill] sm:$0xff] }
 0x245   : > { %v1898_v28 = vsel %vm5983_vm14, %v4911_v37, 0.0  ;;  %v718_v58 = vsel %vm5985_vm2, %v4106_v36, 0.0  ;;  %v862_v51 = vsel %vm5987_vm1, %v4368_v32, 0.0  ;;  %vm5989_vm15 = vcmp.eq.s32.totalorder %v5988_v8, %v5760_v45  ;;  %v5994_v32 = vld [vmem:[#allocation100_spill] sm:$0xff]  ;;  %1940 = vmatpush.msra.mxu1 %v5022_v38 }
 0x246   : > { %v1007_v26 = vsel %vm5989_vm15, %v4461_v2, 0.0  ;;  %v1169_v27 = vadd.f32 %v1153_v44, %v1024_v43  ;;  %v1769_v16 = vadd.f32 %v1753_v53, %v1624_v50  ;;  %v878_v55 = vadd.f32 %v862_v51, %v718_v58  ;;  %v5996_v2 = vld [vmem:[#allocation83_spill] sm:$0xff] }
 0x247   : > { %vm5991_vm9 = vcmp.eq.s32.totalorder %v5990_v22, %v3759_v13  ;;  %vm5993_vm11 = vcmp.eq.s32.totalorder %v5992_v21, %v5708_v18  ;;  %vm5995_vm8 = vcmp.eq.s32.totalorder %v5994_v32, %v3851_v6  ;;  %vm5997_vm5 = vcmp.eq.s32.totalorder %v5996_v2, %v4112_v7  ;;  %v5998_v6 = vld [vmem:[#allocation20_spill] sm:$0xff]  ;;  %1941 = vmatpush.msra.mxu1 %v1916_v35 }
 0x248   : > { %v1152_v36 = vsel %vm5991_vm9, %v4661_v19, 0.0  ;;  %v1463_v9 = vsel %vm5993_vm11, %v4398_v61, 0.0  ;;  %v1607_v45 = vsel %vm5995_vm8, %v4605_v60, 0.0  ;;  %v1752_v46 = vsel %vm5997_vm5, %v4674_v25, 0.0  ;;  %1198 = vmatpush.msra.mxu0 %v1169_v27  ;;  %v267_v25 = vld [vmem:[%s229_s9] sm:$0xff] }
 0x249   : > { %v1914_v13 = vadd.f32 %v1898_v28, %v1769_v16  ;;  %v1023_v19 = vadd.f32 %v1007_v26, %v878_v55  ;;  %v1623_v18 = vadd.f32 %v1607_v45, %v1463_v9  ;;  %vm5999_vm10 = vcmp.eq.s32.totalorder %v5998_v6, %v4458_v23  ;;  %1942 = vmatpush.msra.mxu1 %v1915_v12 }
 0x24a   : > { %v1897_v61 = vsel %vm5999_vm10, %v4911_v37, 0.0 }
 0x24b   : > { %v1168_v60 = vadd.f32 %v1152_v36, %v1023_v19  ;;  %v1768_v7 = vadd.f32 %v1752_v46, %v1623_v18  ;;  %1943 = vmatpush.msra.mxu1 %v1914_v13 }
 0x24d   : > { %1199 = vmatpush.msra.mxu0 %v1168_v60  ;;  %v1913_v47 = vadd.f32 %v1897_v61, %v1768_v7 }
 0x24e   : > { %1200 = vmatmul.f32.vlgmr.msra.gmra.mxu0 %v267_v25 }
 0x24f   : > { %1944 = vmatpush.msra.mxu1 %v1913_v47 }
 0x250   : > { %1945 = vmatmul.f32.vlgmr.msra.gmra.mxu1 %v267_v25 }
 0x2cb   : > { %v1201_v23 = vpop.f32.mrf.mxu0 }
 0x2cc   : > { %1204 = vst [vmem:[%s234_s12] sm:$0x7] %v1201_v23 }
 0x2cd   : > { %v1946_v37 = vpop.f32.mrf.mxu1 }
 0x2ce   : > { %1949 = vst [vmem:[%s234_s12 + $0x4] sm:$0x7] %v1946_v37 }
 0x2cf PF: > { %s14_s15 = sadd.s32 1, %s2082_s15  }
 0x2d0   : > { %p11_p4 = scmp.ge.s32.totalorder %s14_s15, 4  }
 0x2d2   :  { %13 = sbr.rel (!%p11_p4) target bundleno = 1 (0x1), region = 72 }

</bundles_post_ra>
